<compile_context>
chip_gen: v5e
topology: v5e:2x2
jax: 0.10.0
libtpu: 0.0.40
codegen_flags: <defaults>
</compile_context>

<pallas_src>
import functools

import jax
import jax.numpy as jnp
from jax.experimental import pallas as pl
from jax.experimental.pallas import tpu as pltpu

# ---------------- config (small, consistent with the module) ----------------
B, T, N = 2, 8, 4            # batch, temporal_dim, spatial_dim (= input_size)
HIDDEN = 32
NODE_DIM = 16
OUT_SIZE = 4
GCN_DEPTH = 2
PROPALPHA = 0.05
TANHALPHA = 3.0
SUBGRAPH = min(20, N)        # subgraph_size = min(subgraph_size, input_size)
NUM_LAYERS = 1
LEAKY = 0.01                 # torch LeakyReLU default negative_slope

_F32 = jnp.float32
_BF16 = jnp.bfloat16


def _leaky(x):
    return jnp.where(x > 0, x, LEAKY * x)


def _bdot(a, b):
    """bf16-operand MXU matmul with f32 accumulation."""
    return jnp.dot(a.astype(_BF16), b.astype(_BF16), preferred_element_type=jnp.float32)


# ---------------- Pallas kernel 1: graph_encoder + encoder (+spatial emb) ----------------
def _prep_kernel(xcol_ref, gelw_ref, gelb_ref, gewih_ref, gewhh_ref,
                 gibias_ref, gebhhn_ref, encw_ref, encb_ref, sp_ref,
                 emb_ref, z_ref, *, t_len, m0, nd, hdim):
    xcol = xcol_ref[...]                                            # (T*M0, 1)

    # graph_encoder: Linear(1, ND) + LeakyReLU; fused-gate GRU (1 MXU issue per step).
    glin = _leaky(xcol * gelw_ref[...] + gelb_ref[...])             # (T*M0, ND)
    wih = gewih_ref[...].astype(_BF16)                              # (ND, 3ND)  cols [r|z|n]
    whh = gewhh_ref[...].astype(_BF16)                              # (ND, 3ND)
    bhh_n = gebhhn_ref[...]                                         # (1, ND)
    gi = (_bdot(glin, wih) + gibias_ref[...]).reshape(t_len, m0, 3 * nd)

    h = jnp.zeros((m0, nd), _F32)
    for t in range(t_len):                                          # unrolled; h stays in regs
        gh = _bdot(h, whh)                                          # (M0, 3ND)
        g = gi[t]
        r = jax.nn.sigmoid(g[:, :nd] + gh[:, :nd])
        u = jax.nn.sigmoid(g[:, nd:2 * nd] + gh[:, nd:2 * nd])
        n = jnp.tanh(g[:, 2 * nd:] + r * (gh[:, 2 * nd:] + bhh_n))
        h = (1.0 - u) * n + u * h
    emb_ref[...] = h                                                # last hidden state only

    # encoder: Linear(1, H) + LeakyReLU + spatial embedding
    enc = _leaky(xcol * encw_ref[...] + encb_ref[...])              # (T*M0, H)
    z_ref[...] = enc.reshape(t_len, m0, hdim) + sp_ref[...][None, :, :]


def prep_call(x_col, gelw, gelb, gewih, gewhh, gibias, gebhhn, encw, encb, sp_bn):
    kernel = functools.partial(_prep_kernel, t_len=T, m0=B * N, nd=NODE_DIM, hdim=HIDDEN)
    return pl.pallas_call(
        kernel,
        out_shape=(jax.ShapeDtypeStruct((B * N, NODE_DIM), _F32),
                   jax.ShapeDtypeStruct((T, B * N, HIDDEN), _F32)),
        in_specs=[pl.BlockSpec(memory_space=pltpu.MemorySpace.VMEM)] * 10,
        out_specs=(pl.BlockSpec(memory_space=pltpu.MemorySpace.VMEM),) * 2,
    )(x_col, gelw, gelb, gewih, gewhh, gibias, gebhhn, encw, encb, sp_bn)


# ---------------- Pallas kernel 2: fused GraphRNNLayer (both branches) + heads ----------------
def _layer_kernel(x_ref, wih6_ref, whhbig_ref, gibias_ref, bhhn_ref,
                  linw_ref, linb_ref, abig_ref, headw_ref, headb_ref,
                  out_ref, *, t_len, bn, hdim, depth, alpha):
    H = hdim
    x2d = x_ref[...].reshape(t_len * bn, H)

    # All 6 hoisted input projections (3 gates x 2 directions) in ONE matmul.
    wih6 = wih6_ref[...].astype(_BF16)                              # (H, 6H) [rf zf nf rb zb nb]
    gi = (_bdot(x2d, wih6) + gibias_ref[...]).reshape(t_len, bn, 6 * H)

    whh = whhbig_ref[...].astype(_BF16)                             # (2H, 6H) [rf rb zf zb nf nb]
    bhh_n = bhhn_ref[...]                                           # (1, 2H)  [nf | nb]

    # bidirectional GRU: fwd+bwd fused into ONE (bn,2H)x(2H,6H) matmul per step;
    # time reversal of the bwd direction handled by in-kernel indexing (tb).
    h_cat = jnp.zeros((bn, 2 * H), _F32)                            # [h_fwd | h_bwd]
    hf = [None] * t_len
    hb = [None] * t_len
    for t in range(t_len):                                          # fully unrolled
        tb = t_len - 1 - t
        gf = gi[t]
        gb = gi[tb]
        gh = _bdot(h_cat, whh)                                      # (bn, 6H)
        gi_r = jnp.concatenate([gf[:, 0 * H:1 * H], gb[:, 3 * H:4 * H]], axis=1)
        gi_z = jnp.concatenate([gf[:, 1 * H:2 * H], gb[:, 4 * H:5 * H]], axis=1)
        gi_n = jnp.concatenate([gf[:, 2 * H:3 * H], gb[:, 5 * H:6 * H]], axis=1)
        r = jax.nn.sigmoid(gi_r + gh[:, 0:2 * H])
        u = jax.nn.sigmoid(gi_z + gh[:, 2 * H:4 * H])
        n = jnp.tanh(gi_n + r * (gh[:, 4 * H:6 * H] + bhh_n))
        h_cat = (1.0 - u) * n + u * h_cat
        hf[t] = h_cat[:, :H]
        hb[tb] = h_cat[:, H:]

    # post-RNN Linear(2H, H) + ReLU (dropout: eval -> identity); single matmul on the
    # original [fwd;bwd]-stacked weight.
    hcat2d = jnp.concatenate(
        [jnp.concatenate([hf[t], hb[t]], axis=1) for t in range(t_len)], axis=0)   # (T*bn, 2H)
    feat = jnp.maximum(_bdot(hcat2d, linw_ref[...]) + linb_ref[...], 0.0)           # (T*bn, H)

    # duplicate rows for the static/dyna branches only now (identical pre-mixprop since
    # the rnn/Linear weights are shared and the layer inputs are identical).
    feat3 = feat.reshape(t_len, bn, H)
    feat2 = jnp.concatenate([feat3, feat3], axis=1).reshape(t_len * 2 * bn, H)

    # mixprop: adjacency is block-diagonal over (time, branch, batch) -> ONE matmul per hop.
    a = abig_ref[...].astype(_BF16)                                 # (T*2bn, T*2bn)
    h = feat2
    for _ in range(depth):
        h = alpha * feat2 + (1.0 - alpha) * _bdot(a, h)

    # both output heads fused into one (H, 2*OUT) matmul; wrapper selects lanes per branch.
    out_ref[...] = _leaky(_bdot(h, headw_ref[...]) + headb_ref[...])   # (T*2bn, 2*OUT)


def layer_call(x_tbh, rnn_p, abig_t, head_p):
    bn = B * N
    kernel = functools.partial(_layer_kernel, t_len=T, bn=bn, hdim=HIDDEN,
                               depth=GCN_DEPTH, alpha=PROPALPHA)
    return pl.pallas_call(
        kernel,
        out_shape=jax.ShapeDtypeStruct((T * 2 * bn, 2 * OUT_SIZE), _F32),
        in_specs=[pl.BlockSpec(memory_space=pltpu.MemorySpace.VMEM)] * 10,
        out_specs=pl.BlockSpec(memory_space=pltpu.MemorySpace.VMEM),
    )(x_tbh, *rnn_p, abig_t, *head_p)


# ---------------- JAX glue (adjacency construction, parameter packing) ----------------
def static_adjacency(p):
    nv1 = jnp.tanh(TANHALPHA * (p["gc_emb1"] @ p["gc_lin1_w"] + p["gc_lin1_b"]))
    nv2 = jnp.tanh(TANHALPHA * (p["gc_emb2"] @ p["gc_lin2_w"] + p["gc_lin2_b"]))
    a = nv1 @ nv2.T - nv2 @ nv1.T
    return jax.nn.relu(jnp.tanh(TANHALPHA * a))                     # (N, N)


def dyna_adjacency(p, emb):
    nv1 = jnp.tanh(TANHALPHA * (emb @ p["dgc_lin1_w"] + p["dgc_lin1_b"]))
    nv2 = jnp.tanh(TANHALPHA * (emb @ p["dgc_lin2_w"] + p["dgc_lin2_b"]))
    a = jnp.einsum("bid,bjd->bij", nv1, nv2) - jnp.einsum("bid,bjd->bij", nv2, nv1)
    return jax.nn.relu(jnp.tanh(TANHALPHA * a))                     # (B, N, N)


def topk_sparse(adj, k):
    # TODO(synk): keeps >=k entries on ties (torch.topk keeps exactly k); no-op when k == N.
    thresh = jnp.sort(adj, axis=-1)[..., -k]
    return adj * (adj >= thresh[..., None]).astype(adj.dtype)


def normalize_adj(adj):
    a = adj + jnp.eye(adj.shape[-1], dtype=adj.dtype)
    return a / jnp.sum(a, axis=-1, keepdims=True)


def _pack_bidir_gru(wih_f, whh_f, bih_f, bhh_f, wih_b, whh_b, bih_b, bhh_b, h):
    """Pack fwd/bwd GRU params for the fused single-matmul-per-step recurrence.

    Returns:
      wih6    (h, 6h):  input projection, columns [r_f z_f n_f r_b z_b n_b]
      whh_big (2h, 6h): block-diagonal recurrent projection, columns [r_f r_b z_f z_b n_f n_b],
                        rows [h_fwd ; h_bwd]
      gibias  (1, 6h):  b_ih (+ b_hh folded for r/z gates), layout matching wih6 columns
      bhh_n   (1, 2h):  n-gate b_hh [fwd | bwd] (kept separate: it is multiplied by r)
    """
    z = jnp.zeros((h, h), _F32)
    rf, zf, nf = whh_f[:, :h], whh_f[:, h:2 * h], whh_f[:, 2 * h:]
    rb, zb, nb = whh_b[:, :h], whh_b[:, h:2 * h], whh_b[:, 2 * h:]
    whh_big = jnp.concatenate([
        jnp.concatenate([rf, z, zf, z, nf, z], axis=1),
        jnp.concatenate([z, rb, z, zb, z, nb], axis=1)], axis=0)
    wih6 = jnp.concatenate([wih_f, wih_b], axis=1)
    zero_h = jnp.zeros((h,), _F32)
    gib_f = bih_f + jnp.concatenate([bhh_f[:h], bhh_f[h:2 * h], zero_h])
    gib_b = bih_b + jnp.concatenate([bhh_b[:h], bhh_b[h:2 * h], zero_h])
    gibias = jnp.concatenate([gib_f, gib_b]).reshape(1, 6 * h)
    bhh_n = jnp.concatenate([bhh_f[2 * h:], bhh_b[2 * h:]]).reshape(1, 2 * h)
    return wih6, whh_big, gibias, bhh_n


def srdgru_forward(p, inputs):
    bs, t_len, n = inputs.shape
    bn = bs * n
    nd = NODE_DIM

    static_adp = static_adjacency(p)

    # ---- prep kernel: graph_encoder (last GRU state) + encoder(+spatial emb) ----
    x_col = inputs.transpose(1, 0, 2).reshape(t_len * bn, 1)       # row = t*(B*N) + b*N + n
    ge_gibias = (p["ge_bih"] + jnp.concatenate(
        [p["ge_bhh"][:nd], p["ge_bhh"][nd:2 * nd], jnp.zeros((nd,), _F32)])).reshape(1, 3 * nd)
    ge_bhh_n = p["ge_bhh"][2 * nd:].reshape(1, nd)
    sp_bn = jnp.tile(p["spatial_emb"], (bs, 1))                     # (B*N, H), row b*N+n -> emb[n]
    emb_flat, z = prep_call(x_col, p["ge_lin_w"], p["ge_lin_b"].reshape(1, -1),
                            p["ge_wih"], p["ge_whh"], ge_gibias, ge_bhh_n,
                            p["enc_w"], p["enc_b"].reshape(1, -1), sp_bn)
    emb = emb_flat.reshape(bs, n, NODE_DIM)

    # TODO(synk): minmax_loss (gdistance_fro between dyna/static adjacency) is a side-effect
    #             training attribute, not a forward output; skipped here.
    dyna_adp = topk_sparse(dyna_adjacency(p, emb), SUBGRAPH)
    adp = topk_sparse(static_adp, SUBGRAPH)

    # normalized block-diagonal adjacency over stacked (branch, batch) groups, then over time
    blocks = jnp.concatenate([jnp.tile(normalize_adj(adp)[None], (bs, 1, 1)),
                              normalize_adj(dyna_adp)], axis=0)     # (2B, N, N)
    abig = jnp.einsum("gh,gij->gihj", jnp.eye(2 * bs, dtype=_F32), blocks
                      ).reshape(2 * bn, 2 * bn)
    abig_t = jnp.kron(jnp.eye(t_len, dtype=_F32), abig)             # (T*2BN, T*2BN)

    rnn_p = _pack_bidir_gru(p["rnn_wih_f"], p["rnn_whh_f"], p["rnn_bih_f"], p["rnn_bhh_f"],
                            p["rnn_wih_b"], p["rnn_whh_b"], p["rnn_bih_b"], p["rnn_bhh_b"],
                            HIDDEN) + (p["rnn_lin_w"], p["rnn_lin_b"].reshape(1, -1))
    head_p = (jnp.concatenate([p["out_w"], p["out_dyna_w"]], axis=1),
              jnp.concatenate([p["out_b"], p["out_dyna_b"]]).reshape(1, -1))

    # ---- fused regressive layer: bidir GRU + Linear + ReLU + mixprop + heads ----
    # TODO(synk): NUM_LAYERS > 1 would need a general layer-kernel variant (separate branch
    #             inputs, re-enabled per-layer feat output); config here is num_layers=1 so the
    #             weight-shared GRU/Linear run once at B*N rows and duplicate only for mixprop.
    assert NUM_LAYERS == 1
    out2d = layer_call(z, rnn_p, abig_t, head_p)                    # (T*2BN, 2*OUT)

    out3 = out2d.reshape(t_len, 2 * bn, 2 * OUT_SIZE)
    hs = out3[:, :bn, :OUT_SIZE]                                    # static branch, static head
    hd = out3[:, bn:, OUT_SIZE:]                                    # dyna branch, dyna head

    def finalize(h_tbn):                                            # (T, B*N, OUT) -> (B, N*OUT, T)
        return (h_tbn.reshape(t_len, bs, n, OUT_SIZE)
                .transpose(1, 2, 3, 0)
                .reshape(bs, n * OUT_SIZE, t_len))

    outs_static = finalize(hs)
    outs_dyna = finalize(hd)
    return outs_static, outs_static[:, :, -1], outs_dyna, outs_dyna[:, :, -1]


# ---------------- deterministic parameter init ----------------
def init_params(key):
    keys = iter(jax.random.split(key, 40))

    def nxt(shape, scale=0.1):
        return scale * jax.random.normal(next(keys), shape, dtype=jnp.float32)

    return {
        # graph_constructor (static)
        "gc_emb1": nxt((N, NODE_DIM)), "gc_emb2": nxt((N, NODE_DIM)),
        "gc_lin1_w": nxt((NODE_DIM, NODE_DIM)), "gc_lin1_b": nxt((NODE_DIM,)),
        "gc_lin2_w": nxt((NODE_DIM, NODE_DIM)), "gc_lin2_b": nxt((NODE_DIM,)),
        # dyna_graph_constructor
        "dgc_lin1_w": nxt((NODE_DIM, NODE_DIM)), "dgc_lin1_b": nxt((NODE_DIM,)),
        "dgc_lin2_w": nxt((NODE_DIM, NODE_DIM)), "dgc_lin2_b": nxt((NODE_DIM,)),
        # graph_encoder: Linear(1, node_dim) + GRU(node_dim, node_dim)
        "ge_lin_w": nxt((1, NODE_DIM)), "ge_lin_b": nxt((NODE_DIM,)),
        "ge_wih": nxt((NODE_DIM, 3 * NODE_DIM)), "ge_whh": nxt((NODE_DIM, 3 * NODE_DIM)),
        "ge_bih": nxt((3 * NODE_DIM,)), "ge_bhh": nxt((3 * NODE_DIM,)),
        # encoder: Linear(1, hidden)
        "enc_w": nxt((1, HIDDEN)), "enc_b": nxt((HIDDEN,)),
        # spatial embedding
        "spatial_emb": nxt((N, HIDDEN)),
        # regressive bidirectional GRU (shared between static/dyna branches) + Linear(2H, H)
        "rnn_wih_f": nxt((HIDDEN, 3 * HIDDEN)), "rnn_whh_f": nxt((HIDDEN, 3 * HIDDEN)),
        "rnn_bih_f": nxt((3 * HIDDEN,)), "rnn_bhh_f": nxt((3 * HIDDEN,)),
        "rnn_wih_b": nxt((HIDDEN, 3 * HIDDEN)), "rnn_whh_b": nxt((HIDDEN, 3 * HIDDEN)),
        "rnn_bih_b": nxt((3 * HIDDEN,)), "rnn_bhh_b": nxt((3 * HIDDEN,)),
        "rnn_lin_w": nxt((2 * HIDDEN, HIDDEN)), "rnn_lin_b": nxt((HIDDEN,)),
        # output heads
        "out_w": nxt((HIDDEN, OUT_SIZE)), "out_b": nxt((OUT_SIZE,)),
        "out_dyna_w": nxt((HIDDEN, OUT_SIZE)), "out_dyna_b": nxt((OUT_SIZE,)),
    }


if __name__ == "__main__":
    key = jax.random.PRNGKey(0)
    pkey, xkey = jax.random.split(key)
    params = init_params(pkey)
    x = jax.random.normal(xkey, (B, T, N), dtype=jnp.float32)

    outs = jax.jit(srdgru_forward)(params, x)
    outs = jax.block_until_ready(outs)

    assert outs[0].shape == (B, N * OUT_SIZE, T)
    assert outs[1].shape == (B, N * OUT_SIZE)
    assert outs[2].shape == (B, N * OUT_SIZE, T)
    assert outs[3].shape == (B, N * OUT_SIZE)
    assert all(bool(jnp.all(jnp.isfinite(o))) for o in outs)
    print("KERNEL_OK")
</pallas_src>

<mosaic_0001>
module attributes {stable_mosaic.version = 11 : i64} {
  func.func @_prep_kernel(%arg0: memref<64x1xf32, #tpu.memory_space<vmem>>, %arg1: memref<1x16xf32, #tpu.memory_space<vmem>>, %arg2: memref<1x16xf32, #tpu.memory_space<vmem>>, %arg3: memref<16x48xf32, #tpu.memory_space<vmem>>, %arg4: memref<16x48xf32, #tpu.memory_space<vmem>>, %arg5: memref<1x48xf32, #tpu.memory_space<vmem>>, %arg6: memref<1x16xf32, #tpu.memory_space<vmem>>, %arg7: memref<1x32xf32, #tpu.memory_space<vmem>>, %arg8: memref<1x32xf32, #tpu.memory_space<vmem>>, %arg9: memref<8x32xf32, #tpu.memory_space<vmem>>, %arg10: memref<8x16xf32, #tpu.memory_space<vmem>>, %arg11: memref<8x8x32xf32, #tpu.memory_space<vmem>>) attributes {dimension_semantics = [], scalar_prefetch = 0 : i64, scratch_operands = 0 : i64, tpu.core_type = #tpu.core_type<tc>} {
    %c0 = arith.constant 0 : index
    %c0_0 = arith.constant 0 : index
    %0 = vector.load %arg0[%c0, %c0_0] : memref<64x1xf32, #tpu.memory_space<vmem>>, vector<64x1xf32>
    %c0_1 = arith.constant 0 : index
    %c0_2 = arith.constant 0 : index
    %1 = vector.load %arg1[%c0_1, %c0_2] : memref<1x16xf32, #tpu.memory_space<vmem>>, vector<1x16xf32>
    %2 = vector.broadcast %0 : vector<64x1xf32> to vector<64x16xf32>
    %3 = vector.broadcast %1 : vector<1x16xf32> to vector<64x16xf32>
    %4 = arith.mulf %2, %3 : vector<64x16xf32>
    %c0_3 = arith.constant 0 : index
    %c0_4 = arith.constant 0 : index
    %5 = vector.load %arg2[%c0_3, %c0_4] : memref<1x16xf32, #tpu.memory_space<vmem>>, vector<1x16xf32>
    %6 = vector.broadcast %5 : vector<1x16xf32> to vector<64x16xf32>
    %7 = arith.addf %4, %6 : vector<64x16xf32>
    %cst = arith.constant 0.000000e+00 : f32
    %8 = vector.broadcast %cst : f32 to vector<64x16xf32>
    %9 = arith.cmpf ogt, %7, %8 : vector<64x16xf32>
    %cst_5 = arith.constant 0.00999999977 : f32
    %10 = vector.broadcast %cst_5 : f32 to vector<64x16xf32>
    %11 = arith.mulf %10, %7 : vector<64x16xf32>
    %12 = arith.select %9, %7, %11 : vector<64x16xi1>, vector<64x16xf32>
    %c0_6 = arith.constant 0 : index
    %c0_7 = arith.constant 0 : index
    %13 = vector.load %arg3[%c0_6, %c0_7] : memref<16x48xf32, #tpu.memory_space<vmem>>, vector<16x48xf32>
    %14 = arith.truncf %13 : vector<16x48xf32> to vector<16x48xbf16>
    %c0_8 = arith.constant 0 : index
    %c0_9 = arith.constant 0 : index
    %15 = vector.load %arg4[%c0_8, %c0_9] : memref<16x48xf32, #tpu.memory_space<vmem>>, vector<16x48xf32>
    %16 = arith.truncf %15 : vector<16x48xf32> to vector<16x48xbf16>
    %c0_10 = arith.constant 0 : index
    %c0_11 = arith.constant 0 : index
    %17 = vector.load %arg6[%c0_10, %c0_11] : memref<1x16xf32, #tpu.memory_space<vmem>>, vector<1x16xf32>
    %18 = arith.truncf %12 : vector<64x16xf32> to vector<64x16xbf16>
    %cst_12 = arith.constant dense<0.000000e+00> : vector<64x48xf32>
    %19 = tpu.matmul %18, %14, %cst_12 {dimension_numbers = #tpu.dot_dimension_numbers<[1], [0], [0], [1], [0, 0, 1, 1], [], []>} : vector<64x16xbf16>, vector<16x48xbf16>, vector<64x48xf32> -> vector<64x48xf32>
    %c0_13 = arith.constant 0 : index
    %c0_14 = arith.constant 0 : index
    %20 = vector.load %arg5[%c0_13, %c0_14] : memref<1x48xf32, #tpu.memory_space<vmem>>, vector<1x48xf32>
    %21 = vector.broadcast %20 : vector<1x48xf32> to vector<64x48xf32>
    %22 = arith.addf %19, %21 : vector<64x48xf32>
    %23 = vector.shape_cast %22 : vector<64x48xf32> to vector<8x8x48xf32>
    %cst_15 = arith.constant 0.000000e+00 : f32
    %24 = vector.broadcast %cst_15 : f32 to vector<8x16xf32>
    %25 = arith.truncf %24 : vector<8x16xf32> to vector<8x16xbf16>
    %cst_16 = arith.constant dense<0.000000e+00> : vector<8x48xf32>
    %26 = tpu.matmul %25, %16, %cst_16 {dimension_numbers = #tpu.dot_dimension_numbers<[1], [0], [0], [1], [0, 0, 1, 1], [], []>} : vector<8x16xbf16>, vector<16x48xbf16>, vector<8x48xf32> -> vector<8x48xf32>
    %27 = vector.extract_strided_slice %23 {offsets = [0, 0, 0], sizes = [1, 8, 48], strides = [1, 1, 1]} : vector<8x8x48xf32> to vector<1x8x48xf32>
    %28 = vector.shape_cast %27 : vector<1x8x48xf32> to vector<8x48xf32>
    %29 = vector.extract_strided_slice %28 {offsets = [0, 0], sizes = [8, 16], strides = [1, 1]} : vector<8x48xf32> to vector<8x16xf32>
    %30 = vector.extract_strided_slice %26 {offsets = [0, 0], sizes = [8, 16], strides = [1, 1]} : vector<8x48xf32> to vector<8x16xf32>
    %31 = arith.addf %29, %30 : vector<8x16xf32>
    %32 = arith.negf %31 : vector<8x16xf32>
    %33 = math.exp %32 : vector<8x16xf32>
    %cst_17 = arith.constant 1.000000e+00 : f32
    %34 = vector.broadcast %cst_17 : f32 to vector<8x16xf32>
    %35 = arith.addf %34, %33 : vector<8x16xf32>
    %36 = arith.divf %34, %35 : vector<8x16xf32>
    %37 = vector.extract_strided_slice %28 {offsets = [0, 16], sizes = [8, 16], strides = [1, 1]} : vector<8x48xf32> to vector<8x16xf32>
    %38 = vector.extract_strided_slice %26 {offsets = [0, 16], sizes = [8, 16], strides = [1, 1]} : vector<8x48xf32> to vector<8x16xf32>
    %39 = arith.addf %37, %38 : vector<8x16xf32>
    %40 = arith.negf %39 : vector<8x16xf32>
    %41 = math.exp %40 : vector<8x16xf32>
    %cst_18 = arith.constant 1.000000e+00 : f32
    %42 = vector.broadcast %cst_18 : f32 to vector<8x16xf32>
    %43 = arith.addf %42, %41 : vector<8x16xf32>
    %44 = arith.divf %42, %43 : vector<8x16xf32>
    %45 = vector.extract_strided_slice %28 {offsets = [0, 32], sizes = [8, 16], strides = [1, 1]} : vector<8x48xf32> to vector<8x16xf32>
    %46 = vector.extract_strided_slice %26 {offsets = [0, 32], sizes = [8, 16], strides = [1, 1]} : vector<8x48xf32> to vector<8x16xf32>
    %47 = vector.broadcast %17 : vector<1x16xf32> to vector<8x16xf32>
    %48 = arith.addf %46, %47 : vector<8x16xf32>
    %49 = arith.mulf %36, %48 : vector<8x16xf32>
    %50 = arith.addf %45, %49 : vector<8x16xf32>
    %51 = math.tanh %50 : vector<8x16xf32>
    %cst_19 = arith.constant 1.000000e+00 : f32
    %52 = vector.broadcast %cst_19 : f32 to vector<8x16xf32>
    %53 = arith.subf %52, %44 : vector<8x16xf32>
    %54 = arith.mulf %53, %51 : vector<8x16xf32>
    %55 = arith.mulf %44, %24 : vector<8x16xf32>
    %56 = arith.addf %54, %55 : vector<8x16xf32>
    %57 = arith.truncf %56 : vector<8x16xf32> to vector<8x16xbf16>
    %cst_20 = arith.constant dense<0.000000e+00> : vector<8x48xf32>
    %58 = tpu.matmul %57, %16, %cst_20 {dimension_numbers = #tpu.dot_dimension_numbers<[1], [0], [0], [1], [0, 0, 1, 1], [], []>} : vector<8x16xbf16>, vector<16x48xbf16>, vector<8x48xf32> -> vector<8x48xf32>
    %59 = vector.extract_strided_slice %23 {offsets = [1, 0, 0], sizes = [1, 8, 48], strides = [1, 1, 1]} : vector<8x8x48xf32> to vector<1x8x48xf32>
    %60 = vector.shape_cast %59 : vector<1x8x48xf32> to vector<8x48xf32>
    %61 = vector.extract_strided_slice %60 {offsets = [0, 0], sizes = [8, 16], strides = [1, 1]} : vector<8x48xf32> to vector<8x16xf32>
    %62 = vector.extract_strided_slice %58 {offsets = [0, 0], sizes = [8, 16], strides = [1, 1]} : vector<8x48xf32> to vector<8x16xf32>
    %63 = arith.addf %61, %62 : vector<8x16xf32>
    %64 = arith.negf %63 : vector<8x16xf32>
    %65 = math.exp %64 : vector<8x16xf32>
    %cst_21 = arith.constant 1.000000e+00 : f32
    %66 = vector.broadcast %cst_21 : f32 to vector<8x16xf32>
    %67 = arith.addf %66, %65 : vector<8x16xf32>
    %68 = arith.divf %66, %67 : vector<8x16xf32>
    %69 = vector.extract_strided_slice %60 {offsets = [0, 16], sizes = [8, 16], strides = [1, 1]} : vector<8x48xf32> to vector<8x16xf32>
    %70 = vector.extract_strided_slice %58 {offsets = [0, 16], sizes = [8, 16], strides = [1, 1]} : vector<8x48xf32> to vector<8x16xf32>
    %71 = arith.addf %69, %70 : vector<8x16xf32>
    %72 = arith.negf %71 : vector<8x16xf32>
    %73 = math.exp %72 : vector<8x16xf32>
    %cst_22 = arith.constant 1.000000e+00 : f32
    %74 = vector.broadcast %cst_22 : f32 to vector<8x16xf32>
    %75 = arith.addf %74, %73 : vector<8x16xf32>
    %76 = arith.divf %74, %75 : vector<8x16xf32>
    %77 = vector.extract_strided_slice %60 {offsets = [0, 32], sizes = [8, 16], strides = [1, 1]} : vector<8x48xf32> to vector<8x16xf32>
    %78 = vector.extract_strided_slice %58 {offsets = [0, 32], sizes = [8, 16], strides = [1, 1]} : vector<8x48xf32> to vector<8x16xf32>
    %79 = vector.broadcast %17 : vector<1x16xf32> to vector<8x16xf32>
    %80 = arith.addf %78, %79 : vector<8x16xf32>
    %81 = arith.mulf %68, %80 : vector<8x16xf32>
    %82 = arith.addf %77, %81 : vector<8x16xf32>
    %83 = math.tanh %82 : vector<8x16xf32>
    %cst_23 = arith.constant 1.000000e+00 : f32
    %84 = vector.broadcast %cst_23 : f32 to vector<8x16xf32>
    %85 = arith.subf %84, %76 : vector<8x16xf32>
    %86 = arith.mulf %85, %83 : vector<8x16xf32>
    %87 = arith.mulf %76, %56 : vector<8x16xf32>
    %88 = arith.addf %86, %87 : vector<8x16xf32>
    %89 = arith.truncf %88 : vector<8x16xf32> to vector<8x16xbf16>
    %cst_24 = arith.constant dense<0.000000e+00> : vector<8x48xf32>
    %90 = tpu.matmul %89, %16, %cst_24 {dimension_numbers = #tpu.dot_dimension_numbers<[1], [0], [0], [1], [0, 0, 1, 1], [], []>} : vector<8x16xbf16>, vector<16x48xbf16>, vector<8x48xf32> -> vector<8x48xf32>
    %91 = vector.extract_strided_slice %23 {offsets = [2, 0, 0], sizes = [1, 8, 48], strides = [1, 1, 1]} : vector<8x8x48xf32> to vector<1x8x48xf32>
    %92 = vector.shape_cast %91 : vector<1x8x48xf32> to vector<8x48xf32>
    %93 = vector.extract_strided_slice %92 {offsets = [0, 0], sizes = [8, 16], strides = [1, 1]} : vector<8x48xf32> to vector<8x16xf32>
    %94 = vector.extract_strided_slice %90 {offsets = [0, 0], sizes = [8, 16], strides = [1, 1]} : vector<8x48xf32> to vector<8x16xf32>
    %95 = arith.addf %93, %94 : vector<8x16xf32>
    %96 = arith.negf %95 : vector<8x16xf32>
    %97 = math.exp %96 : vector<8x16xf32>
    %cst_25 = arith.constant 1.000000e+00 : f32
    %98 = vector.broadcast %cst_25 : f32 to vector<8x16xf32>
    %99 = arith.addf %98, %97 : vector<8x16xf32>
    %100 = arith.divf %98, %99 : vector<8x16xf32>
    %101 = vector.extract_strided_slice %92 {offsets = [0, 16], sizes = [8, 16], strides = [1, 1]} : vector<8x48xf32> to vector<8x16xf32>
    %102 = vector.extract_strided_slice %90 {offsets = [0, 16], sizes = [8, 16], strides = [1, 1]} : vector<8x48xf32> to vector<8x16xf32>
    %103 = arith.addf %101, %102 : vector<8x16xf32>
    %104 = arith.negf %103 : vector<8x16xf32>
    %105 = math.exp %104 : vector<8x16xf32>
    %cst_26 = arith.constant 1.000000e+00 : f32
    %106 = vector.broadcast %cst_26 : f32 to vector<8x16xf32>
    %107 = arith.addf %106, %105 : vector<8x16xf32>
    %108 = arith.divf %106, %107 : vector<8x16xf32>
    %109 = vector.extract_strided_slice %92 {offsets = [0, 32], sizes = [8, 16], strides = [1, 1]} : vector<8x48xf32> to vector<8x16xf32>
    %110 = vector.extract_strided_slice %90 {offsets = [0, 32], sizes = [8, 16], strides = [1, 1]} : vector<8x48xf32> to vector<8x16xf32>
    %111 = vector.broadcast %17 : vector<1x16xf32> to vector<8x16xf32>
    %112 = arith.addf %110, %111 : vector<8x16xf32>
    %113 = arith.mulf %100, %112 : vector<8x16xf32>
    %114 = arith.addf %109, %113 : vector<8x16xf32>
    %115 = math.tanh %114 : vector<8x16xf32>
    %cst_27 = arith.constant 1.000000e+00 : f32
    %116 = vector.broadcast %cst_27 : f32 to vector<8x16xf32>
    %117 = arith.subf %116, %108 : vector<8x16xf32>
    %118 = arith.mulf %117, %115 : vector<8x16xf32>
    %119 = arith.mulf %108, %88 : vector<8x16xf32>
    %120 = arith.addf %118, %119 : vector<8x16xf32>
    %121 = arith.truncf %120 : vector<8x16xf32> to vector<8x16xbf16>
    %cst_28 = arith.constant dense<0.000000e+00> : vector<8x48xf32>
    %122 = tpu.matmul %121, %16, %cst_28 {dimension_numbers = #tpu.dot_dimension_numbers<[1], [0], [0], [1], [0, 0, 1, 1], [], []>} : vector<8x16xbf16>, vector<16x48xbf16>, vector<8x48xf32> -> vector<8x48xf32>
    %123 = vector.extract_strided_slice %23 {offsets = [3, 0, 0], sizes = [1, 8, 48], strides = [1, 1, 1]} : vector<8x8x48xf32> to vector<1x8x48xf32>
    %124 = vector.shape_cast %123 : vector<1x8x48xf32> to vector<8x48xf32>
    %125 = vector.extract_strided_slice %124 {offsets = [0, 0], sizes = [8, 16], strides = [1, 1]} : vector<8x48xf32> to vector<8x16xf32>
    %126 = vector.extract_strided_slice %122 {offsets = [0, 0], sizes = [8, 16], strides = [1, 1]} : vector<8x48xf32> to vector<8x16xf32>
    %127 = arith.addf %125, %126 : vector<8x16xf32>
    %128 = arith.negf %127 : vector<8x16xf32>
    %129 = math.exp %128 : vector<8x16xf32>
    %cst_29 = arith.constant 1.000000e+00 : f32
    %130 = vector.broadcast %cst_29 : f32 to vector<8x16xf32>
    %131 = arith.addf %130, %129 : vector<8x16xf32>
    %132 = arith.divf %130, %131 : vector<8x16xf32>
    %133 = vector.extract_strided_slice %124 {offsets = [0, 16], sizes = [8, 16], strides = [1, 1]} : vector<8x48xf32> to vector<8x16xf32>
    %134 = vector.extract_strided_slice %122 {offsets = [0, 16], sizes = [8, 16], strides = [1, 1]} : vector<8x48xf32> to vector<8x16xf32>
    %135 = arith.addf %133, %134 : vector<8x16xf32>
    %136 = arith.negf %135 : vector<8x16xf32>
    %137 = math.exp %136 : vector<8x16xf32>
    %cst_30 = arith.constant 1.000000e+00 : f32
    %138 = vector.broadcast %cst_30 : f32 to vector<8x16xf32>
    %139 = arith.addf %138, %137 : vector<8x16xf32>
    %140 = arith.divf %138, %139 : vector<8x16xf32>
    %141 = vector.extract_strided_slice %124 {offsets = [0, 32], sizes = [8, 16], strides = [1, 1]} : vector<8x48xf32> to vector<8x16xf32>
    %142 = vector.extract_strided_slice %122 {offsets = [0, 32], sizes = [8, 16], strides = [1, 1]} : vector<8x48xf32> to vector<8x16xf32>
    %143 = vector.broadcast %17 : vector<1x16xf32> to vector<8x16xf32>
    %144 = arith.addf %142, %143 : vector<8x16xf32>
    %145 = arith.mulf %132, %144 : vector<8x16xf32>
    %146 = arith.addf %141, %145 : vector<8x16xf32>
    %147 = math.tanh %146 : vector<8x16xf32>
    %cst_31 = arith.constant 1.000000e+00 : f32
    %148 = vector.broadcast %cst_31 : f32 to vector<8x16xf32>
    %149 = arith.subf %148, %140 : vector<8x16xf32>
    %150 = arith.mulf %149, %147 : vector<8x16xf32>
    %151 = arith.mulf %140, %120 : vector<8x16xf32>
    %152 = arith.addf %150, %151 : vector<8x16xf32>
    %153 = arith.truncf %152 : vector<8x16xf32> to vector<8x16xbf16>
    %cst_32 = arith.constant dense<0.000000e+00> : vector<8x48xf32>
    %154 = tpu.matmul %153, %16, %cst_32 {dimension_numbers = #tpu.dot_dimension_numbers<[1], [0], [0], [1], [0, 0, 1, 1], [], []>} : vector<8x16xbf16>, vector<16x48xbf16>, vector<8x48xf32> -> vector<8x48xf32>
    %155 = vector.extract_strided_slice %23 {offsets = [4, 0, 0], sizes = [1, 8, 48], strides = [1, 1, 1]} : vector<8x8x48xf32> to vector<1x8x48xf32>
    %156 = vector.shape_cast %155 : vector<1x8x48xf32> to vector<8x48xf32>
    %157 = vector.extract_strided_slice %156 {offsets = [0, 0], sizes = [8, 16], strides = [1, 1]} : vector<8x48xf32> to vector<8x16xf32>
    %158 = vector.extract_strided_slice %154 {offsets = [0, 0], sizes = [8, 16], strides = [1, 1]} : vector<8x48xf32> to vector<8x16xf32>
    %159 = arith.addf %157, %158 : vector<8x16xf32>
    %160 = arith.negf %159 : vector<8x16xf32>
    %161 = math.exp %160 : vector<8x16xf32>
    %cst_33 = arith.constant 1.000000e+00 : f32
    %162 = vector.broadcast %cst_33 : f32 to vector<8x16xf32>
    %163 = arith.addf %162, %161 : vector<8x16xf32>
    %164 = arith.divf %162, %163 : vector<8x16xf32>
    %165 = vector.extract_strided_slice %156 {offsets = [0, 16], sizes = [8, 16], strides = [1, 1]} : vector<8x48xf32> to vector<8x16xf32>
    %166 = vector.extract_strided_slice %154 {offsets = [0, 16], sizes = [8, 16], strides = [1, 1]} : vector<8x48xf32> to vector<8x16xf32>
    %167 = arith.addf %165, %166 : vector<8x16xf32>
    %168 = arith.negf %167 : vector<8x16xf32>
    %169 = math.exp %168 : vector<8x16xf32>
    %cst_34 = arith.constant 1.000000e+00 : f32
    %170 = vector.broadcast %cst_34 : f32 to vector<8x16xf32>
    %171 = arith.addf %170, %169 : vector<8x16xf32>
    %172 = arith.divf %170, %171 : vector<8x16xf32>
    %173 = vector.extract_strided_slice %156 {offsets = [0, 32], sizes = [8, 16], strides = [1, 1]} : vector<8x48xf32> to vector<8x16xf32>
    %174 = vector.extract_strided_slice %154 {offsets = [0, 32], sizes = [8, 16], strides = [1, 1]} : vector<8x48xf32> to vector<8x16xf32>
    %175 = vector.broadcast %17 : vector<1x16xf32> to vector<8x16xf32>
    %176 = arith.addf %174, %175 : vector<8x16xf32>
    %177 = arith.mulf %164, %176 : vector<8x16xf32>
    %178 = arith.addf %173, %177 : vector<8x16xf32>
    %179 = math.tanh %178 : vector<8x16xf32>
    %cst_35 = arith.constant 1.000000e+00 : f32
    %180 = vector.broadcast %cst_35 : f32 to vector<8x16xf32>
    %181 = arith.subf %180, %172 : vector<8x16xf32>
    %182 = arith.mulf %181, %179 : vector<8x16xf32>
    %183 = arith.mulf %172, %152 : vector<8x16xf32>
    %184 = arith.addf %182, %183 : vector<8x16xf32>
    %185 = arith.truncf %184 : vector<8x16xf32> to vector<8x16xbf16>
    %cst_36 = arith.constant dense<0.000000e+00> : vector<8x48xf32>
    %186 = tpu.matmul %185, %16, %cst_36 {dimension_numbers = #tpu.dot_dimension_numbers<[1], [0], [0], [1], [0, 0, 1, 1], [], []>} : vector<8x16xbf16>, vector<16x48xbf16>, vector<8x48xf32> -> vector<8x48xf32>
    %187 = vector.extract_strided_slice %23 {offsets = [5, 0, 0], sizes = [1, 8, 48], strides = [1, 1, 1]} : vector<8x8x48xf32> to vector<1x8x48xf32>
    %188 = vector.shape_cast %187 : vector<1x8x48xf32> to vector<8x48xf32>
    %189 = vector.extract_strided_slice %188 {offsets = [0, 0], sizes = [8, 16], strides = [1, 1]} : vector<8x48xf32> to vector<8x16xf32>
    %190 = vector.extract_strided_slice %186 {offsets = [0, 0], sizes = [8, 16], strides = [1, 1]} : vector<8x48xf32> to vector<8x16xf32>
    %191 = arith.addf %189, %190 : vector<8x16xf32>
    %192 = arith.negf %191 : vector<8x16xf32>
    %193 = math.exp %192 : vector<8x16xf32>
    %cst_37 = arith.constant 1.000000e+00 : f32
    %194 = vector.broadcast %cst_37 : f32 to vector<8x16xf32>
    %195 = arith.addf %194, %193 : vector<8x16xf32>
    %196 = arith.divf %194, %195 : vector<8x16xf32>
    %197 = vector.extract_strided_slice %188 {offsets = [0, 16], sizes = [8, 16], strides = [1, 1]} : vector<8x48xf32> to vector<8x16xf32>
    %198 = vector.extract_strided_slice %186 {offsets = [0, 16], sizes = [8, 16], strides = [1, 1]} : vector<8x48xf32> to vector<8x16xf32>
    %199 = arith.addf %197, %198 : vector<8x16xf32>
    %200 = arith.negf %199 : vector<8x16xf32>
    %201 = math.exp %200 : vector<8x16xf32>
    %cst_38 = arith.constant 1.000000e+00 : f32
    %202 = vector.broadcast %cst_38 : f32 to vector<8x16xf32>
    %203 = arith.addf %202, %201 : vector<8x16xf32>
    %204 = arith.divf %202, %203 : vector<8x16xf32>
    %205 = vector.extract_strided_slice %188 {offsets = [0, 32], sizes = [8, 16], strides = [1, 1]} : vector<8x48xf32> to vector<8x16xf32>
    %206 = vector.extract_strided_slice %186 {offsets = [0, 32], sizes = [8, 16], strides = [1, 1]} : vector<8x48xf32> to vector<8x16xf32>
    %207 = vector.broadcast %17 : vector<1x16xf32> to vector<8x16xf32>
    %208 = arith.addf %206, %207 : vector<8x16xf32>
    %209 = arith.mulf %196, %208 : vector<8x16xf32>
    %210 = arith.addf %205, %209 : vector<8x16xf32>
    %211 = math.tanh %210 : vector<8x16xf32>
    %cst_39 = arith.constant 1.000000e+00 : f32
    %212 = vector.broadcast %cst_39 : f32 to vector<8x16xf32>
    %213 = arith.subf %212, %204 : vector<8x16xf32>
    %214 = arith.mulf %213, %211 : vector<8x16xf32>
    %215 = arith.mulf %204, %184 : vector<8x16xf32>
    %216 = arith.addf %214, %215 : vector<8x16xf32>
    %217 = arith.truncf %216 : vector<8x16xf32> to vector<8x16xbf16>
    %cst_40 = arith.constant dense<0.000000e+00> : vector<8x48xf32>
    %218 = tpu.matmul %217, %16, %cst_40 {dimension_numbers = #tpu.dot_dimension_numbers<[1], [0], [0], [1], [0, 0, 1, 1], [], []>} : vector<8x16xbf16>, vector<16x48xbf16>, vector<8x48xf32> -> vector<8x48xf32>
    %219 = vector.extract_strided_slice %23 {offsets = [6, 0, 0], sizes = [1, 8, 48], strides = [1, 1, 1]} : vector<8x8x48xf32> to vector<1x8x48xf32>
    %220 = vector.shape_cast %219 : vector<1x8x48xf32> to vector<8x48xf32>
    %221 = vector.extract_strided_slice %220 {offsets = [0, 0], sizes = [8, 16], strides = [1, 1]} : vector<8x48xf32> to vector<8x16xf32>
    %222 = vector.extract_strided_slice %218 {offsets = [0, 0], sizes = [8, 16], strides = [1, 1]} : vector<8x48xf32> to vector<8x16xf32>
    %223 = arith.addf %221, %222 : vector<8x16xf32>
    %224 = arith.negf %223 : vector<8x16xf32>
    %225 = math.exp %224 : vector<8x16xf32>
    %cst_41 = arith.constant 1.000000e+00 : f32
    %226 = vector.broadcast %cst_41 : f32 to vector<8x16xf32>
    %227 = arith.addf %226, %225 : vector<8x16xf32>
    %228 = arith.divf %226, %227 : vector<8x16xf32>
    %229 = vector.extract_strided_slice %220 {offsets = [0, 16], sizes = [8, 16], strides = [1, 1]} : vector<8x48xf32> to vector<8x16xf32>
    %230 = vector.extract_strided_slice %218 {offsets = [0, 16], sizes = [8, 16], strides = [1, 1]} : vector<8x48xf32> to vector<8x16xf32>
    %231 = arith.addf %229, %230 : vector<8x16xf32>
    %232 = arith.negf %231 : vector<8x16xf32>
    %233 = math.exp %232 : vector<8x16xf32>
    %cst_42 = arith.constant 1.000000e+00 : f32
    %234 = vector.broadcast %cst_42 : f32 to vector<8x16xf32>
    %235 = arith.addf %234, %233 : vector<8x16xf32>
    %236 = arith.divf %234, %235 : vector<8x16xf32>
    %237 = vector.extract_strided_slice %220 {offsets = [0, 32], sizes = [8, 16], strides = [1, 1]} : vector<8x48xf32> to vector<8x16xf32>
    %238 = vector.extract_strided_slice %218 {offsets = [0, 32], sizes = [8, 16], strides = [1, 1]} : vector<8x48xf32> to vector<8x16xf32>
    %239 = vector.broadcast %17 : vector<1x16xf32> to vector<8x16xf32>
    %240 = arith.addf %238, %239 : vector<8x16xf32>
    %241 = arith.mulf %228, %240 : vector<8x16xf32>
    %242 = arith.addf %237, %241 : vector<8x16xf32>
    %243 = math.tanh %242 : vector<8x16xf32>
    %cst_43 = arith.constant 1.000000e+00 : f32
    %244 = vector.broadcast %cst_43 : f32 to vector<8x16xf32>
    %245 = arith.subf %244, %236 : vector<8x16xf32>
    %246 = arith.mulf %245, %243 : vector<8x16xf32>
    %247 = arith.mulf %236, %216 : vector<8x16xf32>
    %248 = arith.addf %246, %247 : vector<8x16xf32>
    %249 = arith.truncf %248 : vector<8x16xf32> to vector<8x16xbf16>
    %cst_44 = arith.constant dense<0.000000e+00> : vector<8x48xf32>
    %250 = tpu.matmul %249, %16, %cst_44 {dimension_numbers = #tpu.dot_dimension_numbers<[1], [0], [0], [1], [0, 0, 1, 1], [], []>} : vector<8x16xbf16>, vector<16x48xbf16>, vector<8x48xf32> -> vector<8x48xf32>
    %251 = vector.extract_strided_slice %23 {offsets = [7, 0, 0], sizes = [1, 8, 48], strides = [1, 1, 1]} : vector<8x8x48xf32> to vector<1x8x48xf32>
    %252 = vector.shape_cast %251 : vector<1x8x48xf32> to vector<8x48xf32>
    %253 = vector.extract_strided_slice %252 {offsets = [0, 0], sizes = [8, 16], strides = [1, 1]} : vector<8x48xf32> to vector<8x16xf32>
    %254 = vector.extract_strided_slice %250 {offsets = [0, 0], sizes = [8, 16], strides = [1, 1]} : vector<8x48xf32> to vector<8x16xf32>
    %255 = arith.addf %253, %254 : vector<8x16xf32>
    %256 = arith.negf %255 : vector<8x16xf32>
    %257 = math.exp %256 : vector<8x16xf32>
    %cst_45 = arith.constant 1.000000e+00 : f32
    %258 = vector.broadcast %cst_45 : f32 to vector<8x16xf32>
    %259 = arith.addf %258, %257 : vector<8x16xf32>
    %260 = arith.divf %258, %259 : vector<8x16xf32>
    %261 = vector.extract_strided_slice %252 {offsets = [0, 16], sizes = [8, 16], strides = [1, 1]} : vector<8x48xf32> to vector<8x16xf32>
    %262 = vector.extract_strided_slice %250 {offsets = [0, 16], sizes = [8, 16], strides = [1, 1]} : vector<8x48xf32> to vector<8x16xf32>
    %263 = arith.addf %261, %262 : vector<8x16xf32>
    %264 = arith.negf %263 : vector<8x16xf32>
    %265 = math.exp %264 : vector<8x16xf32>
    %cst_46 = arith.constant 1.000000e+00 : f32
    %266 = vector.broadcast %cst_46 : f32 to vector<8x16xf32>
    %267 = arith.addf %266, %265 : vector<8x16xf32>
    %268 = arith.divf %266, %267 : vector<8x16xf32>
    %269 = vector.extract_strided_slice %252 {offsets = [0, 32], sizes = [8, 16], strides = [1, 1]} : vector<8x48xf32> to vector<8x16xf32>
    %270 = vector.extract_strided_slice %250 {offsets = [0, 32], sizes = [8, 16], strides = [1, 1]} : vector<8x48xf32> to vector<8x16xf32>
    %271 = vector.broadcast %17 : vector<1x16xf32> to vector<8x16xf32>
    %272 = arith.addf %270, %271 : vector<8x16xf32>
    %273 = arith.mulf %260, %272 : vector<8x16xf32>
    %274 = arith.addf %269, %273 : vector<8x16xf32>
    %275 = math.tanh %274 : vector<8x16xf32>
    %cst_47 = arith.constant 1.000000e+00 : f32
    %276 = vector.broadcast %cst_47 : f32 to vector<8x16xf32>
    %277 = arith.subf %276, %268 : vector<8x16xf32>
    %278 = arith.mulf %277, %275 : vector<8x16xf32>
    %279 = arith.mulf %268, %248 : vector<8x16xf32>
    %280 = arith.addf %278, %279 : vector<8x16xf32>
    %c0_48 = arith.constant 0 : index
    %c0_49 = arith.constant 0 : index
    %281 = vector.load %arg10[%c0_48, %c0_49] : memref<8x16xf32, #tpu.memory_space<vmem>>, vector<8x16xf32>
    tpu.vector_store %arg10[%c0_48, %c0_49], %280 {strides = array<i32>} : memref<8x16xf32, #tpu.memory_space<vmem>>, vector<8x16xf32>,
    %c0_50 = arith.constant 0 : index
    %c0_51 = arith.constant 0 : index
    %282 = vector.load %arg7[%c0_50, %c0_51] : memref<1x32xf32, #tpu.memory_space<vmem>>, vector<1x32xf32>
    %283 = vector.broadcast %0 : vector<64x1xf32> to vector<64x32xf32>
    %284 = vector.broadcast %282 : vector<1x32xf32> to vector<64x32xf32>
    %285 = arith.mulf %283, %284 : vector<64x32xf32>
    %c0_52 = arith.constant 0 : index
    %c0_53 = arith.constant 0 : index
    %286 = vector.load %arg8[%c0_52, %c0_53] : memref<1x32xf32, #tpu.memory_space<vmem>>, vector<1x32xf32>
    %287 = vector.broadcast %286 : vector<1x32xf32> to vector<64x32xf32>
    %288 = arith.addf %285, %287 : vector<64x32xf32>
    %cst_54 = arith.constant 0.000000e+00 : f32
    %289 = vector.broadcast %cst_54 : f32 to vector<64x32xf32>
    %290 = arith.cmpf ogt, %288, %289 : vector<64x32xf32>
    %cst_55 = arith.constant 0.00999999977 : f32
    %291 = vector.broadcast %cst_55 : f32 to vector<64x32xf32>
    %292 = arith.mulf %291, %288 : vector<64x32xf32>
    %293 = arith.select %290, %288, %292 : vector<64x32xi1>, vector<64x32xf32>
    %294 = vector.shape_cast %293 : vector<64x32xf32> to vector<8x8x32xf32>
    %c0_56 = arith.constant 0 : index
    %c0_57 = arith.constant 0 : index
    %295 = vector.load %arg9[%c0_56, %c0_57] : memref<8x32xf32, #tpu.memory_space<vmem>>, vector<8x32xf32>
    %296 = vector.shape_cast %295 : vector<8x32xf32> to vector<1x8x32xf32>
    %297 = vector.broadcast %296 : vector<1x8x32xf32> to vector<8x8x32xf32>
    %298 = arith.addf %294, %297 : vector<8x8x32xf32>
    %c0_58 = arith.constant 0 : index
    %c0_59 = arith.constant 0 : index
    %c0_60 = arith.constant 0 : index
    %299 = vector.load %arg11[%c0_58, %c0_59, %c0_60] : memref<8x8x32xf32, #tpu.memory_space<vmem>>, vector<8x8x32xf32>
    tpu.vector_store %arg11[%c0_58, %c0_59, %c0_60], %298 {strides = array<i32>} : memref<8x8x32xf32, #tpu.memory_space<vmem>>, vector<8x8x32xf32>,
    return
  }
}

module attributes {stable_mosaic.version = 11 : i64} {
  func.func @_layer_kernel(%arg0: memref<8x8x32xf32, #tpu.memory_space<vmem>>, %arg1: memref<32x192xf32, #tpu.memory_space<vmem>>, %arg2: memref<64x192xf32, #tpu.memory_space<vmem>>, %arg3: memref<1x192xf32, #tpu.memory_space<vmem>>, %arg4: memref<1x64xf32, #tpu.memory_space<vmem>>, %arg5: memref<64x32xf32, #tpu.memory_space<vmem>>, %arg6: memref<1x32xf32, #tpu.memory_space<vmem>>, %arg7: memref<128x128xf32, #tpu.memory_space<vmem>>, %arg8: memref<32x8xf32, #tpu.memory_space<vmem>>, %arg9: memref<1x8xf32, #tpu.memory_space<vmem>>, %arg10: memref<128x8xf32, #tpu.memory_space<vmem>>) attributes {dimension_semantics = [], scalar_prefetch = 0 : i64, scratch_operands = 0 : i64, tpu.core_type = #tpu.core_type<tc>} {
    %c0 = arith.constant 0 : index
    %c0_0 = arith.constant 0 : index
    %c0_1 = arith.constant 0 : index
    %0 = vector.load %arg0[%c0, %c0_0, %c0_1] : memref<8x8x32xf32, #tpu.memory_space<vmem>>, vector<8x8x32xf32>
    %1 = vector.shape_cast %0 : vector<8x8x32xf32> to vector<64x32xf32>
    %c0_2 = arith.constant 0 : index
    %c0_3 = arith.constant 0 : index
    %2 = vector.load %arg1[%c0_2, %c0_3] : memref<32x192xf32, #tpu.memory_space<vmem>>, vector<32x192xf32>
    %3 = arith.truncf %2 : vector<32x192xf32> to vector<32x192xbf16>
    %4 = arith.truncf %1 : vector<64x32xf32> to vector<64x32xbf16>
    %cst = arith.constant dense<0.000000e+00> : vector<64x192xf32>
    %5 = tpu.matmul %4, %3, %cst {dimension_numbers = #tpu.dot_dimension_numbers<[1], [0], [0], [1], [0, 0, 1, 1], [], []>} : vector<64x32xbf16>, vector<32x192xbf16>, vector<64x192xf32> -> vector<64x192xf32>
    %c0_4 = arith.constant 0 : index
    %c0_5 = arith.constant 0 : index
    %6 = vector.load %arg3[%c0_4, %c0_5] : memref<1x192xf32, #tpu.memory_space<vmem>>, vector<1x192xf32>
    %7 = vector.broadcast %6 : vector<1x192xf32> to vector<64x192xf32>
    %8 = arith.addf %5, %7 : vector<64x192xf32>
    %9 = vector.shape_cast %8 : vector<64x192xf32> to vector<8x8x192xf32>
    %c0_6 = arith.constant 0 : index
    %c0_7 = arith.constant 0 : index
    %10 = vector.load %arg2[%c0_6, %c0_7] : memref<64x192xf32, #tpu.memory_space<vmem>>, vector<64x192xf32>
    %11 = arith.truncf %10 : vector<64x192xf32> to vector<64x192xbf16>
    %c0_8 = arith.constant 0 : index
    %c0_9 = arith.constant 0 : index
    %12 = vector.load %arg4[%c0_8, %c0_9] : memref<1x64xf32, #tpu.memory_space<vmem>>, vector<1x64xf32>
    %cst_10 = arith.constant 0.000000e+00 : f32
    %13 = vector.broadcast %cst_10 : f32 to vector<8x64xf32>
    %14 = vector.extract_strided_slice %9 {offsets = [0, 0, 0], sizes = [1, 8, 192], strides = [1, 1, 1]} : vector<8x8x192xf32> to vector<1x8x192xf32>
    %15 = vector.shape_cast %14 : vector<1x8x192xf32> to vector<8x192xf32>
    %16 = vector.extract_strided_slice %9 {offsets = [7, 0, 0], sizes = [1, 8, 192], strides = [1, 1, 1]} : vector<8x8x192xf32> to vector<1x8x192xf32>
    %17 = vector.shape_cast %16 : vector<1x8x192xf32> to vector<8x192xf32>
    %18 = arith.truncf %13 : vector<8x64xf32> to vector<8x64xbf16>
    %cst_11 = arith.constant dense<0.000000e+00> : vector<8x192xf32>
    %19 = tpu.matmul %18, %11, %cst_11 {dimension_numbers = #tpu.dot_dimension_numbers<[1], [0], [0], [1], [0, 0, 1, 1], [], []>} : vector<8x64xbf16>, vector<64x192xbf16>, vector<8x192xf32> -> vector<8x192xf32>
    %20 = vector.extract_strided_slice %15 {offsets = [0, 0], sizes = [8, 32], strides = [1, 1]} : vector<8x192xf32> to vector<8x32xf32>
    %21 = vector.extract_strided_slice %17 {offsets = [0, 96], sizes = [8, 32], strides = [1, 1]} : vector<8x192xf32> to vector<8x32xf32>
    %22 = tpu.concatenate %20, %21 in 1 : vector<8x32xf32>, vector<8x32xf32> -> vector<8x64xf32>
    %23 = vector.extract_strided_slice %15 {offsets = [0, 32], sizes = [8, 32], strides = [1, 1]} : vector<8x192xf32> to vector<8x32xf32>
    %24 = vector.extract_strided_slice %17 {offsets = [0, 128], sizes = [8, 32], strides = [1, 1]} : vector<8x192xf32> to vector<8x32xf32>
    %25 = tpu.concatenate %23, %24 in 1 : vector<8x32xf32>, vector<8x32xf32> -> vector<8x64xf32>
    %26 = vector.extract_strided_slice %15 {offsets = [0, 64], sizes = [8, 32], strides = [1, 1]} : vector<8x192xf32> to vector<8x32xf32>
    %27 = vector.extract_strided_slice %17 {offsets = [0, 160], sizes = [8, 32], strides = [1, 1]} : vector<8x192xf32> to vector<8x32xf32>
    %28 = tpu.concatenate %26, %27 in 1 : vector<8x32xf32>, vector<8x32xf32> -> vector<8x64xf32>
    %29 = vector.extract_strided_slice %19 {offsets = [0, 0], sizes = [8, 64], strides = [1, 1]} : vector<8x192xf32> to vector<8x64xf32>
    %30 = arith.addf %22, %29 : vector<8x64xf32>
    %31 = arith.negf %30 : vector<8x64xf32>
    %32 = math.exp %31 : vector<8x64xf32>
    %cst_12 = arith.constant 1.000000e+00 : f32
    %33 = vector.broadcast %cst_12 : f32 to vector<8x64xf32>
    %34 = arith.addf %33, %32 : vector<8x64xf32>
    %35 = arith.divf %33, %34 : vector<8x64xf32>
    %36 = vector.extract_strided_slice %19 {offsets = [0, 64], sizes = [8, 64], strides = [1, 1]} : vector<8x192xf32> to vector<8x64xf32>
    %37 = arith.addf %25, %36 : vector<8x64xf32>
    %38 = arith.negf %37 : vector<8x64xf32>
    %39 = math.exp %38 : vector<8x64xf32>
    %cst_13 = arith.constant 1.000000e+00 : f32
    %40 = vector.broadcast %cst_13 : f32 to vector<8x64xf32>
    %41 = arith.addf %40, %39 : vector<8x64xf32>
    %42 = arith.divf %40, %41 : vector<8x64xf32>
    %43 = vector.extract_strided_slice %19 {offsets = [0, 128], sizes = [8, 64], strides = [1, 1]} : vector<8x192xf32> to vector<8x64xf32>
    %44 = vector.broadcast %12 : vector<1x64xf32> to vector<8x64xf32>
    %45 = arith.addf %43, %44 : vector<8x64xf32>
    %46 = arith.mulf %35, %45 : vector<8x64xf32>
    %47 = arith.addf %28, %46 : vector<8x64xf32>
    %48 = math.tanh %47 : vector<8x64xf32>
    %cst_14 = arith.constant 1.000000e+00 : f32
    %49 = vector.broadcast %cst_14 : f32 to vector<8x64xf32>
    %50 = arith.subf %49, %42 : vector<8x64xf32>
    %51 = arith.mulf %50, %48 : vector<8x64xf32>
    %52 = arith.mulf %42, %13 : vector<8x64xf32>
    %53 = arith.addf %51, %52 : vector<8x64xf32>
    %54 = vector.extract_strided_slice %53 {offsets = [0, 0], sizes = [8, 32], strides = [1, 1]} : vector<8x64xf32> to vector<8x32xf32>
    %55 = vector.extract_strided_slice %53 {offsets = [0, 32], sizes = [8, 32], strides = [1, 1]} : vector<8x64xf32> to vector<8x32xf32>
    %56 = vector.extract_strided_slice %9 {offsets = [1, 0, 0], sizes = [1, 8, 192], strides = [1, 1, 1]} : vector<8x8x192xf32> to vector<1x8x192xf32>
    %57 = vector.shape_cast %56 : vector<1x8x192xf32> to vector<8x192xf32>
    %58 = vector.extract_strided_slice %9 {offsets = [6, 0, 0], sizes = [1, 8, 192], strides = [1, 1, 1]} : vector<8x8x192xf32> to vector<1x8x192xf32>
    %59 = vector.shape_cast %58 : vector<1x8x192xf32> to vector<8x192xf32>
    %60 = arith.truncf %53 : vector<8x64xf32> to vector<8x64xbf16>
    %cst_15 = arith.constant dense<0.000000e+00> : vector<8x192xf32>
    %61 = tpu.matmul %60, %11, %cst_15 {dimension_numbers = #tpu.dot_dimension_numbers<[1], [0], [0], [1], [0, 0, 1, 1], [], []>} : vector<8x64xbf16>, vector<64x192xbf16>, vector<8x192xf32> -> vector<8x192xf32>
    %62 = vector.extract_strided_slice %57 {offsets = [0, 0], sizes = [8, 32], strides = [1, 1]} : vector<8x192xf32> to vector<8x32xf32>
    %63 = vector.extract_strided_slice %59 {offsets = [0, 96], sizes = [8, 32], strides = [1, 1]} : vector<8x192xf32> to vector<8x32xf32>
    %64 = tpu.concatenate %62, %63 in 1 : vector<8x32xf32>, vector<8x32xf32> -> vector<8x64xf32>
    %65 = vector.extract_strided_slice %57 {offsets = [0, 32], sizes = [8, 32], strides = [1, 1]} : vector<8x192xf32> to vector<8x32xf32>
    %66 = vector.extract_strided_slice %59 {offsets = [0, 128], sizes = [8, 32], strides = [1, 1]} : vector<8x192xf32> to vector<8x32xf32>
    %67 = tpu.concatenate %65, %66 in 1 : vector<8x32xf32>, vector<8x32xf32> -> vector<8x64xf32>
    %68 = vector.extract_strided_slice %57 {offsets = [0, 64], sizes = [8, 32], strides = [1, 1]} : vector<8x192xf32> to vector<8x32xf32>
    %69 = vector.extract_strided_slice %59 {offsets = [0, 160], sizes = [8, 32], strides = [1, 1]} : vector<8x192xf32> to vector<8x32xf32>
    %70 = tpu.concatenate %68, %69 in 1 : vector<8x32xf32>, vector<8x32xf32> -> vector<8x64xf32>
    %71 = vector.extract_strided_slice %61 {offsets = [0, 0], sizes = [8, 64], strides = [1, 1]} : vector<8x192xf32> to vector<8x64xf32>
    %72 = arith.addf %64, %71 : vector<8x64xf32>
    %73 = arith.negf %72 : vector<8x64xf32>
    %74 = math.exp %73 : vector<8x64xf32>
    %cst_16 = arith.constant 1.000000e+00 : f32
    %75 = vector.broadcast %cst_16 : f32 to vector<8x64xf32>
    %76 = arith.addf %75, %74 : vector<8x64xf32>
    %77 = arith.divf %75, %76 : vector<8x64xf32>
    %78 = vector.extract_strided_slice %61 {offsets = [0, 64], sizes = [8, 64], strides = [1, 1]} : vector<8x192xf32> to vector<8x64xf32>
    %79 = arith.addf %67, %78 : vector<8x64xf32>
    %80 = arith.negf %79 : vector<8x64xf32>
    %81 = math.exp %80 : vector<8x64xf32>
    %cst_17 = arith.constant 1.000000e+00 : f32
    %82 = vector.broadcast %cst_17 : f32 to vector<8x64xf32>
    %83 = arith.addf %82, %81 : vector<8x64xf32>
    %84 = arith.divf %82, %83 : vector<8x64xf32>
    %85 = vector.extract_strided_slice %61 {offsets = [0, 128], sizes = [8, 64], strides = [1, 1]} : vector<8x192xf32> to vector<8x64xf32>
    %86 = vector.broadcast %12 : vector<1x64xf32> to vector<8x64xf32>
    %87 = arith.addf %85, %86 : vector<8x64xf32>
    %88 = arith.mulf %77, %87 : vector<8x64xf32>
    %89 = arith.addf %70, %88 : vector<8x64xf32>
    %90 = math.tanh %89 : vector<8x64xf32>
    %cst_18 = arith.constant 1.000000e+00 : f32
    %91 = vector.broadcast %cst_18 : f32 to vector<8x64xf32>
    %92 = arith.subf %91, %84 : vector<8x64xf32>
    %93 = arith.mulf %92, %90 : vector<8x64xf32>
    %94 = arith.mulf %84, %53 : vector<8x64xf32>
    %95 = arith.addf %93, %94 : vector<8x64xf32>
    %96 = vector.extract_strided_slice %95 {offsets = [0, 0], sizes = [8, 32], strides = [1, 1]} : vector<8x64xf32> to vector<8x32xf32>
    %97 = vector.extract_strided_slice %95 {offsets = [0, 32], sizes = [8, 32], strides = [1, 1]} : vector<8x64xf32> to vector<8x32xf32>
    %98 = vector.extract_strided_slice %9 {offsets = [2, 0, 0], sizes = [1, 8, 192], strides = [1, 1, 1]} : vector<8x8x192xf32> to vector<1x8x192xf32>
    %99 = vector.shape_cast %98 : vector<1x8x192xf32> to vector<8x192xf32>
    %100 = vector.extract_strided_slice %9 {offsets = [5, 0, 0], sizes = [1, 8, 192], strides = [1, 1, 1]} : vector<8x8x192xf32> to vector<1x8x192xf32>
    %101 = vector.shape_cast %100 : vector<1x8x192xf32> to vector<8x192xf32>
    %102 = arith.truncf %95 : vector<8x64xf32> to vector<8x64xbf16>
    %cst_19 = arith.constant dense<0.000000e+00> : vector<8x192xf32>
    %103 = tpu.matmul %102, %11, %cst_19 {dimension_numbers = #tpu.dot_dimension_numbers<[1], [0], [0], [1], [0, 0, 1, 1], [], []>} : vector<8x64xbf16>, vector<64x192xbf16>, vector<8x192xf32> -> vector<8x192xf32>
    %104 = vector.extract_strided_slice %99 {offsets = [0, 0], sizes = [8, 32], strides = [1, 1]} : vector<8x192xf32> to vector<8x32xf32>
    %105 = vector.extract_strided_slice %101 {offsets = [0, 96], sizes = [8, 32], strides = [1, 1]} : vector<8x192xf32> to vector<8x32xf32>
    %106 = tpu.concatenate %104, %105 in 1 : vector<8x32xf32>, vector<8x32xf32> -> vector<8x64xf32>
    %107 = vector.extract_strided_slice %99 {offsets = [0, 32], sizes = [8, 32], strides = [1, 1]} : vector<8x192xf32> to vector<8x32xf32>
    %108 = vector.extract_strided_slice %101 {offsets = [0, 128], sizes = [8, 32], strides = [1, 1]} : vector<8x192xf32> to vector<8x32xf32>
    %109 = tpu.concatenate %107, %108 in 1 : vector<8x32xf32>, vector<8x32xf32> -> vector<8x64xf32>
    %110 = vector.extract_strided_slice %99 {offsets = [0, 64], sizes = [8, 32], strides = [1, 1]} : vector<8x192xf32> to vector<8x32xf32>
    %111 = vector.extract_strided_slice %101 {offsets = [0, 160], sizes = [8, 32], strides = [1, 1]} : vector<8x192xf32> to vector<8x32xf32>
    %112 = tpu.concatenate %110, %111 in 1 : vector<8x32xf32>, vector<8x32xf32> -> vector<8x64xf32>
    %113 = vector.extract_strided_slice %103 {offsets = [0, 0], sizes = [8, 64], strides = [1, 1]} : vector<8x192xf32> to vector<8x64xf32>
    %114 = arith.addf %106, %113 : vector<8x64xf32>
    %115 = arith.negf %114 : vector<8x64xf32>
    %116 = math.exp %115 : vector<8x64xf32>
    %cst_20 = arith.constant 1.000000e+00 : f32
    %117 = vector.broadcast %cst_20 : f32 to vector<8x64xf32>
    %118 = arith.addf %117, %116 : vector<8x64xf32>
    %119 = arith.divf %117, %118 : vector<8x64xf32>
    %120 = vector.extract_strided_slice %103 {offsets = [0, 64], sizes = [8, 64], strides = [1, 1]} : vector<8x192xf32> to vector<8x64xf32>
    %121 = arith.addf %109, %120 : vector<8x64xf32>
    %122 = arith.negf %121 : vector<8x64xf32>
    %123 = math.exp %122 : vector<8x64xf32>
    %cst_21 = arith.constant 1.000000e+00 : f32
    %124 = vector.broadcast %cst_21 : f32 to vector<8x64xf32>
    %125 = arith.addf %124, %123 : vector<8x64xf32>
    %126 = arith.divf %124, %125 : vector<8x64xf32>
    %127 = vector.extract_strided_slice %103 {offsets = [0, 128], sizes = [8, 64], strides = [1, 1]} : vector<8x192xf32> to vector<8x64xf32>
    %128 = vector.broadcast %12 : vector<1x64xf32> to vector<8x64xf32>
    %129 = arith.addf %127, %128 : vector<8x64xf32>
    %130 = arith.mulf %119, %129 : vector<8x64xf32>
    %131 = arith.addf %112, %130 : vector<8x64xf32>
    %132 = math.tanh %131 : vector<8x64xf32>
    %cst_22 = arith.constant 1.000000e+00 : f32
    %133 = vector.broadcast %cst_22 : f32 to vector<8x64xf32>
    %134 = arith.subf %133, %126 : vector<8x64xf32>
    %135 = arith.mulf %134, %132 : vector<8x64xf32>
    %136 = arith.mulf %126, %95 : vector<8x64xf32>
    %137 = arith.addf %135, %136 : vector<8x64xf32>
    %138 = vector.extract_strided_slice %137 {offsets = [0, 0], sizes = [8, 32], strides = [1, 1]} : vector<8x64xf32> to vector<8x32xf32>
    %139 = vector.extract_strided_slice %137 {offsets = [0, 32], sizes = [8, 32], strides = [1, 1]} : vector<8x64xf32> to vector<8x32xf32>
    %140 = vector.extract_strided_slice %9 {offsets = [3, 0, 0], sizes = [1, 8, 192], strides = [1, 1, 1]} : vector<8x8x192xf32> to vector<1x8x192xf32>
    %141 = vector.shape_cast %140 : vector<1x8x192xf32> to vector<8x192xf32>
    %142 = vector.extract_strided_slice %9 {offsets = [4, 0, 0], sizes = [1, 8, 192], strides = [1, 1, 1]} : vector<8x8x192xf32> to vector<1x8x192xf32>
    %143 = vector.shape_cast %142 : vector<1x8x192xf32> to vector<8x192xf32>
    %144 = arith.truncf %137 : vector<8x64xf32> to vector<8x64xbf16>
    %cst_23 = arith.constant dense<0.000000e+00> : vector<8x192xf32>
    %145 = tpu.matmul %144, %11, %cst_23 {dimension_numbers = #tpu.dot_dimension_numbers<[1], [0], [0], [1], [0, 0, 1, 1], [], []>} : vector<8x64xbf16>, vector<64x192xbf16>, vector<8x192xf32> -> vector<8x192xf32>
    %146 = vector.extract_strided_slice %141 {offsets = [0, 0], sizes = [8, 32], strides = [1, 1]} : vector<8x192xf32> to vector<8x32xf32>
    %147 = vector.extract_strided_slice %143 {offsets = [0, 96], sizes = [8, 32], strides = [1, 1]} : vector<8x192xf32> to vector<8x32xf32>
    %148 = tpu.concatenate %146, %147 in 1 : vector<8x32xf32>, vector<8x32xf32> -> vector<8x64xf32>
    %149 = vector.extract_strided_slice %141 {offsets = [0, 32], sizes = [8, 32], strides = [1, 1]} : vector<8x192xf32> to vector<8x32xf32>
    %150 = vector.extract_strided_slice %143 {offsets = [0, 128], sizes = [8, 32], strides = [1, 1]} : vector<8x192xf32> to vector<8x32xf32>
    %151 = tpu.concatenate %149, %150 in 1 : vector<8x32xf32>, vector<8x32xf32> -> vector<8x64xf32>
    %152 = vector.extract_strided_slice %141 {offsets = [0, 64], sizes = [8, 32], strides = [1, 1]} : vector<8x192xf32> to vector<8x32xf32>
    %153 = vector.extract_strided_slice %143 {offsets = [0, 160], sizes = [8, 32], strides = [1, 1]} : vector<8x192xf32> to vector<8x32xf32>
    %154 = tpu.concatenate %152, %153 in 1 : vector<8x32xf32>, vector<8x32xf32> -> vector<8x64xf32>
    %155 = vector.extract_strided_slice %145 {offsets = [0, 0], sizes = [8, 64], strides = [1, 1]} : vector<8x192xf32> to vector<8x64xf32>
    %156 = arith.addf %148, %155 : vector<8x64xf32>
    %157 = arith.negf %156 : vector<8x64xf32>
    %158 = math.exp %157 : vector<8x64xf32>
    %cst_24 = arith.constant 1.000000e+00 : f32
    %159 = vector.broadcast %cst_24 : f32 to vector<8x64xf32>
    %160 = arith.addf %159, %158 : vector<8x64xf32>
    %161 = arith.divf %159, %160 : vector<8x64xf32>
    %162 = vector.extract_strided_slice %145 {offsets = [0, 64], sizes = [8, 64], strides = [1, 1]} : vector<8x192xf32> to vector<8x64xf32>
    %163 = arith.addf %151, %162 : vector<8x64xf32>
    %164 = arith.negf %163 : vector<8x64xf32>
    %165 = math.exp %164 : vector<8x64xf32>
    %cst_25 = arith.constant 1.000000e+00 : f32
    %166 = vector.broadcast %cst_25 : f32 to vector<8x64xf32>
    %167 = arith.addf %166, %165 : vector<8x64xf32>
    %168 = arith.divf %166, %167 : vector<8x64xf32>
    %169 = vector.extract_strided_slice %145 {offsets = [0, 128], sizes = [8, 64], strides = [1, 1]} : vector<8x192xf32> to vector<8x64xf32>
    %170 = vector.broadcast %12 : vector<1x64xf32> to vector<8x64xf32>
    %171 = arith.addf %169, %170 : vector<8x64xf32>
    %172 = arith.mulf %161, %171 : vector<8x64xf32>
    %173 = arith.addf %154, %172 : vector<8x64xf32>
    %174 = math.tanh %173 : vector<8x64xf32>
    %cst_26 = arith.constant 1.000000e+00 : f32
    %175 = vector.broadcast %cst_26 : f32 to vector<8x64xf32>
    %176 = arith.subf %175, %168 : vector<8x64xf32>
    %177 = arith.mulf %176, %174 : vector<8x64xf32>
    %178 = arith.mulf %168, %137 : vector<8x64xf32>
    %179 = arith.addf %177, %178 : vector<8x64xf32>
    %180 = vector.extract_strided_slice %179 {offsets = [0, 0], sizes = [8, 32], strides = [1, 1]} : vector<8x64xf32> to vector<8x32xf32>
    %181 = vector.extract_strided_slice %179 {offsets = [0, 32], sizes = [8, 32], strides = [1, 1]} : vector<8x64xf32> to vector<8x32xf32>
    %182 = vector.extract_strided_slice %9 {offsets = [4, 0, 0], sizes = [1, 8, 192], strides = [1, 1, 1]} : vector<8x8x192xf32> to vector<1x8x192xf32>
    %183 = vector.shape_cast %182 : vector<1x8x192xf32> to vector<8x192xf32>
    %184 = vector.extract_strided_slice %9 {offsets = [3, 0, 0], sizes = [1, 8, 192], strides = [1, 1, 1]} : vector<8x8x192xf32> to vector<1x8x192xf32>
    %185 = vector.shape_cast %184 : vector<1x8x192xf32> to vector<8x192xf32>
    %186 = arith.truncf %179 : vector<8x64xf32> to vector<8x64xbf16>
    %cst_27 = arith.constant dense<0.000000e+00> : vector<8x192xf32>
    %187 = tpu.matmul %186, %11, %cst_27 {dimension_numbers = #tpu.dot_dimension_numbers<[1], [0], [0], [1], [0, 0, 1, 1], [], []>} : vector<8x64xbf16>, vector<64x192xbf16>, vector<8x192xf32> -> vector<8x192xf32>
    %188 = vector.extract_strided_slice %183 {offsets = [0, 0], sizes = [8, 32], strides = [1, 1]} : vector<8x192xf32> to vector<8x32xf32>
    %189 = vector.extract_strided_slice %185 {offsets = [0, 96], sizes = [8, 32], strides = [1, 1]} : vector<8x192xf32> to vector<8x32xf32>
    %190 = tpu.concatenate %188, %189 in 1 : vector<8x32xf32>, vector<8x32xf32> -> vector<8x64xf32>
    %191 = vector.extract_strided_slice %183 {offsets = [0, 32], sizes = [8, 32], strides = [1, 1]} : vector<8x192xf32> to vector<8x32xf32>
    %192 = vector.extract_strided_slice %185 {offsets = [0, 128], sizes = [8, 32], strides = [1, 1]} : vector<8x192xf32> to vector<8x32xf32>
    %193 = tpu.concatenate %191, %192 in 1 : vector<8x32xf32>, vector<8x32xf32> -> vector<8x64xf32>
    %194 = vector.extract_strided_slice %183 {offsets = [0, 64], sizes = [8, 32], strides = [1, 1]} : vector<8x192xf32> to vector<8x32xf32>
    %195 = vector.extract_strided_slice %185 {offsets = [0, 160], sizes = [8, 32], strides = [1, 1]} : vector<8x192xf32> to vector<8x32xf32>
    %196 = tpu.concatenate %194, %195 in 1 : vector<8x32xf32>, vector<8x32xf32> -> vector<8x64xf32>
    %197 = vector.extract_strided_slice %187 {offsets = [0, 0], sizes = [8, 64], strides = [1, 1]} : vector<8x192xf32> to vector<8x64xf32>
    %198 = arith.addf %190, %197 : vector<8x64xf32>
    %199 = arith.negf %198 : vector<8x64xf32>
    %200 = math.exp %199 : vector<8x64xf32>
    %cst_28 = arith.constant 1.000000e+00 : f32
    %201 = vector.broadcast %cst_28 : f32 to vector<8x64xf32>
    %202 = arith.addf %201, %200 : vector<8x64xf32>
    %203 = arith.divf %201, %202 : vector<8x64xf32>
    %204 = vector.extract_strided_slice %187 {offsets = [0, 64], sizes = [8, 64], strides = [1, 1]} : vector<8x192xf32> to vector<8x64xf32>
    %205 = arith.addf %193, %204 : vector<8x64xf32>
    %206 = arith.negf %205 : vector<8x64xf32>
    %207 = math.exp %206 : vector<8x64xf32>
    %cst_29 = arith.constant 1.000000e+00 : f32
    %208 = vector.broadcast %cst_29 : f32 to vector<8x64xf32>
    %209 = arith.addf %208, %207 : vector<8x64xf32>
    %210 = arith.divf %208, %209 : vector<8x64xf32>
    %211 = vector.extract_strided_slice %187 {offsets = [0, 128], sizes = [8, 64], strides = [1, 1]} : vector<8x192xf32> to vector<8x64xf32>
    %212 = vector.broadcast %12 : vector<1x64xf32> to vector<8x64xf32>
    %213 = arith.addf %211, %212 : vector<8x64xf32>
    %214 = arith.mulf %203, %213 : vector<8x64xf32>
    %215 = arith.addf %196, %214 : vector<8x64xf32>
    %216 = math.tanh %215 : vector<8x64xf32>
    %cst_30 = arith.constant 1.000000e+00 : f32
    %217 = vector.broadcast %cst_30 : f32 to vector<8x64xf32>
    %218 = arith.subf %217, %210 : vector<8x64xf32>
    %219 = arith.mulf %218, %216 : vector<8x64xf32>
    %220 = arith.mulf %210, %179 : vector<8x64xf32>
    %221 = arith.addf %219, %220 : vector<8x64xf32>
    %222 = vector.extract_strided_slice %221 {offsets = [0, 0], sizes = [8, 32], strides = [1, 1]} : vector<8x64xf32> to vector<8x32xf32>
    %223 = vector.extract_strided_slice %221 {offsets = [0, 32], sizes = [8, 32], strides = [1, 1]} : vector<8x64xf32> to vector<8x32xf32>
    %224 = vector.extract_strided_slice %9 {offsets = [5, 0, 0], sizes = [1, 8, 192], strides = [1, 1, 1]} : vector<8x8x192xf32> to vector<1x8x192xf32>
    %225 = vector.shape_cast %224 : vector<1x8x192xf32> to vector<8x192xf32>
    %226 = vector.extract_strided_slice %9 {offsets = [2, 0, 0], sizes = [1, 8, 192], strides = [1, 1, 1]} : vector<8x8x192xf32> to vector<1x8x192xf32>
    %227 = vector.shape_cast %226 : vector<1x8x192xf32> to vector<8x192xf32>
    %228 = arith.truncf %221 : vector<8x64xf32> to vector<8x64xbf16>
    %cst_31 = arith.constant dense<0.000000e+00> : vector<8x192xf32>
    %229 = tpu.matmul %228, %11, %cst_31 {dimension_numbers = #tpu.dot_dimension_numbers<[1], [0], [0], [1], [0, 0, 1, 1], [], []>} : vector<8x64xbf16>, vector<64x192xbf16>, vector<8x192xf32> -> vector<8x192xf32>
    %230 = vector.extract_strided_slice %225 {offsets = [0, 0], sizes = [8, 32], strides = [1, 1]} : vector<8x192xf32> to vector<8x32xf32>
    %231 = vector.extract_strided_slice %227 {offsets = [0, 96], sizes = [8, 32], strides = [1, 1]} : vector<8x192xf32> to vector<8x32xf32>
    %232 = tpu.concatenate %230, %231 in 1 : vector<8x32xf32>, vector<8x32xf32> -> vector<8x64xf32>
    %233 = vector.extract_strided_slice %225 {offsets = [0, 32], sizes = [8, 32], strides = [1, 1]} : vector<8x192xf32> to vector<8x32xf32>
    %234 = vector.extract_strided_slice %227 {offsets = [0, 128], sizes = [8, 32], strides = [1, 1]} : vector<8x192xf32> to vector<8x32xf32>
    %235 = tpu.concatenate %233, %234 in 1 : vector<8x32xf32>, vector<8x32xf32> -> vector<8x64xf32>
    %236 = vector.extract_strided_slice %225 {offsets = [0, 64], sizes = [8, 32], strides = [1, 1]} : vector<8x192xf32> to vector<8x32xf32>
    %237 = vector.extract_strided_slice %227 {offsets = [0, 160], sizes = [8, 32], strides = [1, 1]} : vector<8x192xf32> to vector<8x32xf32>
    %238 = tpu.concatenate %236, %237 in 1 : vector<8x32xf32>, vector<8x32xf32> -> vector<8x64xf32>
    %239 = vector.extract_strided_slice %229 {offsets = [0, 0], sizes = [8, 64], strides = [1, 1]} : vector<8x192xf32> to vector<8x64xf32>
    %240 = arith.addf %232, %239 : vector<8x64xf32>
    %241 = arith.negf %240 : vector<8x64xf32>
    %242 = math.exp %241 : vector<8x64xf32>
    %cst_32 = arith.constant 1.000000e+00 : f32
    %243 = vector.broadcast %cst_32 : f32 to vector<8x64xf32>
    %244 = arith.addf %243, %242 : vector<8x64xf32>
    %245 = arith.divf %243, %244 : vector<8x64xf32>
    %246 = vector.extract_strided_slice %229 {offsets = [0, 64], sizes = [8, 64], strides = [1, 1]} : vector<8x192xf32> to vector<8x64xf32>
    %247 = arith.addf %235, %246 : vector<8x64xf32>
    %248 = arith.negf %247 : vector<8x64xf32>
    %249 = math.exp %248 : vector<8x64xf32>
    %cst_33 = arith.constant 1.000000e+00 : f32
    %250 = vector.broadcast %cst_33 : f32 to vector<8x64xf32>
    %251 = arith.addf %250, %249 : vector<8x64xf32>
    %252 = arith.divf %250, %251 : vector<8x64xf32>
    %253 = vector.extract_strided_slice %229 {offsets = [0, 128], sizes = [8, 64], strides = [1, 1]} : vector<8x192xf32> to vector<8x64xf32>
    %254 = vector.broadcast %12 : vector<1x64xf32> to vector<8x64xf32>
    %255 = arith.addf %253, %254 : vector<8x64xf32>
    %256 = arith.mulf %245, %255 : vector<8x64xf32>
    %257 = arith.addf %238, %256 : vector<8x64xf32>
    %258 = math.tanh %257 : vector<8x64xf32>
    %cst_34 = arith.constant 1.000000e+00 : f32
    %259 = vector.broadcast %cst_34 : f32 to vector<8x64xf32>
    %260 = arith.subf %259, %252 : vector<8x64xf32>
    %261 = arith.mulf %260, %258 : vector<8x64xf32>
    %262 = arith.mulf %252, %221 : vector<8x64xf32>
    %263 = arith.addf %261, %262 : vector<8x64xf32>
    %264 = vector.extract_strided_slice %263 {offsets = [0, 0], sizes = [8, 32], strides = [1, 1]} : vector<8x64xf32> to vector<8x32xf32>
    %265 = vector.extract_strided_slice %263 {offsets = [0, 32], sizes = [8, 32], strides = [1, 1]} : vector<8x64xf32> to vector<8x32xf32>
    %266 = vector.extract_strided_slice %9 {offsets = [6, 0, 0], sizes = [1, 8, 192], strides = [1, 1, 1]} : vector<8x8x192xf32> to vector<1x8x192xf32>
    %267 = vector.shape_cast %266 : vector<1x8x192xf32> to vector<8x192xf32>
    %268 = vector.extract_strided_slice %9 {offsets = [1, 0, 0], sizes = [1, 8, 192], strides = [1, 1, 1]} : vector<8x8x192xf32> to vector<1x8x192xf32>
    %269 = vector.shape_cast %268 : vector<1x8x192xf32> to vector<8x192xf32>
    %270 = arith.truncf %263 : vector<8x64xf32> to vector<8x64xbf16>
    %cst_35 = arith.constant dense<0.000000e+00> : vector<8x192xf32>
    %271 = tpu.matmul %270, %11, %cst_35 {dimension_numbers = #tpu.dot_dimension_numbers<[1], [0], [0], [1], [0, 0, 1, 1], [], []>} : vector<8x64xbf16>, vector<64x192xbf16>, vector<8x192xf32> -> vector<8x192xf32>
    %272 = vector.extract_strided_slice %267 {offsets = [0, 0], sizes = [8, 32], strides = [1, 1]} : vector<8x192xf32> to vector<8x32xf32>
    %273 = vector.extract_strided_slice %269 {offsets = [0, 96], sizes = [8, 32], strides = [1, 1]} : vector<8x192xf32> to vector<8x32xf32>
    %274 = tpu.concatenate %272, %273 in 1 : vector<8x32xf32>, vector<8x32xf32> -> vector<8x64xf32>
    %275 = vector.extract_strided_slice %267 {offsets = [0, 32], sizes = [8, 32], strides = [1, 1]} : vector<8x192xf32> to vector<8x32xf32>
    %276 = vector.extract_strided_slice %269 {offsets = [0, 128], sizes = [8, 32], strides = [1, 1]} : vector<8x192xf32> to vector<8x32xf32>
    %277 = tpu.concatenate %275, %276 in 1 : vector<8x32xf32>, vector<8x32xf32> -> vector<8x64xf32>
    %278 = vector.extract_strided_slice %267 {offsets = [0, 64], sizes = [8, 32], strides = [1, 1]} : vector<8x192xf32> to vector<8x32xf32>
    %279 = vector.extract_strided_slice %269 {offsets = [0, 160], sizes = [8, 32], strides = [1, 1]} : vector<8x192xf32> to vector<8x32xf32>
    %280 = tpu.concatenate %278, %279 in 1 : vector<8x32xf32>, vector<8x32xf32> -> vector<8x64xf32>
    %281 = vector.extract_strided_slice %271 {offsets = [0, 0], sizes = [8, 64], strides = [1, 1]} : vector<8x192xf32> to vector<8x64xf32>
    %282 = arith.addf %274, %281 : vector<8x64xf32>
    %283 = arith.negf %282 : vector<8x64xf32>
    %284 = math.exp %283 : vector<8x64xf32>
    %cst_36 = arith.constant 1.000000e+00 : f32
    %285 = vector.broadcast %cst_36 : f32 to vector<8x64xf32>
    %286 = arith.addf %285, %284 : vector<8x64xf32>
    %287 = arith.divf %285, %286 : vector<8x64xf32>
    %288 = vector.extract_strided_slice %271 {offsets = [0, 64], sizes = [8, 64], strides = [1, 1]} : vector<8x192xf32> to vector<8x64xf32>
    %289 = arith.addf %277, %288 : vector<8x64xf32>
    %290 = arith.negf %289 : vector<8x64xf32>
    %291 = math.exp %290 : vector<8x64xf32>
    %cst_37 = arith.constant 1.000000e+00 : f32
    %292 = vector.broadcast %cst_37 : f32 to vector<8x64xf32>
    %293 = arith.addf %292, %291 : vector<8x64xf32>
    %294 = arith.divf %292, %293 : vector<8x64xf32>
    %295 = vector.extract_strided_slice %271 {offsets = [0, 128], sizes = [8, 64], strides = [1, 1]} : vector<8x192xf32> to vector<8x64xf32>
    %296 = vector.broadcast %12 : vector<1x64xf32> to vector<8x64xf32>
    %297 = arith.addf %295, %296 : vector<8x64xf32>
    %298 = arith.mulf %287, %297 : vector<8x64xf32>
    %299 = arith.addf %280, %298 : vector<8x64xf32>
    %300 = math.tanh %299 : vector<8x64xf32>
    %cst_38 = arith.constant 1.000000e+00 : f32
    %301 = vector.broadcast %cst_38 : f32 to vector<8x64xf32>
    %302 = arith.subf %301, %294 : vector<8x64xf32>
    %303 = arith.mulf %302, %300 : vector<8x64xf32>
    %304 = arith.mulf %294, %263 : vector<8x64xf32>
    %305 = arith.addf %303, %304 : vector<8x64xf32>
    %306 = vector.extract_strided_slice %305 {offsets = [0, 0], sizes = [8, 32], strides = [1, 1]} : vector<8x64xf32> to vector<8x32xf32>
    %307 = vector.extract_strided_slice %305 {offsets = [0, 32], sizes = [8, 32], strides = [1, 1]} : vector<8x64xf32> to vector<8x32xf32>
    %308 = vector.extract_strided_slice %9 {offsets = [7, 0, 0], sizes = [1, 8, 192], strides = [1, 1, 1]} : vector<8x8x192xf32> to vector<1x8x192xf32>
    %309 = vector.shape_cast %308 : vector<1x8x192xf32> to vector<8x192xf32>
    %310 = vector.extract_strided_slice %9 {offsets = [0, 0, 0], sizes = [1, 8, 192], strides = [1, 1, 1]} : vector<8x8x192xf32> to vector<1x8x192xf32>
    %311 = vector.shape_cast %310 : vector<1x8x192xf32> to vector<8x192xf32>
    %312 = arith.truncf %305 : vector<8x64xf32> to vector<8x64xbf16>
    %cst_39 = arith.constant dense<0.000000e+00> : vector<8x192xf32>
    %313 = tpu.matmul %312, %11, %cst_39 {dimension_numbers = #tpu.dot_dimension_numbers<[1], [0], [0], [1], [0, 0, 1, 1], [], []>} : vector<8x64xbf16>, vector<64x192xbf16>, vector<8x192xf32> -> vector<8x192xf32>
    %314 = vector.extract_strided_slice %309 {offsets = [0, 0], sizes = [8, 32], strides = [1, 1]} : vector<8x192xf32> to vector<8x32xf32>
    %315 = vector.extract_strided_slice %311 {offsets = [0, 96], sizes = [8, 32], strides = [1, 1]} : vector<8x192xf32> to vector<8x32xf32>
    %316 = tpu.concatenate %314, %315 in 1 : vector<8x32xf32>, vector<8x32xf32> -> vector<8x64xf32>
    %317 = vector.extract_strided_slice %309 {offsets = [0, 32], sizes = [8, 32], strides = [1, 1]} : vector<8x192xf32> to vector<8x32xf32>
    %318 = vector.extract_strided_slice %311 {offsets = [0, 128], sizes = [8, 32], strides = [1, 1]} : vector<8x192xf32> to vector<8x32xf32>
    %319 = tpu.concatenate %317, %318 in 1 : vector<8x32xf32>, vector<8x32xf32> -> vector<8x64xf32>
    %320 = vector.extract_strided_slice %309 {offsets = [0, 64], sizes = [8, 32], strides = [1, 1]} : vector<8x192xf32> to vector<8x32xf32>
    %321 = vector.extract_strided_slice %311 {offsets = [0, 160], sizes = [8, 32], strides = [1, 1]} : vector<8x192xf32> to vector<8x32xf32>
    %322 = tpu.concatenate %320, %321 in 1 : vector<8x32xf32>, vector<8x32xf32> -> vector<8x64xf32>
    %323 = vector.extract_strided_slice %313 {offsets = [0, 0], sizes = [8, 64], strides = [1, 1]} : vector<8x192xf32> to vector<8x64xf32>
    %324 = arith.addf %316, %323 : vector<8x64xf32>
    %325 = arith.negf %324 : vector<8x64xf32>
    %326 = math.exp %325 : vector<8x64xf32>
    %cst_40 = arith.constant 1.000000e+00 : f32
    %327 = vector.broadcast %cst_40 : f32 to vector<8x64xf32>
    %328 = arith.addf %327, %326 : vector<8x64xf32>
    %329 = arith.divf %327, %328 : vector<8x64xf32>
    %330 = vector.extract_strided_slice %313 {offsets = [0, 64], sizes = [8, 64], strides = [1, 1]} : vector<8x192xf32> to vector<8x64xf32>
    %331 = arith.addf %319, %330 : vector<8x64xf32>
    %332 = arith.negf %331 : vector<8x64xf32>
    %333 = math.exp %332 : vector<8x64xf32>
    %cst_41 = arith.constant 1.000000e+00 : f32
    %334 = vector.broadcast %cst_41 : f32 to vector<8x64xf32>
    %335 = arith.addf %334, %333 : vector<8x64xf32>
    %336 = arith.divf %334, %335 : vector<8x64xf32>
    %337 = vector.extract_strided_slice %313 {offsets = [0, 128], sizes = [8, 64], strides = [1, 1]} : vector<8x192xf32> to vector<8x64xf32>
    %338 = vector.broadcast %12 : vector<1x64xf32> to vector<8x64xf32>
    %339 = arith.addf %337, %338 : vector<8x64xf32>
    %340 = arith.mulf %329, %339 : vector<8x64xf32>
    %341 = arith.addf %322, %340 : vector<8x64xf32>
    %342 = math.tanh %341 : vector<8x64xf32>
    %cst_42 = arith.constant 1.000000e+00 : f32
    %343 = vector.broadcast %cst_42 : f32 to vector<8x64xf32>
    %344 = arith.subf %343, %336 : vector<8x64xf32>
    %345 = arith.mulf %344, %342 : vector<8x64xf32>
    %346 = arith.mulf %336, %305 : vector<8x64xf32>
    %347 = arith.addf %345, %346 : vector<8x64xf32>
    %348 = vector.extract_strided_slice %347 {offsets = [0, 0], sizes = [8, 32], strides = [1, 1]} : vector<8x64xf32> to vector<8x32xf32>
    %349 = vector.extract_strided_slice %347 {offsets = [0, 32], sizes = [8, 32], strides = [1, 1]} : vector<8x64xf32> to vector<8x32xf32>
    %350 = tpu.concatenate %54, %349 in 1 : vector<8x32xf32>, vector<8x32xf32> -> vector<8x64xf32>
    %351 = tpu.concatenate %96, %307 in 1 : vector<8x32xf32>, vector<8x32xf32> -> vector<8x64xf32>
    %352 = tpu.concatenate %138, %265 in 1 : vector<8x32xf32>, vector<8x32xf32> -> vector<8x64xf32>
    %353 = tpu.concatenate %180, %223 in 1 : vector<8x32xf32>, vector<8x32xf32> -> vector<8x64xf32>
    %354 = tpu.concatenate %222, %181 in 1 : vector<8x32xf32>, vector<8x32xf32> -> vector<8x64xf32>
    %355 = tpu.concatenate %264, %139 in 1 : vector<8x32xf32>, vector<8x32xf32> -> vector<8x64xf32>
    %356 = tpu.concatenate %306, %97 in 1 : vector<8x32xf32>, vector<8x32xf32> -> vector<8x64xf32>
    %357 = tpu.concatenate %348, %55 in 1 : vector<8x32xf32>, vector<8x32xf32> -> vector<8x64xf32>
    %358 = tpu.concatenate %350, %351, %352, %353, %354, %355, %356, %357 in 0 : vector<8x64xf32>, vector<8x64xf32>, vector<8x64xf32>, vector<8x64xf32>, vector<8x64xf32>, vector<8x64xf32>, vector<8x64xf32>, vector<8x64xf32> -> vector<64x64xf32>
    %c0_43 = arith.constant 0 : index
    %c0_44 = arith.constant 0 : index
    %359 = vector.load %arg5[%c0_43, %c0_44] : memref<64x32xf32, #tpu.memory_space<vmem>>, vector<64x32xf32>
    %360 = arith.truncf %358 : vector<64x64xf32> to vector<64x64xbf16>
    %361 = arith.truncf %359 : vector<64x32xf32> to vector<64x32xbf16>
    %cst_45 = arith.constant dense<0.000000e+00> : vector<64x32xf32>
    %362 = tpu.matmul %360, %361, %cst_45 {dimension_numbers = #tpu.dot_dimension_numbers<[1], [0], [0], [1], [0, 0, 1, 1], [], []>} : vector<64x64xbf16>, vector<64x32xbf16>, vector<64x32xf32> -> vector<64x32xf32>
    %c0_46 = arith.constant 0 : index
    %c0_47 = arith.constant 0 : index
    %363 = vector.load %arg6[%c0_46, %c0_47] : memref<1x32xf32, #tpu.memory_space<vmem>>, vector<1x32xf32>
    %364 = vector.broadcast %363 : vector<1x32xf32> to vector<64x32xf32>
    %365 = arith.addf %362, %364 : vector<64x32xf32>
    %cst_48 = arith.constant 0.000000e+00 : f32
    %366 = vector.broadcast %cst_48 : f32 to vector<64x32xf32>
    %367 = arith.maximumf %365, %366 : vector<64x32xf32>
    %368 = vector.shape_cast %367 : vector<64x32xf32> to vector<8x8x32xf32>
    %369 = tpu.concatenate %368, %368 in 1 : vector<8x8x32xf32>, vector<8x8x32xf32> -> vector<8x16x32xf32>
    %370 = vector.shape_cast %369 : vector<8x16x32xf32> to vector<128x32xf32>
    %c0_49 = arith.constant 0 : index
    %c0_50 = arith.constant 0 : index
    %371 = vector.load %arg7[%c0_49, %c0_50] : memref<128x128xf32, #tpu.memory_space<vmem>>, vector<128x128xf32>
    %372 = arith.truncf %371 : vector<128x128xf32> to vector<128x128xbf16>
    %cst_51 = arith.constant 5.000000e-02 : f32
    %373 = vector.broadcast %cst_51 : f32 to vector<128x32xf32>
    %374 = arith.mulf %373, %370 : vector<128x32xf32>
    %375 = arith.truncf %370 : vector<128x32xf32> to vector<128x32xbf16>
    %cst_52 = arith.constant dense<0.000000e+00> : vector<128x32xf32>
    %376 = tpu.matmul %372, %375, %cst_52 {dimension_numbers = #tpu.dot_dimension_numbers<[1], [0], [0], [1], [0, 0, 1, 1], [], []>} : vector<128x128xbf16>, vector<128x32xbf16>, vector<128x32xf32> -> vector<128x32xf32>
    %cst_53 = arith.constant 0.949999988 : f32
    %377 = vector.broadcast %cst_53 : f32 to vector<128x32xf32>
    %378 = arith.mulf %377, %376 : vector<128x32xf32>
    %379 = arith.addf %374, %378 : vector<128x32xf32>
    %cst_54 = arith.constant 5.000000e-02 : f32
    %380 = vector.broadcast %cst_54 : f32 to vector<128x32xf32>
    %381 = arith.mulf %380, %370 : vector<128x32xf32>
    %382 = arith.truncf %379 : vector<128x32xf32> to vector<128x32xbf16>
    %cst_55 = arith.constant dense<0.000000e+00> : vector<128x32xf32>
    %383 = tpu.matmul %372, %382, %cst_55 {dimension_numbers = #tpu.dot_dimension_numbers<[1], [0], [0], [1], [0, 0, 1, 1], [], []>} : vector<128x128xbf16>, vector<128x32xbf16>, vector<128x32xf32> -> vector<128x32xf32>
    %cst_56 = arith.constant 0.949999988 : f32
    %384 = vector.broadcast %cst_56 : f32 to vector<128x32xf32>
    %385 = arith.mulf %384, %383 : vector<128x32xf32>
    %386 = arith.addf %381, %385 : vector<128x32xf32>
    %c0_57 = arith.constant 0 : index
    %c0_58 = arith.constant 0 : index
    %387 = vector.load %arg8[%c0_57, %c0_58] : memref<32x8xf32, #tpu.memory_space<vmem>>, vector<32x8xf32>
    %388 = arith.truncf %386 : vector<128x32xf32> to vector<128x32xbf16>
    %389 = arith.truncf %387 : vector<32x8xf32> to vector<32x8xbf16>
    %cst_59 = arith.constant dense<0.000000e+00> : vector<128x8xf32>
    %390 = tpu.matmul %388, %389, %cst_59 {dimension_numbers = #tpu.dot_dimension_numbers<[1], [0], [0], [1], [0, 0, 1, 1], [], []>} : vector<128x32xbf16>, vector<32x8xbf16>, vector<128x8xf32> -> vector<128x8xf32>
    %c0_60 = arith.constant 0 : index
    %c0_61 = arith.constant 0 : index
    %391 = vector.load %arg9[%c0_60, %c0_61] : memref<1x8xf32, #tpu.memory_space<vmem>>, vector<1x8xf32>
    %392 = vector.broadcast %391 : vector<1x8xf32> to vector<128x8xf32>
    %393 = arith.addf %390, %392 : vector<128x8xf32>
    %cst_62 = arith.constant 0.000000e+00 : f32
    %394 = vector.broadcast %cst_62 : f32 to vector<128x8xf32>
    %395 = arith.cmpf ogt, %393, %394 : vector<128x8xf32>
    %cst_63 = arith.constant 0.00999999977 : f32
    %396 = vector.broadcast %cst_63 : f32 to vector<128x8xf32>
    %397 = arith.mulf %396, %393 : vector<128x8xf32>
    %398 = arith.select %395, %393, %397 : vector<128x8xi1>, vector<128x8xf32>
    %c0_64 = arith.constant 0 : index
    %c0_65 = arith.constant 0 : index
    %399 = vector.load %arg10[%c0_64, %c0_65] : memref<128x8xf32, #tpu.memory_space<vmem>>, vector<128x8xf32>
    tpu.vector_store %arg10[%c0_64, %c0_65], %398 {strides = array<i32>} : memref<128x8xf32, #tpu.memory_space<vmem>>, vector<128x8xf32>,
    return
  }
}

</mosaic_0001>

<bundles_post_ra>
// kernel: mul.4
= control target key start
LH: loop header
LB: loop body
LE: loop exit
PB: predicated region body
PF: predicated region fallthrough
CT: control target
= control target key end

     0   :  { %vm68_vm0 = vcmask 1047556   ;;  %s167_s9 = smov 8   ;;  %s168_s10 = smov 4   ;;  %vm70_vm1 = vcmask 31744   ;;  %vm89_vm2 = vcmask 130144   ;;  %vm110_vm3 = vcmask 97344   ;;  %s259_s0 = inlined_call_operand.vmem [shape: f32[4,4,4,4], index: 0, kind: input, shape index: {}]   ;;  %s260_s1 = inlined_call_operand.vmem [shape: f32[16,16], index: 1, kind: output, shape index: {}]  }
   0x1   :  { %v152_v0 = vld [vmem:[%s259_s0 + $0x1c] sm:$0xf]  ;;  %v153_v1 = vld [vmem:[%s259_s0 + $0x18] sm:$0xf]  ;;  %v154_v2 = vld [vmem:[%s259_s0 + $0x14] sm:$0xf] }
   0x2   :  { %39 = vst [vmem:[#allocation0 + $0x38] sm:$0xf] %v152_v0  ;;  %v155_v3 = vld [vmem:[%s259_s0 + $0x10] sm:$0xf]  ;;  %v156_v4 = vld [vmem:[%s259_s0 + $0xc] sm:$0xf] }
   0x3   :  { %43 = vst [vmem:[#allocation0 + $0x30] sm:$0xf] %v153_v1  ;;  %v157_v5 = vld [vmem:[%s259_s0 + $0x8] sm:$0xf]  ;;  %v158_v6 = vld [vmem:[%s259_s0 + $0x4] sm:$0xf] }
   0x4   :  { %47 = vst [vmem:[#allocation0 + $0x28] sm:$0xf] %v154_v2  ;;  %v64_v7 = vld [vmem:[%s259_s0] sm:$0xf]  ;;  %v144_v8 = vld [vmem:[%s259_s0 + $0x3c] sm:$0xf] }
   0x5   :  { %51 = vst [vmem:[#allocation0 + $0x20] sm:$0xf] %v155_v3  ;;  %v145_v9 = vld [vmem:[%s259_s0 + $0x38] sm:$0xf]  ;;  %v146_v10 = vld [vmem:[%s259_s0 + $0x34] sm:$0xf] }
   0x6   :  { %55 = vst [vmem:[#allocation0 + $0x18] sm:$0xf] %v156_v4  ;;  %v147_v11 = vld [vmem:[%s259_s0 + $0x30] sm:$0xf]  ;;  %v148_v12 = vld [vmem:[%s259_s0 + $0x2c] sm:$0xf] }
   0x7   :  { %59 = vst [vmem:[#allocation0 + $0x10] sm:$0xf] %v157_v5  ;;  %v149_v13 = vld [vmem:[%s259_s0 + $0x28] sm:$0xf]  ;;  %v150_v15 = vld [vmem:[%s259_s0 + $0x24] sm:$0xf] }
   0x8   :  { %63 = vst [vmem:[#allocation0 + $0x8] sm:$0xf] %v158_v6  ;;  %v151_v17 = vld [vmem:[%s259_s0 + $0x20] sm:$0xf]  ;;  %s166_s0 = smov 12   ;;  %vm131_vm4 = vcmask 64544  }
   0x9   :  { %65 = vst [vmem:[#allocation0] sm:$0xf] %v64_v7 }
   0xa   :  { %7 = vst [vmem:[#allocation0 + $0x78] sm:$0xf] %v144_v8 }
   0xb   :  { %11 = vst [vmem:[#allocation0 + $0x70] sm:$0xf] %v145_v9 }
   0xc   :  { %v84_v14 = vld [vmem:[#allocation0 + $0x3] ss:$8 sm:$0xf0]   ;;  %15 = vst [vmem:[#allocation0 + $0x68] sm:$0xf] %v146_v10 }
   0xd   :  { %v105_v16 = vld [vmem:[#allocation0 + $0x2] ss:$8 sm:$0xf0]   ;;  %19 = vst [vmem:[#allocation0 + $0x60] sm:$0xf] %v147_v11 }
   0xe   :  { %23 = vst [vmem:[#allocation0 + $0x58] sm:$0xf] %v148_v12  ;;  %v126_v18 = vld [vmem:[#allocation0 + $0x1] ss:$8 sm:$0xf0]  }
   0xf   :  { %27 = vst [vmem:[#allocation0 + $0x50] sm:$0xf] %v149_v13  ;;  %v67_v35 = vld [vmem:[#allocation0] ss:$8 sm:$0xf0]  }
  0x10   :  { %v82_v19 = vld [vmem:[#allocation0 + $0x3] ss:$8 sm:$0xf]   ;;  %v103_v20 = vld [vmem:[#allocation0 + $0x2] ss:$8 sm:$0xf]  }
  0x11   :  { %v86_v21 = vsel %vm68_vm0, %v84_v14, %v82_v19  ;;  %v107_v22 = vsel %vm68_vm0, %v105_v16, %v103_v20  ;;  %v124_v23 = vld [vmem:[#allocation0 + $0x1] ss:$8 sm:$0xf]   ;;  %31 = vst [vmem:[#allocation0 + $0x48] sm:$0xf] %v150_v15 }
  0x12   :  { %87 = vrot.lane.b32.xlu0 %v86_v21, %s166_s0  ;;  %108 = vrot.lane.b32.xlu1 %v107_v22, %s167_s9  ;;  %v128_v24 = vsel %vm68_vm0, %v126_v18, %v124_v23  ;;  %35 = vst [vmem:[#allocation0 + $0x40] sm:$0xf] %v151_v17  ;;  %v66_v34 = vld [vmem:[#allocation0] ss:$8 sm:$0xf]  }
  0x13   :  { %129 = vrot.lane.b32.xlu2 %v128_v24, %s168_s10  ;;  %v69_v36 = vsel %vm68_vm0, %v67_v35, %v66_v34 }
  0x14   :  { %v94_v25 = vld [vmem:[#allocation0 + $0x43] ss:$8 sm:$0xf0]   ;;  %v115_v26 = vld [vmem:[#allocation0 + $0x42] ss:$8 sm:$0xf0]  }
  0x15   :  { %v136_v27 = vld [vmem:[#allocation0 + $0x41] ss:$8 sm:$0xf0]   ;;  %71 = vst.msk [vmem:[%s260_s1] sm:$0xff] %vm70_vm1, %v69_v36  }
  0x16   :  { %v75_v38 = vld [vmem:[#allocation0 + $0x40] ss:$8 sm:$0xf0]  }
  0x19   :  { %v92_v28 = vld [vmem:[#allocation0 + $0x43] ss:$8 sm:$0xf]   ;;  %v113_v29 = vld [vmem:[#allocation0 + $0x42] ss:$8 sm:$0xf]  }
  0x1a   :  { %v96_v30 = vsel %vm68_vm0, %v94_v25, %v92_v28  ;;  %v117_v31 = vsel %vm68_vm0, %v115_v26, %v113_v29  ;;  %v134_v32 = vld [vmem:[#allocation0 + $0x41] ss:$8 sm:$0xf]   ;;  %v73_v37 = vld [vmem:[#allocation0 + $0x40] ss:$8 sm:$0xf]  }
  0x1b   :  { %97 = vrot.lane.b32.xlu0 %v96_v30, %s166_s0  ;;  %118 = vrot.lane.b32.xlu1 %v117_v31, %s167_s9  ;;  %v138_v33 = vsel %vm68_vm0, %v136_v27, %v134_v32  ;;  %v77_v40 = vsel %vm68_vm0, %v75_v38, %v73_v37 }
  0x1c   :  { %139 = vrot.lane.b32.xlu2 %v138_v33, %s168_s10  ;;  %159 = vst.msk [vmem:[%s260_s1 + $0x8] sm:$0xff] %vm70_vm1, %v77_v40  }
  0x6d   :  { %v130_v39 = vpop.permute.xlu2 %129  }
  0x76   :  { %v140_v41 = vpop.permute.xlu2 %139  }
  0x84   :  { %v88_v42 = vpop.permute.xlu0 %87   ;;  %v109_v43 = vpop.permute.xlu1 %108  }
  0x85   :  { %90 = vst.msk [vmem:[%s260_s1] sm:$0xff] %vm89_vm2, %v88_v42  }
  0x86   :  { %111 = vst.msk [vmem:[%s260_s1] sm:$0xff] %vm110_vm3, %v109_v43  }
  0x87   :  { %132 = vst.msk [vmem:[%s260_s1] sm:$0xff] %vm131_vm4, %v130_v39  }
  0x8d   :  { %v98_v44 = vpop.permute.xlu0 %97   ;;  %v119_v45 = vpop.permute.xlu1 %118  }
  0x8e   :  { %160 = vst.msk [vmem:[%s260_s1 + $0x8] sm:$0xff] %vm89_vm2, %v98_v44  }
  0x8f   :  { %161 = vst.msk [vmem:[%s260_s1 + $0x8] sm:$0xff] %vm110_vm3, %v119_v45  }
  0x90   :  { %162 = vst.msk [vmem:[%s260_s1 + $0x8] sm:$0xff] %vm131_vm4, %v140_v41  }

// kernel: srdgru_forward.2
= control target key start
LH: loop header
LB: loop body
LE: loop exit
PB: predicated region body
PF: predicated region fallthrough
CT: control target
= control target key end

     0   :  { %v832_v0 = vmov 0   ;;  %s833_s25 = smov 32   ;;  %vm734_vm1 = vcmask 261120   ;;  %vm149_vm5 = vcmask 130048   ;;  %s834_s19 = smov 96   ;;  %s1129_s0 = inlined_call_operand.vmem [shape: f32[64,1], index: 0, kind: input, shape index: {}]   ;;  %s1130_s4 = inlined_call_operand.vmem [shape: f32[16,48], index: 4, kind: input, shape index: {}]   ;;  %s1131_s6 = inlined_call_operand.vmem [shape: f32[1,16], index: 6, kind: input, shape index: {}]   ;;  %s1132_s1 = inlined_call_operand.vmem [shape: f32[1,16], index: 1, kind: input, shape index: {}]   ;;  %s1133_s2 = inlined_call_operand.vmem [shape: f32[1,16], index: 2, kind: input, shape index: {}]   ;;  %s1134_s7 = inlined_call_operand.vmem [shape: f32[1,32], index: 7, kind: input, shape index: {}]   ;;  %s1135_s8 = inlined_call_operand.vmem [shape: f32[1,32], index: 8, kind: input, shape index: {}]   ;;  %s1136_s5 = inlined_call_operand.vmem [shape: f32[1,48], index: 5, kind: input, shape index: {}]   ;;  %s1137_s3 = inlined_call_operand.vmem [shape: f32[16,48], index: 3, kind: input, shape index: {}]   ;;  %s1138_s9 = inlined_call_operand.vmem [shape: f32[8,32], index: 9, kind: input, shape index: {}]   ;;  %s1139_s11 = inlined_call_operand.vmem [shape: f32[8,8,32], index: 11, kind: output, shape index: {1}]   ;;  %s1140_s10 = inlined_call_operand.vmem [shape: f32[8,16], index: 10, kind: output, shape index: {0}]  }
   0x1   :  { %775 = vset.pattern.permute.xlu0 %v832_v0  ;;  %v38_v1 = vld [vmem:[%s1129_s0] sm:$0xff]  ;;  %776 = vset.pattern.permute.xlu1 %v832_v0  ;;  %v138_v3 = vld [vmem:[%s1130_s4 + $0x8] sm:$0xff] }
   0x2   :  { %v137_v2 = vld [vmem:[%s1130_s4] sm:$0xff]  ;;  %49 = vperm.xlu0 %775, %v38_v1   ;;  %777 = vset.pattern.permute.xlu2 %v832_v0  ;;  %v39_v6 = vld [vmem:[%s1129_s0 + $0x8] sm:$0xff] }
   0x3   :  { %v778_v4 = vld [vmem:[%s1131_s6] ss:$0 sm:$0xff]  ;;  %v908_v5 = vpack.c.bf16 %v138_v3, %v137_v2  ;;  %v135_v8 = vld [vmem:[%s1137_s3 + $0x8] sm:$0xff] }
   0x4   :  { %229 = vrot.lane.b32.xlu1 %v778_v4, %s833_s25  ;;  %v134_v7 = vld [vmem:[%s1137_s3] sm:$0xff] }
   0x5   :  { %201 = vmatpush.bf16.msra.mxu1 %v908_v5  ;;  %266 = vmatpush.bf16.msra.mxu2 %v908_v5  ;;  %v136_v9 = vpack.c.bf16 %v135_v8, %v134_v7  ;;  %v929_v10 = vld [vmem:[%s1134_s7] ss:$0 sm:$0xff] }
   0x6   :  { %v934_v11 = vld [vmem:[%s1132_s1] ss:$0 sm:$0xff] }
   0x7   :  { %169 = vmatpush.bf16.msra.mxu0 %v136_v9  ;;  %770 = vmatpush.bf16.msra.mxu3 %v136_v9  ;;  %v939_v12 = vld [vmem:[%s1135_s8] ss:$0 sm:$0xff] }
   0x8   :  { %202 = vmatmul.bf16.vlgmr.msra.gmra.mxu1 %v832_v0  ;;  %v945_v15 = vld [vmem:[%s1133_s2] ss:$0 sm:$0xff] }
   0x9   :  { %386 = vmatpush.bf16.msrb.mxu1 %v908_v5  ;;  %446 = vmatpush.bf16.msrb.mxu2 %v908_v5  ;;  %v952_v18 = vld [vmem:[%s1138_s9] sm:$0xff] }
   0xa   :  { %54 = vperm.xlu0 %775, %v39_v6   ;;  %v977_v40 = vld [vmem:[%s1136_s5] ss:$0 sm:$0xff]  ;;  %s835_s5 = smov 112  }
   0xb   :  { %326 = vmatpush.bf16.msrb.mxu3 %v908_v5 }
   0xd   :  { %566 = vmatpush.bf16.msra.mxu1 %v908_v5 }
  0x74   :  { %v50_v13 = vpop.permute.xlu0 %49 }
  0x75   :  { %v681_v14 = vmul.f32 %v929_v10, %v50_v13  ;;  %v90_v16 = vmul.f32 %v934_v11, %v50_v13 }
  0x76   :  { %v964_v34 = vpop.permute.xlu1 %229 }
  0x77   :  { %v693_v17 = vadd.f32 %v939_v12, %v681_v14  ;;  %v102_v20 = vadd.f32 %v945_v15, %v90_v16 }
  0x79   :  { %vm701_vm0 = vcmp.gt.f32.partialorder %v693_v17, 0.0  ;;  %v709_v19 = vmul.f32 0.01, %v693_v17  ;;  %v118_v26 = vmul.f32 0.01, %v102_v20  ;;  %vm110_vm2 = vcmp.gt.f32.partialorder %v102_v20, 0.0 }
  0x7b   :  { %v717_v21 = vsel %vm701_vm0, %v693_v17, %v709_v19  ;;  %v126_v32 = vsel %vm110_vm2, %v102_v20, %v118_v26 }
  0x7c   :  { %v726_v22 = vadd.f32 %v952_v18, %v717_v21  ;;  %v55_v23 = vpop.permute.xlu0 %54 }
  0x7d   :  { %v91_v24 = vmul.f32 %v934_v11, %v55_v23  ;;  %v682_v25 = vmul.f32 %v929_v10, %v55_v23 }
  0x7e   :  { %735 = vst.msk [vmem:[%s1139_s11] sm:$0xff] %vm734_vm1, %v726_v22 }
  0x7f   :  { %v103_v27 = vadd.f32 %v945_v15, %v91_v24  ;;  %v694_v28 = vadd.f32 %v939_v12, %v682_v25 }
  0x81   :  { %v119_v29 = vmul.f32 0.01, %v103_v27  ;;  %vm702_vm3 = vcmp.gt.f32.partialorder %v694_v28, 0.0  ;;  %v710_v30 = vmul.f32 0.01, %v694_v28  ;;  %vm111_vm4 = vcmp.gt.f32.partialorder %v103_v27, 0.0 }
  0x83   :  { %v718_v31 = vsel %vm702_vm3, %v694_v28, %v710_v30  ;;  %v127_v33 = vsel %vm111_vm4, %v103_v27, %v119_v29 }
  0x84   :  { %v727_v35 = vadd.f32 %v952_v18, %v718_v31  ;;  %v141_v36 = vpack.c.bf16 %v127_v33, %v126_v32  ;;  %v44_v32 = vld [vmem:[%s1129_s0 + $0x30] sm:$0xff]  ;;  %v45_v33 = vld [vmem:[%s1129_s0 + $0x38] sm:$0xff] }
  0x85   :  { %v203_v37 = vpop.f32.mrf.mxu1 }
  0x86   :  { %736 = vst.msk [vmem:[%s1139_s11 + $0x8] sm:$0xff] %vm734_vm1, %v727_v35  ;;  %751 = vmatmul.msk.bf16.vlgmr.msra.gmra.mxu0 %vm149_vm5, %v141_v36  ;;  %v232_v38 = vadd.f32 %v964_v34, %v203_v37  ;;  %v40_v35 = vld [vmem:[%s1129_s0 + $0x10] sm:$0xff]  ;;  %v41_v36 = vld [vmem:[%s1129_s0 + $0x18] sm:$0xff] }
  0x88   :  { %234 = vrot.lane.b32.xlu1 %v232_v38, %s834_s19 }
  0x8d   :  { %v205_v39 = vpop.f32.mrf.mxu1 }
  0xfa   :  { %v235_v54 = vpop.permute.xlu1 %234 }
 0x103   :  { %v171_v41 = vpop.f32.mrf.mxu0 }
 0x104   :  { %v172_v42 = vadd.f32 %v977_v40, %v171_v41 }
 0x106   :  { %v207_v43 = vadd.f32 %v203_v37, %v172_v42 }
 0x108   :  { %v755_v44 = vmul.f32 -1.442695, %v207_v43 }
 0x10a   :  { %784 = vpow2.f32 %v755_v44 }
 0x10b   :  { %v173_v9 = vpop.f32.mrf.mxu0 }
 0x10c   :  { %v174_v13 = vadd.f32 %v977_v40, %v173_v9 }
 0x110   :  { %v785_v45 = vpop.eup %784 }
 0x111   :  { %v211_v46 = vadd.f32 1.0, %v785_v45 }
 0x113   :  { %786 = vrcp.f32 %v211_v46  ;;  %v223_v50 = vand.u32 2147483648, %v211_v46  ;;  %v221_v52 = vand.u32 2147483647, %v211_v46  ;;  %vm217_vm7 = vweird.f32 %v211_v46 }
 0x115   :  { %v224_v55 = vor.u32 1.1754944e-38, %v223_v50  ;;  %vm222_vm9 = vcmp.eq.f32.partialorder %v221_v52, 8.507059e+37 }
 0x119   :  { %v787_v47 = vpop.eup %786 }
 0x11a   :  { %v213_v48 = vmul.f32 %v787_v47, %v211_v46  ;;  %vm218_vm6 = vweird.f32 %v787_v47 }
 0x11b   :  { %vm219_vm8 = vmor %vm217_vm7, %vm218_vm6 }
 0x11c   :  { %v214_v49 = vsub.f32 1.0, %v213_v48 }
 0x11e   :  { %v215_v51 = vmul.f32 %v787_v47, %v214_v49 }
 0x120   :  { %v216_v53 = vadd.f32 %v787_v47, %v215_v51 }
 0x122   :  { %v220_v56 = vsel %vm219_vm8, %v787_v47, %v216_v53 }
 0x123   :  { %v225_v57 = vsel %vm222_vm9, %v224_v55, %v220_v56 }
 0x124   :  { %v237_v58 = vmul.f32 %v235_v54, %v225_v57  ;;  %v244_v62 = vsub.f32 1.0, %v225_v57  ;;  %v250_v0 = vmul.f32 0.0, %v225_v57 }
 0x126   :  { %239 = vrot.lane.b32.xlu2 %v237_v58, %s833_s25 }
 0x180   :  { %v240_v59 = vpop.permute.xlu2 %239 }
 0x181   :  { %v242_v60 = vadd.f32 %v240_v59, %v172_v42 }
 0x183   :  { %788 = vtanh.f32 %v242_v60 }
 0x189   :  { %v789_v61 = vpop.eup %788 }
 0x18a   :  { %246 = vrot.lane.b32.xlu2 %v789_v61, %s835_s5 }
 0x1e4   :  { %v247_v63 = vpop.permute.xlu2 %246 }
 0x1e5   :  { %v249_v1 = vmul.f32 %v247_v63, %v244_v62 }
 0x1e7   :  { %v982_v2 = vadd.f32 %v250_v0, %v249_v1 }
 0x1e9   :  { %v252_v3 = vpack.c.bf16 %v982_v2, %v982_v2 }
 0x1eb   :  { %254 = vrot.lane.b32.xlu0 %v252_v3, %s835_s5 }
 0x25d   :  { %v255_v4 = vpop.permute.xlu0 %254 }
 0x25e   :  { %756 = vmatmul.msk.bf16.vlgmr.msra.gmra.mxu2 %vm149_vm5, %v255_v4 }
 0x25f   :  { %626 = vmatpush.bf16.msra.mxu2 %v908_v5 }
 0x2e1   :  { %v268_v6 = vpop.f32.mrf.mxu2 }
 0x2e2   :  { %v292_v7 = vadd.f32 %v268_v6, %v964_v34  ;;  %v272_v14 = vadd.f32 %v268_v6, %v174_v13 }
 0x2e4   :  { %294 = vrot.lane.b32.xlu1 %v292_v7, %s834_s19  ;;  %v757_v16 = vmul.f32 -1.442695, %v272_v14 }
 0x2e6   :  { %790 = vpow2.f32 %v757_v16 }
 0x2e9   :  { %v270_v8 = vpop.f32.mrf.mxu2 }
 0x2ec   :  { %v791_v17 = vpop.eup %790  ;;  %79 = vperm.xlu1 %776, %v44_v32  }
 0x2ed   :  { %v276_v19 = vadd.f32 1.0, %v791_v17 }
 0x2ef   :  { %792 = vrcp.f32 %v276_v19  ;;  %v288_v25 = vand.u32 2147483648, %v276_v19  ;;  %vm282_vm11 = vweird.f32 %v276_v19  ;;  %v286_v26 = vand.u32 2147483647, %v276_v19 }
 0x2f1   :  { %v289_v28 = vor.u32 1.1754944e-38, %v288_v25  ;;  %vm287_vm13 = vcmp.eq.f32.partialorder %v286_v26, 8.507059e+37 }
 0x2f4   :  { %59 = vperm.xlu1 %776, %v40_v35  }
 0x2f5   :  { %v793_v20 = vpop.eup %792 }
 0x2f6   :  { %v278_v21 = vmul.f32 %v793_v20, %v276_v19  ;;  %vm283_vm10 = vweird.f32 %v793_v20 }
 0x2f7   :  { %vm284_vm12 = vmor %vm282_vm11, %vm283_vm10 }
 0x2f8   :  { %v279_v22 = vsub.f32 1.0, %v278_v21 }
 0x2fa   :  { %v280_v23 = vmul.f32 %v793_v20, %v279_v22 }
 0x2fc   :  { %v281_v24 = vadd.f32 %v793_v20, %v280_v23 }
 0x2fe   :  { %v285_v27 = vsel %vm284_vm12, %v793_v20, %v281_v24 }
 0x2ff   :  { %v992_v30 = vsel %vm287_vm13, %v289_v28, %v285_v27 }
 0x300   :  { %v310_v27 = vmul.f32 %v992_v30, %v982_v2 }
 0x356   :  { %v295_v29 = vpop.permute.xlu1 %294 }
 0x357   :  { %v297_v31 = vmul.f32 %v295_v29, %v992_v30 }
 0x359   :  { %299 = vrot.lane.b32.xlu2 %v297_v31, %s833_s25 }
 0x35e   :  { %v80_v41 = vpop.permute.xlu1 %79 }
 0x35f   :  { %v96_v43 = vmul.f32 %v934_v11, %v80_v41  ;;  %v687_v44 = vmul.f32 %v929_v10, %v80_v41 }
 0x361   :  { %84 = vperm.xlu2 %777, %v45_v33   ;;  %v108_v47 = vadd.f32 %v945_v15, %v96_v43  ;;  %v699_v48 = vadd.f32 %v939_v12, %v687_v44 }
 0x363   :  { %v124_v51 = vmul.f32 0.01, %v108_v47  ;;  %vm707_vm14 = vcmp.gt.f32.partialorder %v699_v48, 0.0  ;;  %v715_v52 = vmul.f32 0.01, %v699_v48  ;;  %vm116_vm0 = vcmp.gt.f32.partialorder %v108_v47, 0.0 }
 0x365   :  { %v723_v55 = vsel %vm707_vm14, %v699_v48, %v715_v52  ;;  %v132_v56 = vsel %vm116_vm0, %v108_v47, %v124_v51 }
 0x366   :  { %v732_v57 = vadd.f32 %v952_v18, %v723_v55  ;;  %v60_v59 = vpop.permute.xlu1 %59 }
 0x367   :  { %v92_v63 = vmul.f32 %v934_v11, %v60_v59  ;;  %v683_v0 = vmul.f32 %v929_v10, %v60_v59 }
 0x368   :  { %741 = vst.msk [vmem:[%s1139_s11 + $0x30] sm:$0xff] %vm734_vm1, %v732_v57 }
 0x369   :  { %64 = vperm.xlu2 %777, %v41_v36   ;;  %v104_v6 = vadd.f32 %v945_v15, %v92_v63  ;;  %v695_v7 = vadd.f32 %v939_v12, %v683_v0 }
 0x36b   :  { %vm703_vm3 = vcmp.gt.f32.partialorder %v695_v7, 0.0  ;;  %v711_v14 = vmul.f32 0.01, %v695_v7  ;;  %vm112_vm4 = vcmp.gt.f32.partialorder %v104_v6, 0.0 }
 0x36d   :  { %v719_v19 = vsel %vm703_vm3, %v695_v7, %v711_v14 }
 0x36e   :  { %v728_v21 = vadd.f32 %v952_v18, %v719_v19 }
 0x370   :  { %737 = vst.msk [vmem:[%s1139_s11 + $0x10] sm:$0xff] %vm734_vm1, %v728_v21 }
 0x3b3   :  { %v300_v37 = vpop.permute.xlu2 %299 }
 0x3b4   :  { %v302_v38 = vadd.f32 %v300_v37, %v174_v13  ;;  %v120_v13 = vmul.f32 0.01, %v104_v6 }
 0x3b6   :  { %794 = vtanh.f32 %v302_v38  ;;  %v128_v20 = vsel %vm112_vm4, %v104_v6, %v120_v13 }
 0x3bb   :  { %v85_v42 = vpop.permute.xlu2 %84 }
 0x3bc   :  { %v795_v39 = vpop.eup %794  ;;  %v97_v45 = vmul.f32 %v934_v11, %v85_v42  ;;  %v688_v46 = vmul.f32 %v929_v10, %v85_v42 }
 0x3bd   :  { %306 = vrot.lane.b32.xlu0 %v795_v39, %s835_s5 }
 0x3be   :  { %v109_v49 = vadd.f32 %v945_v15, %v97_v45  ;;  %v700_v50 = vadd.f32 %v939_v12, %v688_v46 }
 0x3c0   :  { %vm708_vm15 = vcmp.gt.f32.partialorder %v700_v50, 0.0  ;;  %v125_v53 = vmul.f32 0.01, %v109_v49  ;;  %v716_v54 = vmul.f32 0.01, %v700_v50  ;;  %vm117_vm2 = vcmp.gt.f32.partialorder %v109_v49, 0.0 }
 0x3c2   :  { %v724_v58 = vsel %vm708_vm15, %v700_v50, %v716_v54  ;;  %v133_v61 = vsel %vm117_vm2, %v109_v49, %v125_v53 }
 0x3c3   :  { %v65_v60 = vpop.permute.xlu2 %64  ;;  %v733_v62 = vadd.f32 %v952_v18, %v724_v58  ;;  %v144_v4 = vpack.c.bf16 %v133_v61, %v132_v56 }
 0x3c4   :  { %v93_v1 = vmul.f32 %v934_v11, %v65_v60  ;;  %v684_v3 = vmul.f32 %v929_v10, %v65_v60 }
 0x3c5   :  { %742 = vst.msk [vmem:[%s1139_s11 + $0x38] sm:$0xff] %vm734_vm1, %v733_v62  ;;  %754 = vmatmul.msk.bf16.vlgmr.msra.gmra.mxu3 %vm149_vm5, %v144_v4 }
 0x3c6   :  { %v105_v8 = vadd.f32 %v945_v15, %v93_v1  ;;  %v696_v9 = vadd.f32 %v939_v12, %v684_v3  ;;  %506 = vmatpush.bf16.msra.mxu3 %v908_v5  ;;  %v304_v5 = vsub.f32 1.0, %v992_v30 }
 0x3c8   :  { %v121_v16 = vmul.f32 0.01, %v105_v8  ;;  %vm704_vm6 = vcmp.gt.f32.partialorder %v696_v9, 0.0  ;;  %v712_v17 = vmul.f32 0.01, %v696_v9  ;;  %vm113_vm7 = vcmp.gt.f32.partialorder %v105_v8, 0.0 }
 0x3ca   :  { %v720_v22 = vsel %vm704_vm6, %v696_v9, %v712_v17  ;;  %v129_v23 = vsel %vm113_vm7, %v105_v8, %v121_v16 }
 0x3cb   :  { %v729_v24 = vadd.f32 %v952_v18, %v720_v22  ;;  %v142_v25 = vpack.c.bf16 %v129_v23, %v128_v20 }
 0x3cd   :  { %738 = vst.msk [vmem:[%s1139_s11 + $0x18] sm:$0xff] %vm734_vm1, %v729_v24  ;;  %752 = vmatmul.msk.bf16.gmra.mxu0 %vm149_vm5, %v142_v25 }
 0x42f   :  { %v307_v26 = vpop.permute.xlu0 %306 }
 0x430   :  { %v309_v28 = vmul.f32 %v307_v26, %v304_v5 }
 0x432   :  { %v311_v29 = vadd.f32 %v310_v27, %v309_v28 }
 0x434   :  { %v312_v31 = vpack.c.bf16 %v311_v29, %v311_v29 }
 0x436   :  { %314 = vrot.lane.b32.xlu0 %v312_v31, %s835_s5 }
 0x448   :  { %v1053_v33 = vpop.f32.mrf.mxu3 }
 0x44a   :  { %v176_v39 = vpop.f32.mrf.mxu0 }
 0x44b   :  { %v177_v2 = vadd.f32 %v977_v40, %v176_v39 }
 0x450   :  { %v1055_v35 = vpop.f32.mrf.mxu3 }
 0x452   :  { %v178_v7 = vpop.f32.mrf.mxu0 }
 0x453   :  { %v179_v8 = vadd.f32 %v977_v40, %v178_v7 }
 0x4a8   :  { %v315_v32 = vpop.permute.xlu0 %314 }
 0x4a9   :  { %758 = vmatmul.msk.bf16.vlgmr.msrb.gmra.mxu3 %vm149_vm5, %v315_v32 }
 0x52c   :  { %v328_v36 = vpop.f32.mrf.mxu3 }
 0x52d   :  { %v352_v37 = vadd.f32 %v328_v36, %v964_v34  ;;  %v332_v30 = vadd.f32 %v328_v36, %v177_v2 }
 0x52f   :  { %354 = vrot.lane.b32.xlu0 %v352_v37, %s834_s19  ;;  %v759_v41 = vmul.f32 -1.442695, %v332_v30 }
 0x531   :  { %796 = vpow2.f32 %v759_v41  ;;  %v43_v41 = vld [vmem:[%s1129_s0 + $0x28] sm:$0xff] }
 0x534   :  { %v330_v38 = vpop.f32.mrf.mxu3 }
 0x537   :  { %v797_v42 = vpop.eup %796 }
 0x538   :  { %v336_v43 = vadd.f32 1.0, %v797_v42 }
 0x53a   :  { %798 = vrcp.f32 %v336_v43  ;;  %v348_v49 = vand.u32 2147483648, %v336_v43  ;;  %vm342_vm9 = vweird.f32 %v336_v43  ;;  %v346_v50 = vand.u32 2147483647, %v336_v43 }
 0x53c   :  { %v349_v52 = vor.u32 1.1754944e-38, %v348_v49  ;;  %vm347_vm11 = vcmp.eq.f32.partialorder %v346_v50, 8.507059e+37 }
 0x540   :  { %v799_v44 = vpop.eup %798 }
 0x541   :  { %v338_v45 = vmul.f32 %v799_v44, %v336_v43  ;;  %vm343_vm8 = vweird.f32 %v799_v44 }
 0x542   :  { %vm344_vm10 = vmor %vm342_vm9, %vm343_vm8 }
 0x543   :  { %v339_v46 = vsub.f32 1.0, %v338_v45 }
 0x545   :  { %v340_v47 = vmul.f32 %v799_v44, %v339_v46 }
 0x547   :  { %v341_v48 = vadd.f32 %v799_v44, %v340_v47 }
 0x549   :  { %v345_v51 = vsel %vm344_vm10, %v799_v44, %v341_v48 }
 0x54a   :  { %v350_v54 = vsel %vm347_vm11, %v349_v52, %v345_v51 }
 0x54b   :  { %v364_v59 = vsub.f32 1.0, %v350_v54  ;;  %v370_v61 = vmul.f32 %v350_v54, %v311_v29  ;;  %v42_v29 = vld [vmem:[%s1129_s0 + $0x20] sm:$0xff] }
 0x5a1   :  { %v355_v53 = vpop.permute.xlu0 %354 }
 0x5a2   :  { %v357_v55 = vmul.f32 %v355_v53, %v350_v54 }
 0x5a4   :  { %359 = vrot.lane.b32.xlu1 %v357_v55, %s833_s25 }
 0x616   :  { %v360_v56 = vpop.permute.xlu1 %359 }
 0x617   :  { %v362_v57 = vadd.f32 %v360_v56, %v177_v2 }
 0x619   :  { %800 = vtanh.f32 %v362_v57 }
 0x61f   :  { %v801_v58 = vpop.eup %800 }
 0x620   :  { %366 = vrot.lane.b32.xlu2 %v801_v58, %s835_s5 }
 0x67a   :  { %v367_v60 = vpop.permute.xlu2 %366 }
 0x67b   :  { %v369_v62 = vmul.f32 %v367_v60, %v364_v59 }
 0x67d   :  { %v371_v63 = vadd.f32 %v370_v61, %v369_v62 }
 0x67f   :  { %v372_v0 = vpack.c.bf16 %v371_v63, %v371_v63 }
 0x681   :  { %374 = vrot.lane.b32.xlu0 %v372_v0, %s835_s5 }
 0x6f3   :  { %v375_v1 = vpop.permute.xlu0 %374 }
 0x6f4   :  { %760 = vmatmul.msk.bf16.vlgmr.msrb.gmra.mxu1 %vm149_vm5, %v375_v1 }
 0x771   :  { %v388_v3 = vpop.f32.mrf.mxu1 }
 0x772   :  { %v412_v4 = vadd.f32 %v388_v3, %v964_v34  ;;  %v392_v9 = vadd.f32 %v388_v3, %v179_v8 }
 0x774   :  { %414 = vrot.lane.b32.xlu1 %v412_v4, %s834_s19  ;;  %v761_v13 = vmul.f32 -1.442695, %v392_v9 }
 0x776   :  { %802 = vpow2.f32 %v761_v13 }
 0x779   :  { %v390_v6 = vpop.f32.mrf.mxu1 }
 0x77c   :  { %v803_v14 = vpop.eup %802 }
 0x77d   :  { %v396_v16 = vadd.f32 1.0, %v803_v14 }
 0x77f   :  { %804 = vrcp.f32 %v396_v16  ;;  %v408_v23 = vand.u32 2147483648, %v396_v16  ;;  %vm402_vm13 = vweird.f32 %v396_v16  ;;  %v406_v24 = vand.u32 2147483647, %v396_v16 }
 0x781   :  { %v409_v5 = vor.u32 1.1754944e-38, %v408_v23  ;;  %vm407_vm15 = vcmp.eq.f32.partialorder %v406_v24, 8.507059e+37 }
 0x785   :  { %v805_v17 = vpop.eup %804 }
 0x786   :  { %v398_v19 = vmul.f32 %v805_v17, %v396_v16  ;;  %vm403_vm12 = vweird.f32 %v805_v17 }
 0x787   :  { %vm404_vm14 = vmor %vm402_vm13, %vm403_vm12 }
 0x788   :  { %v399_v20 = vsub.f32 1.0, %v398_v19 }
 0x78a   :  { %v400_v21 = vmul.f32 %v805_v17, %v399_v20 }
 0x78c   :  { %v401_v22 = vadd.f32 %v805_v17, %v400_v21 }
 0x78e   :  { %v405_v25 = vsel %vm404_vm14, %v805_v17, %v401_v22 }
 0x78f   :  { %v410_v27 = vsel %vm407_vm15, %v409_v5, %v405_v25 }
 0x790   :  { %v424_v43 = vsub.f32 1.0, %v410_v27  ;;  %v430_v45 = vmul.f32 %v410_v27, %v371_v63 }
 0x7e6   :  { %v415_v26 = vpop.permute.xlu1 %414 }
 0x7e7   :  { %v417_v28 = vmul.f32 %v415_v26, %v410_v27 }
 0x7e9   :  { %419 = vrot.lane.b32.xlu2 %v417_v28, %s833_s25 }
 0x7f1   :  { %69 = vperm.xlu2 %777, %v42_v29  }
 0x843   :  { %v420_v31 = vpop.permute.xlu2 %419 }
 0x844   :  { %v422_v32 = vadd.f32 %v420_v31, %v179_v8 }
 0x846   :  { %806 = vtanh.f32 %v422_v32 }
 0x84b   :  { %v70_v36 = vpop.permute.xlu2 %69 }
 0x84c   :  { %v807_v37 = vpop.eup %806  ;;  %v685_v38 = vmul.f32 %v929_v10, %v70_v36  ;;  %v94_v47 = vmul.f32 %v934_v11, %v70_v36 }
 0x84d   :  { %426 = vrot.lane.b32.xlu0 %v807_v37, %s835_s5 }
 0x84e   :  { %v697_v39 = vadd.f32 %v939_v12, %v685_v38  ;;  %v106_v50 = vadd.f32 %v945_v15, %v94_v47 }
 0x850   :  { %vm705_vm0 = vcmp.gt.f32.partialorder %v697_v39, 0.0  ;;  %v713_v2 = vmul.f32 0.01, %v697_v39  ;;  %v122_v54 = vmul.f32 0.01, %v106_v50  ;;  %vm114_vm2 = vcmp.gt.f32.partialorder %v106_v50, 0.0 }
 0x852   :  { %v721_v30 = vsel %vm705_vm0, %v697_v39, %v713_v2  ;;  %v130_v60 = vsel %vm114_vm2, %v106_v50, %v122_v54 }
 0x853   :  { %v730_v42 = vadd.f32 %v952_v18, %v721_v30 }
 0x855   :  { %739 = vst.msk [vmem:[%s1139_s11 + $0x20] sm:$0xff] %vm734_vm1, %v730_v42  ;;  %74 = vperm.xlu0 %775, %v43_v41  }
 0x8bf   :  { %v427_v44 = vpop.permute.xlu0 %426 }
 0x8c0   :  { %v429_v46 = vmul.f32 %v427_v44, %v424_v43 }
 0x8c2   :  { %v431_v48 = vadd.f32 %v430_v45, %v429_v46 }
 0x8c4   :  { %v432_v49 = vpack.c.bf16 %v431_v48, %v431_v48 }
 0x8c6   :  { %434 = vrot.lane.b32.xlu1 %v432_v49, %s835_s5 }
 0x8c7   :  { %v75_v51 = vpop.permute.xlu0 %74 }
 0x8c8   :  { %v95_v52 = vmul.f32 %v934_v11, %v75_v51  ;;  %v686_v53 = vmul.f32 %v929_v10, %v75_v51 }
 0x8ca   :  { %v107_v55 = vadd.f32 %v945_v15, %v95_v52  ;;  %v698_v56 = vadd.f32 %v939_v12, %v686_v53 }
 0x8cc   :  { %v123_v57 = vmul.f32 0.01, %v107_v55  ;;  %vm706_vm3 = vcmp.gt.f32.partialorder %v698_v56, 0.0  ;;  %v714_v58 = vmul.f32 0.01, %v698_v56  ;;  %vm115_vm4 = vcmp.gt.f32.partialorder %v107_v55, 0.0 }
 0x8ce   :  { %v722_v59 = vsel %vm706_vm3, %v698_v56, %v714_v58  ;;  %v131_v61 = vsel %vm115_vm4, %v107_v55, %v123_v57 }
 0x8cf   :  { %v731_v62 = vadd.f32 %v952_v18, %v722_v59  ;;  %v143_v63 = vpack.c.bf16 %v131_v61, %v130_v60 }
 0x8d1   :  { %740 = vst.msk [vmem:[%s1139_s11 + $0x28] sm:$0xff] %vm734_vm1, %v731_v62  ;;  %753 = vmatmul.msk.bf16.gmra.mxu0 %vm149_vm5, %v143_v63 }
 0x938   :  { %v435_v10 = vpop.permute.xlu1 %434 }
 0x939   :  { %762 = vmatmul.msk.bf16.vlgmr.msrb.gmra.mxu2 %vm149_vm5, %v435_v10 }
 0x94e   :  { %v181_v0 = vpop.f32.mrf.mxu0 }
 0x94f   :  { %v182_v18 = vadd.f32 %v977_v40, %v181_v0 }
 0x956   :  { %v183_v2 = vpop.f32.mrf.mxu0 }
 0x957   :  { %v184_v30 = vadd.f32 %v977_v40, %v183_v2  ;;  %v189_v2 = vadd.f32 %v977_v40, %v1055_v35 }
 0x9bc   :  { %v448_v11 = vpop.f32.mrf.mxu2 }
 0x9bd   :  { %v472_v12 = vadd.f32 %v448_v11, %v964_v34  ;;  %v452_v1 = vadd.f32 %v448_v11, %v182_v18 }
 0x9bf   :  { %474 = vrot.lane.b32.xlu1 %v472_v12, %s834_s19  ;;  %v763_v3 = vmul.f32 -1.442695, %v452_v1  ;;  %v187_v1 = vadd.f32 %v977_v40, %v1053_v33 }
 0x9c1   :  { %808 = vpow2.f32 %v763_v3 }
 0x9c4   :  { %v450_v15 = vpop.f32.mrf.mxu2 }
 0x9c7   :  { %v809_v4 = vpop.eup %808 }
 0x9c8   :  { %v456_v6 = vadd.f32 1.0, %v809_v4 }
 0x9ca   :  { %810 = vrcp.f32 %v456_v6  ;;  %v468_v16 = vand.u32 2147483648, %v456_v6  ;;  %vm462_vm6 = vweird.f32 %v456_v6  ;;  %v466_v17 = vand.u32 2147483647, %v456_v6 }
 0x9cc   :  { %v469_v20 = vor.u32 1.1754944e-38, %v468_v16  ;;  %vm467_vm8 = vcmp.eq.f32.partialorder %v466_v17, 8.507059e+37 }
 0x9d0   :  { %v811_v7 = vpop.eup %810 }
 0x9d1   :  { %v458_v8 = vmul.f32 %v811_v7, %v456_v6  ;;  %vm463_vm1 = vweird.f32 %v811_v7 }
 0x9d2   :  { %vm464_vm7 = vmor %vm462_vm6, %vm463_vm1 }
 0x9d3   :  { %v459_v9 = vsub.f32 1.0, %v458_v8 }
 0x9d5   :  { %v460_v13 = vmul.f32 %v811_v7, %v459_v9 }
 0x9d7   :  { %v461_v14 = vadd.f32 %v811_v7, %v460_v13 }
 0x9d9   :  { %v465_v19 = vsel %vm464_vm7, %v811_v7, %v461_v14 }
 0x9da   :  { %v470_v22 = vsel %vm467_vm8, %v469_v20, %v465_v19 }
 0x9db   :  { %v484_v26 = vsub.f32 1.0, %v470_v22  ;;  %v490_v28 = vmul.f32 %v470_v22, %v431_v48 }
 0xa31   :  { %v475_v21 = vpop.permute.xlu1 %474 }
 0xa32   :  { %v477_v23 = vmul.f32 %v475_v21, %v470_v22 }
 0xa34   :  { %479 = vrot.lane.b32.xlu2 %v477_v23, %s833_s25 }
 0xa8e   :  { %v480_v24 = vpop.permute.xlu2 %479 }
 0xa8f   :  { %v482_v25 = vadd.f32 %v480_v24, %v182_v18 }
 0xa91   :  { %812 = vtanh.f32 %v482_v25 }
 0xa97   :  { %v813_v5 = vpop.eup %812 }
 0xa98   :  { %486 = vrot.lane.b32.xlu0 %v813_v5, %s835_s5 }
 0xb0a   :  { %v487_v27 = vpop.permute.xlu0 %486 }
 0xb0b   :  { %v489_v29 = vmul.f32 %v487_v27, %v484_v26 }
 0xb0d   :  { %v491_v31 = vadd.f32 %v490_v28, %v489_v29 }
 0xb0f   :  { %v492_v32 = vpack.c.bf16 %v491_v31, %v491_v31 }
 0xb11   :  { %494 = vrot.lane.b32.xlu1 %v492_v32, %s835_s5 }
 0xb83   :  { %v495_v36 = vpop.permute.xlu1 %494 }
 0xb84   :  { %764 = vmatmul.msk.bf16.vlgmr.msra.gmra.mxu3 %vm149_vm5, %v495_v36 }
 0xc07   :  { %v508_v37 = vpop.f32.mrf.mxu3 }
 0xc08   :  { %v532_v38 = vadd.f32 %v508_v37, %v964_v34  ;;  %v512_v41 = vadd.f32 %v508_v37, %v184_v30 }
 0xc0a   :  { %534 = vrot.lane.b32.xlu2 %v532_v38, %s834_s19  ;;  %v765_v42 = vmul.f32 -1.442695, %v512_v41 }
 0xc0c   :  { %814 = vpow2.f32 %v765_v42 }
 0xc0f   :  { %v510_v39 = vpop.f32.mrf.mxu3 }
 0xc12   :  { %v815_v43 = vpop.eup %814 }
 0xc13   :  { %v516_v44 = vadd.f32 1.0, %v815_v43 }
 0xc15   :  { %816 = vrcp.f32 %v516_v44  ;;  %v528_v50 = vand.u32 2147483648, %v516_v44  ;;  %vm522_vm10 = vweird.f32 %v516_v44  ;;  %v526_v51 = vand.u32 2147483647, %v516_v44 }
 0xc17   :  { %v529_v53 = vor.u32 1.1754944e-38, %v528_v50  ;;  %vm527_vm12 = vcmp.eq.f32.partialorder %v526_v51, 8.507059e+37 }
 0xc1b   :  { %v817_v45 = vpop.eup %816 }
 0xc1c   :  { %v518_v46 = vmul.f32 %v817_v45, %v516_v44  ;;  %vm523_vm9 = vweird.f32 %v817_v45 }
 0xc1d   :  { %vm524_vm11 = vmor %vm522_vm10, %vm523_vm9 }
 0xc1e   :  { %v519_v47 = vsub.f32 1.0, %v518_v46 }
 0xc20   :  { %v520_v48 = vmul.f32 %v817_v45, %v519_v47 }
 0xc22   :  { %v521_v49 = vadd.f32 %v817_v45, %v520_v48 }
 0xc24   :  { %v525_v52 = vsel %vm524_vm11, %v817_v45, %v521_v49 }
 0xc25   :  { %v530_v55 = vsel %vm527_vm12, %v529_v53, %v525_v52 }
 0xc26   :  { %v544_v60 = vsub.f32 1.0, %v530_v55  ;;  %v550_v62 = vmul.f32 %v530_v55, %v491_v31 }
 0xc64   :  { %v535_v54 = vpop.permute.xlu2 %534 }
 0xc65   :  { %v537_v56 = vmul.f32 %v535_v54, %v530_v55 }
 0xc67   :  { %539 = vrot.lane.b32.xlu0 %v537_v56, %s833_s25 }
 0xcd9   :  { %v540_v57 = vpop.permute.xlu0 %539 }
 0xcda   :  { %v542_v58 = vadd.f32 %v540_v57, %v184_v30 }
 0xcdc   :  { %818 = vtanh.f32 %v542_v58 }
 0xce2   :  { %v819_v59 = vpop.eup %818 }
 0xce3   :  { %546 = vrot.lane.b32.xlu1 %v819_v59, %s835_s5 }
 0xd55   :  { %v547_v61 = vpop.permute.xlu1 %546 }
 0xd56   :  { %v549_v63 = vmul.f32 %v547_v61, %v544_v60 }
 0xd58   :  { %v551_v10 = vadd.f32 %v550_v62, %v549_v63 }
 0xd5a   :  { %v552_v11 = vpack.c.bf16 %v551_v10, %v551_v10 }
 0xd5c   :  { %554 = vrot.lane.b32.xlu2 %v552_v11, %s835_s5 }
 0xdb6   :  { %v555_v12 = vpop.permute.xlu2 %554 }
 0xdb7   :  { %766 = vmatmul.msk.bf16.vlgmr.msra.gmra.mxu1 %vm149_vm5, %v555_v12 }
 0xe34   :  { %v568_v15 = vpop.f32.mrf.mxu1 }
 0xe35   :  { %v592_v0 = vadd.f32 %v568_v15, %v964_v34  ;;  %v572_v3 = vadd.f32 %v568_v15, %v187_v1 }
 0xe37   :  { %594 = vrot.lane.b32.xlu0 %v592_v0, %s834_s19  ;;  %v767_v4 = vmul.f32 -1.442695, %v572_v3 }
 0xe39   :  { %820 = vpow2.f32 %v767_v4 }
 0xe3c   :  { %v570_v18 = vpop.f32.mrf.mxu1 }
 0xe3f   :  { %v821_v6 = vpop.eup %820 }
 0xe40   :  { %v576_v7 = vadd.f32 1.0, %v821_v6 }
 0xe42   :  { %822 = vrcp.f32 %v576_v7  ;;  %v588_v17 = vand.u32 2147483648, %v576_v7  ;;  %vm582_vm14 = vweird.f32 %v576_v7  ;;  %v586_v19 = vand.u32 2147483647, %v576_v7 }
 0xe44   :  { %v589_v21 = vor.u32 1.1754944e-38, %v588_v17  ;;  %vm587_vm0 = vcmp.eq.f32.partialorder %v586_v19, 8.507059e+37 }
 0xe48   :  { %v823_v8 = vpop.eup %822 }
 0xe49   :  { %v578_v9 = vmul.f32 %v823_v8, %v576_v7  ;;  %vm583_vm13 = vweird.f32 %v823_v8 }
 0xe4a   :  { %vm584_vm15 = vmor %vm582_vm14, %vm583_vm13 }
 0xe4b   :  { %v579_v13 = vsub.f32 1.0, %v578_v9 }
 0xe4d   :  { %v580_v14 = vmul.f32 %v823_v8, %v579_v13 }
 0xe4f   :  { %v581_v16 = vadd.f32 %v823_v8, %v580_v14 }
 0xe51   :  { %v585_v20 = vsel %vm584_vm15, %v823_v8, %v581_v16 }
 0xe52   :  { %v590_v22 = vsel %vm587_vm0, %v589_v21, %v585_v20 }
 0xe53   :  { %v604_v26 = vsub.f32 1.0, %v590_v22  ;;  %v610_v28 = vmul.f32 %v590_v22, %v551_v10 }
 0xea9   :  { %v595_v33 = vpop.permute.xlu0 %594 }
 0xeaa   :  { %v597_v23 = vmul.f32 %v595_v33, %v590_v22 }
 0xeac   :  { %599 = vrot.lane.b32.xlu1 %v597_v23, %s833_s25 }
 0xf1e   :  { %v600_v24 = vpop.permute.xlu1 %599 }
 0xf1f   :  { %v602_v25 = vadd.f32 %v600_v24, %v187_v1 }
 0xf21   :  { %824 = vtanh.f32 %v602_v25 }
 0xf27   :  { %v825_v5 = vpop.eup %824 }
 0xf28   :  { %606 = vrot.lane.b32.xlu2 %v825_v5, %s835_s5 }
 0xf82   :  { %v607_v27 = vpop.permute.xlu2 %606 }
 0xf83   :  { %v609_v29 = vmul.f32 %v607_v27, %v604_v26 }
 0xf85   :  { %v611_v31 = vadd.f32 %v610_v28, %v609_v29 }
 0xf87   :  { %v612_v32 = vpack.c.bf16 %v611_v31, %v611_v31 }
 0xf89   :  { %614 = vrot.lane.b32.xlu0 %v612_v32, %s835_s5 }
 0xffb   :  { %v615_v36 = vpop.permute.xlu0 %614 }
 0xffc   :  { %768 = vmatmul.msk.bf16.vlgmr.msra.gmra.mxu2 %vm149_vm5, %v615_v36 }
0x107f   :  { %v628_v37 = vpop.f32.mrf.mxu2 }
0x1080   :  { %v652_v38 = vadd.f32 %v628_v37, %v964_v34  ;;  %v632_v30 = vadd.f32 %v628_v37, %v189_v2 }
0x1082   :  { %654 = vrot.lane.b32.xlu1 %v652_v38, %s834_s19  ;;  %v769_v41 = vmul.f32 -1.442695, %v632_v30 }
0x1084   :  { %826 = vpow2.f32 %v769_v41 }
0x1087   :  { %v630_v39 = vpop.f32.mrf.mxu2 }
0x108a   :  { %v827_v42 = vpop.eup %826 }
0x108b   :  { %v636_v43 = vadd.f32 1.0, %v827_v42 }
0x108d   :  { %828 = vrcp.f32 %v636_v43  ;;  %v648_v49 = vand.u32 2147483648, %v636_v43  ;;  %vm642_vm3 = vweird.f32 %v636_v43  ;;  %v646_v34 = vand.u32 2147483647, %v636_v43 }
0x108f   :  { %v649_v51 = vor.u32 1.1754944e-38, %v648_v49  ;;  %vm647_vm1 = vcmp.eq.f32.partialorder %v646_v34, 8.507059e+37 }
0x1093   :  { %v829_v44 = vpop.eup %828 }
0x1094   :  { %v638_v45 = vmul.f32 %v829_v44, %v636_v43  ;;  %vm643_vm2 = vweird.f32 %v829_v44 }
0x1095   :  { %vm644_vm4 = vmor %vm642_vm3, %vm643_vm2 }
0x1096   :  { %v639_v46 = vsub.f32 1.0, %v638_v45 }
0x1098   :  { %v640_v47 = vmul.f32 %v829_v44, %v639_v46 }
0x109a   :  { %v641_v48 = vadd.f32 %v829_v44, %v640_v47 }
0x109c   :  { %v645_v50 = vsel %vm644_vm4, %v829_v44, %v641_v48 }
0x109d   :  { %v650_v35 = vsel %vm647_vm1, %v649_v51, %v645_v50 }
0x109e   :  { %v664_v56 = vsub.f32 1.0, %v650_v35  ;;  %v670_v58 = vmul.f32 %v650_v35, %v611_v31 }
0x10f4   :  { %v655_v40 = vpop.permute.xlu1 %654 }
0x10f5   :  { %v657_v52 = vmul.f32 %v655_v40, %v650_v35 }
0x10f7   :  { %659 = vrot.lane.b32.xlu2 %v657_v52, %s833_s25 }
0x1151   :  { %v660_v53 = vpop.permute.xlu2 %659 }
0x1152   :  { %v662_v54 = vadd.f32 %v660_v53, %v189_v2 }
0x1154   :  { %830 = vtanh.f32 %v662_v54 }
0x115a   :  { %v831_v55 = vpop.eup %830 }
0x115b   :  { %666 = vrot.lane.b32.xlu0 %v831_v55, %s835_s5 }
0x11cd   :  { %v667_v57 = vpop.permute.xlu0 %666 }
0x11ce   :  { %v669_v59 = vmul.f32 %v667_v57, %v664_v56 }
0x11d0   :  { %v671_v60 = vadd.f32 %v670_v58, %v669_v59 }
0x11d2   :  { %673 = vrot.lane.b32.xlu1 %v671_v60, %s835_s5 }
0x1244   :  { %v674_v61 = vpop.permute.xlu1 %673 }
0x1245   :  { %676 = vst.msk [vmem:[%s1140_s10] sm:$0xff] %vm149_vm5, %v674_v61 }

// kernel: srdgru_forward.3
= control target key start
LH: loop header
LB: loop body
LE: loop exit
PB: predicated region body
PF: predicated region fallthrough
CT: control target
= control target key end

     0   :  { %vm66_vm0 = vcmask 261120   ;;  %v1519_v36 = vmov 0   ;;  %s1520_s20 = smov 64   ;;  %s1521_s28 = smov 32   ;;  %vm162_vm9 = vcmask 523264   ;;  %s2349_s1 = inlined_call_operand.vmem [shape: f32[32,192], index: 1, kind: input, shape index: {}]   ;;  %s2350_s0 = inlined_call_operand.vmem [shape: f32[8,8,32], index: 0, kind: input, shape index: {}]   ;;  %s2351_s2 = inlined_call_operand.vmem [shape: f32[64,192], index: 2, kind: input, shape index: {}]   ;;  %s2352_s3 = inlined_call_operand.vmem [shape: f32[1,192], index: 3, kind: input, shape index: {}]   ;;  %s2353_s4 = inlined_call_operand.vmem [shape: f32[1,64], index: 4, kind: input, shape index: {}]   ;;  %s2354_s6 = inlined_call_operand.vmem [shape: f32[1,32], index: 6, kind: input, shape index: {}]   ;;  %s2355_s5 = inlined_call_operand.vmem [shape: f32[64,32], index: 5, kind: input, shape index: {}]   ;;  %s2356_s7 = inlined_call_operand.vmem [shape: f32[128,128], index: 7, kind: input, shape index: {}]   ;;  %s2357_s8 = inlined_call_operand.vmem [shape: f32[32,8], index: 8, kind: input, shape index: {}]   ;;  %s2358_s9 = inlined_call_operand.vmem [shape: f32[1,8], index: 9, kind: input, shape index: {}]   ;;  %s2359_s10 = inlined_call_operand.vmem [shape: f32[128,8], index: 10, kind: output, shape index: {}]  }
   0x1   :  { %v48_v0 = vld [vmem:[%s2349_s1 + $0x20] sm:$0xff]  ;;  %v50_v1 = vld [vmem:[%s2349_s1 + $0x30] sm:$0xff]  ;;  %v49_v5 = vld [vmem:[%s2349_s1 + $0x28] sm:$0xff] }
   0x2   :  { %v44_v2 = vld [vmem:[%s2349_s1] sm:$0xff]  ;;  %v54_v3 = vpack.c.bf16 %v50_v1, %v48_v0  ;;  %v46_v4 = vld [vmem:[%s2349_s1 + $0x10] sm:$0xff]  ;;  %v51_v6 = vld [vmem:[%s2349_s1 + $0x38] sm:$0xff] }
   0x3   :  { %v52_v7 = vpack.c.bf16 %v46_v4, %v44_v2  ;;  %v36_v8 = vld [vmem:[%s2350_s0] sm:$0xff]  ;;  %v37_v9 = vld [vmem:[%s2350_s0 + $0x8] sm:$0xff]  ;;  %v55_v10 = vpack.c.bf16 %v51_v6, %v49_v5  ;;  %v47_v13 = vld [vmem:[%s2349_s1 + $0x18] sm:$0xff] }
   0x4   :  { %85 = vmatpush.bf16.msra.mxu0 %v54_v3  ;;  %v56_v11 = vpack.c.bf16 %v37_v9, %v36_v8  ;;  %v45_v12 = vld [vmem:[%s2349_s1 + $0x8] sm:$0xff]  ;;  %v42_v15 = vld [vmem:[%s2350_s0 + $0x30] sm:$0xff]  ;;  %v43_v16 = vld [vmem:[%s2350_s0 + $0x38] sm:$0xff] }
   0x5   :  { %1430 = vmatpush.bf16.msra.mxu1 %v55_v10  ;;  %v53_v14 = vpack.c.bf16 %v47_v13, %v45_v12  ;;  %v59_v17 = vpack.c.bf16 %v43_v16, %v42_v15  ;;  %v38_v18 = vld [vmem:[%s2350_s0 + $0x10] sm:$0xff]  ;;  %v39_v19 = vld [vmem:[%s2350_s0 + $0x18] sm:$0xff]  ;;  %v40_v21 = vld [vmem:[%s2350_s0 + $0x20] sm:$0xff] }
   0x6   :  { %v57_v20 = vpack.c.bf16 %v39_v19, %v38_v18  ;;  %v41_v22 = vld [vmem:[%s2350_s0 + $0x28] sm:$0xff]  ;;  %v149_v24 = vld [vmem:[%s2351_s2 + $0x60] sm:$0xff]  ;;  %v151_v25 = vld [vmem:[%s2351_s2 + $0x70] sm:$0xff] }
   0x7   :  { %v58_v23 = vpack.c.bf16 %v41_v22, %v40_v21  ;;  %v145_v26 = vld [vmem:[%s2351_s2 + $0x40] sm:$0xff]  ;;  %v1639_v27 = vpack.c.bf16 %v151_v25, %v149_v24  ;;  %v147_v28 = vld [vmem:[%s2351_s2 + $0x50] sm:$0xff]  ;;  %v150_v46 = vld [vmem:[%s2351_s2 + $0x68] sm:$0xff] }
   0x8   :  { %86 = vmatpush.bf16.msra.mxu0 %v52_v7  ;;  %v1645_v29 = vpack.c.bf16 %v147_v28, %v145_v26  ;;  %v141_v30 = vld [vmem:[%s2351_s2 + $0x20] sm:$0xff]  ;;  %v143_v31 = vld [vmem:[%s2351_s2 + $0x30] sm:$0xff]  ;;  %v152_v47 = vld [vmem:[%s2351_s2 + $0x78] sm:$0xff] }
   0x9   :  { %1431 = vmatpush.bf16.msra.mxu1 %v53_v14  ;;  %373 = vmatpush.bf16.msra.mxu2 %v1639_v27  ;;  %v1657_v32 = vpack.c.bf16 %v143_v31, %v141_v30  ;;  %v137_v33 = vld [vmem:[%s2351_s2] sm:$0xff]  ;;  %v139_v34 = vld [vmem:[%s2351_s2 + $0x10] sm:$0xff]  ;;  %v1709_v48 = vpack.c.bf16 %v152_v47, %v150_v46  ;;  %v146_v50 = vld [vmem:[%s2351_s2 + $0x48] sm:$0xff] }
   0xa   :  { %v1668_v35 = vpack.c.bf16 %v139_v34, %v137_v33  ;;  %v60_v37 = vld [vmem:[%s2352_s3] sm:$0x3]  ;;  %v148_v51 = vld [vmem:[%s2351_s2 + $0x58] sm:$0xff]  ;;  %v142_v57 = vld [vmem:[%s2351_s2 + $0x28] sm:$0xff] }
   0xb   :  { %1380 = vmatmul.msk.bf16.vlgmr.msra.gmra.mxu0 %vm66_vm0, %v56_v11  ;;  %v1688_v38 = vperm.slane %v60_v37, 0  ;;  %v1711_v49 = vperm.slane %v60_v37, 1  ;;  %286 = vmatpush.bf16.msra.mxu3 %v1709_v48  ;;  %v1721_v54 = vpack.c.bf16 %v148_v51, %v146_v50  ;;  %v144_v58 = vld [vmem:[%s2351_s2 + $0x38] sm:$0xff]  ;;  %v138_v60 = vld [vmem:[%s2351_s2 + $0x8] sm:$0xff]  ;;  %v1821_v28 = vld [vmem:[%s2353_s4] ss:$0 sm:$0xff] }
   0xc   :  { %114 = vmatpush.bf16.msrb.mxu0 %v55_v10  ;;  %1387 = vmatmul.msk.bf16.vlgmr.msra.gmra.mxu1 %vm66_vm0, %v59_v17  ;;  %v1739_v59 = vpack.c.bf16 %v144_v58, %v142_v57  ;;  %v140_v61 = vld [vmem:[%s2351_s2 + $0x18] sm:$0xff]  ;;  %s1522_s2 = smov 96  }
   0xd   :  { %374 = vmatpush.bf16.msra.mxu2 %v1645_v29  ;;  %183 = vmatpush.bf16.msrb.mxu1 %v1709_v48  ;;  %v1749_v63 = vpack.c.bf16 %v140_v61, %v138_v60 }
   0xf   :  { %287 = vmatpush.bf16.msra.mxu3 %v1721_v54 }
  0x10   :  { %115 = vmatpush.bf16.msrb.mxu0 %v53_v14 }
  0x11   :  { %375 = vmatpush.bf16.msra.mxu2 %v1657_v32  ;;  %184 = vmatpush.bf16.msrb.mxu1 %v1721_v54 }
  0x13   :  { %288 = vmatpush.bf16.msra.mxu3 %v1739_v59 }
  0x14   :  { %170 = vmatpush.bf16.msra.mxu0 %v1639_v27 }
  0x15   :  { %376 = vmatpush.bf16.msra.mxu2 %v1668_v35  ;;  %185 = vmatpush.bf16.msrb.mxu1 %v1739_v59 }
  0x17   :  { %289 = vmatpush.bf16.msra.mxu3 %v1749_v63 }
  0x18   :  { %171 = vmatpush.bf16.msra.mxu0 %v1645_v29 }
  0x19   :  { %473 = vmatpush.bf16.msrb.mxu2 %v1639_v27  ;;  %186 = vmatpush.bf16.msrb.mxu1 %v1749_v63 }
  0x1b   :  { %1381 = vmatmul.msk.bf16.gmra.mxu0 %vm66_vm0, %v57_v20  ;;  %386 = vmatpush.bf16.msrb.mxu3 %v1709_v48 }
  0x1c   :  { %172 = vmatpush.bf16.msra.mxu0 %v1657_v32  ;;  %187 = vmatmul.bf16.vlgmr.msrb.gmra.mxu1 %v1519_v36 }
  0x1d   :  { %474 = vmatpush.bf16.msrb.mxu2 %v1645_v29  ;;  %273 = vmatpush.bf16.msra.mxu1 %v1639_v27 }
  0x1f   :  { %387 = vmatpush.bf16.msrb.mxu3 %v1721_v54 }
  0x20   :  { %173 = vmatpush.bf16.msra.mxu0 %v1668_v35 }
  0x21   :  { %475 = vmatpush.bf16.msrb.mxu2 %v1657_v32  ;;  %274 = vmatpush.bf16.msra.mxu1 %v1645_v29 }
  0x23   :  { %388 = vmatpush.bf16.msrb.mxu3 %v1739_v59 }
  0x25   :  { %476 = vmatpush.bf16.msrb.mxu2 %v1668_v35  ;;  %275 = vmatpush.bf16.msra.mxu1 %v1657_v32 }
  0x27   :  { %389 = vmatpush.bf16.msrb.mxu3 %v1749_v63 }
  0x29   :  { %276 = vmatpush.bf16.msra.mxu1 %v1668_v35 }
  0x2b   :  { %1382 = vmatmul.msk.bf16.gmra.mxu0 %vm66_vm0, %v58_v23 }
  0x2d   :  { %586 = vmatpush.bf16.msrb.mxu1 %v1709_v48 }
  0x31   :  { %587 = vmatpush.bf16.msrb.mxu1 %v1721_v54 }
  0x35   :  { %588 = vmatpush.bf16.msrb.mxu1 %v1739_v59 }
  0x39   :  { %589 = vmatpush.bf16.msrb.mxu1 %v1749_v63 }
  0x3b   :  { %1383 = vmatmul.msk.bf16.gmra.mxu0 %vm66_vm0, %v59_v17 }
  0x4b   :  { %1384 = vmatmul.msk.bf16.vlgmr.msrb.gmra.mxu0 %vm66_vm0, %v56_v11 }
  0x4c   :  { %573 = vmatpush.bf16.msrb.mxu0 %v1639_v27 }
  0x50   :  { %574 = vmatpush.bf16.msrb.mxu0 %v1645_v29 }
  0x54   :  { %575 = vmatpush.bf16.msrb.mxu0 %v1657_v32 }
  0x58   :  { %576 = vmatpush.bf16.msrb.mxu0 %v1668_v35 }
  0x5b   :  { %1385 = vmatmul.msk.bf16.gmra.mxu0 %vm66_vm0, %v57_v20 }
  0x6b   :  { %1386 = vmatmul.msk.bf16.gmra.mxu0 %vm66_vm0, %v58_v23 }
  0x7b   :  { %174 = vmatmul.bf16.vlgmr.msra.gmra.mxu0 %v1519_v36 }
  0x7c   :  { %757 = vmatpush.bf16.msra.mxu0 %v1639_v27 }
  0x80   :  { %758 = vmatpush.bf16.msra.mxu0 %v1645_v29 }
  0x84   :  { %759 = vmatpush.bf16.msra.mxu0 %v1657_v32 }
  0x88   :  { %v88_v39 = vpop.f32.mrf.mxu0  ;;  %760 = vmatpush.bf16.msra.mxu0 %v1668_v35 }
  0x89   :  { %v1692_v40 = vadd.f32 %v88_v39, %v1688_v38  ;;  %v1701_v45 = vpop.f32.mrf.mxu1 }
  0x8a   :  { %v1807_v14 = vadd.f32 %v1701_v45, %v1711_v49 }
  0x8b   :  { %206 = vrot.lane.b32.xlu2 %v1692_v40, %s1520_s20 }
  0x90   :  { %v90_v41 = vpop.f32.mrf.mxu0 }
  0x91   :  { %v134_v53 = vpop.f32.mrf.mxu1  ;;  %v1785_v7 = vadd.f32 %v90_v41, %v1688_v38 }
  0x92   :  { %v1727_v56 = vadd.f32 %v134_v53, %v1711_v49 }
  0x94   :  { %202 = vrot.lane.b32.xlu1 %v1727_v56, %s1521_s28 }
  0x98   :  { %v93_v42 = vpop.f32.mrf.mxu0 }
  0x99   :  { %v1697_v43 = vadd.f32 %v93_v42, %v1688_v38  ;;  %v188_v16 = vpop.f32.mrf.mxu1 }
  0x9a   :  { %v257_v36 = vadd.f32 %v1821_v28, %v188_v16 }
  0xa0   :  { %v1699_v44 = vpop.f32.mrf.mxu0 }
  0xa1   :  { %v190_v21 = vpop.f32.mrf.mxu1 }
  0xa8   :  { %v98_v52 = vpop.f32.mrf.mxu0 }
  0xa9   :  { %v1724_v55 = vadd.f32 %v98_v52, %v1688_v38 }
  0xb0   :  { %v100_v62 = vpop.f32.mrf.mxu0 }
  0xb1   :  { %v1752_v0 = vadd.f32 %v100_v62, %v1688_v38 }
  0xb8   :  { %v103_v1 = vpop.f32.mrf.mxu0 }
  0xb9   :  { %v1761_v2 = vadd.f32 %v103_v1, %v1688_v38 }
  0xbb   :  { %296 = vrot.lane.b32.xlu2 %v1761_v2, %s1520_s20 }
  0xc0   :  { %v105_v3 = vpop.f32.mrf.mxu0 }
  0xc1   :  { %v1771_v4 = vadd.f32 %v105_v3, %v1688_v38 }
  0xc3   :  { %193 = vrot.lane.b32.xlu0 %v1771_v4, %s1520_s20 }
  0xc8   :  { %v1776_v5 = vpop.f32.mrf.mxu0 }
  0xcb   :  { %198 = vrot.lane.b32.xlu0 %v1692_v40, %s1522_s2 }
  0xd0   :  { %v1782_v6 = vpop.f32.mrf.mxu0 }
  0xd3   :  { %301 = vrot.lane.b32.xlu0 %v1785_v7, %s1522_s2 }
  0xd8   :  { %v1789_v8 = vpop.f32.mrf.mxu0 }
  0xdb   :  { %309 = vrot.lane.b32.xlu0 %v1785_v7, %s1520_s20 }
  0xe0   :  { %v1793_v9 = vpop.f32.mrf.mxu0 }
  0xe5   :  { %v1824_v39 = vpop.permute.xlu2 %206 }
  0xe6   :  { %v209_v45 = vsel %vm66_vm0, %v1824_v39, %v1727_v56 }
  0xe8   :  { %v1795_v10 = vpop.f32.mrf.mxu0 }
  0xf0   :  { %v129_v11 = vpop.f32.mrf.mxu0 }
  0xf1   :  { %v1798_v12 = vadd.f32 %v129_v11, %v1711_v49 }
  0xf3   :  { %405 = vrot.lane.b32.xlu0 %v1798_v12, %s1521_s28 }
  0xf8   :  { %v175_v13 = vpop.f32.mrf.mxu0 }
  0xf9   :  { %231 = vrot.lane.b32.xlu1 %v175_v13, %s1520_s20 }
  0xfb   :  { %496 = vrot.lane.b32.xlu0 %v1724_v55, %s1520_s20 }
 0x100   :  { %v177_v15 = vpop.f32.mrf.mxu0 }
 0x101   :  { %305 = vrot.lane.b32.xlu1 %v1807_v14, %s1521_s28 }
 0x106   :  { %v203_v47 = vpop.permute.xlu1 %202 }
 0x109   :  { %396 = vrot.lane.b32.xlu1 %v1752_v0, %s1520_s20 }
 0x135   :  { %v1813_v17 = vpop.permute.xlu0 %193 }
 0x136   :  { %v196_v18 = vsel %vm66_vm0, %v1692_v40, %v1813_v17 }
 0x137   :  { %v210_v19 = vadd.f32 %v196_v18, %v175_v13 }
 0x139   :  { %v1388_v20 = vmul.f32 -1.442695, %v210_v19 }
 0x13b   :  { %1439 = vpow2.f32 %v1388_v20 }
 0x13d   :  { %v199_v50 = vpop.permute.xlu0 %198 }
 0x13e   :  { %v205_v52 = vsel %vm66_vm0, %v199_v50, %v203_v47 }
 0x141   :  { %v1440_v22 = vpop.eup %1439 }
 0x142   :  { %v214_v23 = vadd.f32 1.0, %v1440_v22 }
 0x144   :  { %1441 = vrcp.f32 %v214_v23  ;;  %v226_v30 = vand.u32 2147483648, %v214_v23  ;;  %v224_v33 = vand.u32 2147483647, %v214_v23  ;;  %vm220_vm2 = vweird.f32 %v214_v23 }
 0x146   :  { %v227_v37 = vor.u32 1.1754944e-38, %v226_v30  ;;  %vm225_vm4 = vcmp.eq.f32.partialorder %v224_v33, 8.507059e+37 }
 0x14a   :  { %v1442_v24 = vpop.eup %1441 }
 0x14b   :  { %v216_v25 = vmul.f32 %v1442_v24, %v214_v23  ;;  %vm221_vm1 = vweird.f32 %v1442_v24 }
 0x14c   :  { %vm222_vm3 = vmor %vm220_vm2, %vm221_vm1 }
 0x14d   :  { %v217_v26 = vsub.f32 1.0, %v216_v25  ;;  %v1844_v25 = vpop.permute.xlu2 %296 }
 0x14f   :  { %v218_v31 = vmul.f32 %v1442_v24, %v217_v26  ;;  %v299_v26 = vsel %vm66_vm0, %v1785_v7, %v1844_v25 }
 0x151   :  { %v219_v34 = vadd.f32 %v1442_v24, %v218_v31 }
 0x153   :  { %v223_v40 = vsel %vm222_vm3, %v1442_v24, %v219_v34 }
 0x154   :  { %v228_v41 = vsel %vm225_vm4, %v227_v37, %v223_v40 }
 0x155   :  { %v258_v42 = vmul.f32 %v257_v36, %v228_v41 }
 0x157   :  { %v259_v46 = vadd.f32 %v258_v42, %v209_v45  ;;  %v1856_v45 = vadd.f32 %v1795_v10, %v1711_v49 }
 0x16b   :  { %v232_v51 = vpop.permute.xlu1 %231 }
 0x16c   :  { %v234_v53 = vadd.f32 %v232_v51, %v205_v52 }
 0x16e   :  { %v1389_v57 = vmul.f32 -1.442695, %v234_v53 }
 0x170   :  { %1443 = vpow2.f32 %v1389_v57 }
 0x173   :  { %v306_v10 = vpop.permute.xlu1 %305 }
 0x176   :  { %v1444_v58 = vpop.eup %1443 }
 0x177   :  { %v238_v60 = vadd.f32 1.0, %v1444_v58 }
 0x179   :  { %1445 = vrcp.f32 %v238_v60  ;;  %v250_v3 = vand.u32 2147483648, %v238_v60  ;;  %v248_v13 = vand.u32 2147483647, %v238_v60  ;;  %vm244_vm6 = vweird.f32 %v238_v60 }
 0x17a   :  { %1447 = vtanh.f32 %v259_v46 }
 0x17b   :  { %v251_v15 = vor.u32 1.1754944e-38, %v250_v3  ;;  %vm249_vm8 = vcmp.eq.f32.partialorder %v248_v13, 8.507059e+37 }
 0x17f   :  { %v1446_v61 = vpop.eup %1445 }
 0x180   :  { %v240_v62 = vmul.f32 %v1446_v61, %v238_v60  ;;  %vm245_vm5 = vweird.f32 %v1446_v61  ;;  %v1448_v20 = vpop.eup %1447 }
 0x181   :  { %vm246_vm7 = vmor %vm244_vm6, %vm245_vm5 }
 0x182   :  { %v241_v1 = vsub.f32 1.0, %v240_v62  ;;  %v302_v62 = vpop.permute.xlu0 %301 }
 0x184   :  { %v242_v11 = vmul.f32 %v1446_v61, %v241_v1  ;;  %v308_v1 = vsel %vm66_vm0, %v302_v62, %v306_v10 }
 0x186   :  { %v243_v56 = vadd.f32 %v1446_v61, %v242_v11 }
 0x188   :  { %v247_v16 = vsel %vm246_vm7, %v1446_v61, %v243_v56 }
 0x189   :  { %v252_v18 = vsel %vm249_vm8, %v251_v15, %v247_v16 }
 0x18a   :  { %v261_v19 = vsub.f32 1.0, %v252_v18  ;;  %v263_v22 = vmul.f32 0.0, %v252_v18  ;;  %v1870_v16 = vpop.permute.xlu0 %309 }
 0x18c   :  { %v262_v21 = vmul.f32 %v1448_v20, %v261_v19  ;;  %v312_v19 = vsel %vm66_vm0, %v1870_v16, %v1807_v14 }
 0x18e   :  { %v1830_v23 = vadd.f32 %v263_v22, %v262_v21 }
 0x190   :  { %v265_v24 = vpack.c.bf16 %v1830_v23, %v1830_v23 }
 0x192   :  { %1390 = vmatmul.msk.bf16.vlgmr.msra.gmra.mxu1 %vm162_vm9, %v265_v24  ;;  %1391 = vmatmul.msk.bf16.vlgmr.msra.gmra.mxu3 %vm162_vm9, %v265_v24 }
 0x193   :  { %486 = vmatpush.bf16.msra.mxu3 %v1709_v48  ;;  %770 = vmatpush.bf16.msra.mxu1 %v1709_v48 }
 0x197   :  { %487 = vmatpush.bf16.msra.mxu3 %v1721_v54  ;;  %771 = vmatpush.bf16.msra.mxu1 %v1721_v54 }
 0x19b   :  { %488 = vmatpush.bf16.msra.mxu3 %v1739_v59  ;;  %772 = vmatpush.bf16.msra.mxu1 %v1739_v59 }
 0x19f   :  { %489 = vmatpush.bf16.msra.mxu3 %v1749_v63  ;;  %773 = vmatpush.bf16.msra.mxu1 %v1749_v63 }
 0x20f   :  { %v278_v30 = vpop.f32.mrf.mxu1 }
 0x210   :  { %v313_v31 = vadd.f32 %v299_v26, %v278_v30  ;;  %334 = vrot.lane.b32.xlu2 %v278_v30, %s1520_s20 }
 0x212   :  { %v1392_v33 = vmul.f32 -1.442695, %v313_v31 }
 0x214   :  { %1449 = vpow2.f32 %v1392_v33 }
 0x215   :  { %v291_v34 = vpop.f32.mrf.mxu3 }
 0x216   :  { %v357_v58 = vadd.f32 %v1821_v28, %v291_v34 }
 0x217   :  { %v280_v36 = vpop.f32.mrf.mxu1 }
 0x218   :  { %401 = vrot.lane.b32.xlu2 %v1697_v43, %s1522_s2 }
 0x21a   :  { %v1450_v37 = vpop.eup %1449 }
 0x21b   :  { %v317_v40 = vadd.f32 1.0, %v1450_v37 }
 0x21d   :  { %1451 = vrcp.f32 %v317_v40  ;;  %v293_v41 = vpop.f32.mrf.mxu3  ;;  %v329_v47 = vand.u32 2147483648, %v317_v40  ;;  %v327_v51 = vand.u32 2147483647, %v317_v40  ;;  %vm323_vm11 = vweird.f32 %v317_v40 }
 0x21f   :  { %v330_v53 = vor.u32 1.1754944e-38, %v329_v47  ;;  %vm328_vm13 = vcmp.eq.f32.partialorder %v327_v51, 8.507059e+37 }
 0x220   :  { %409 = vrot.lane.b32.xlu2 %v1697_v43, %s1520_s20 }
 0x223   :  { %v1452_v42 = vpop.eup %1451 }
 0x224   :  { %v319_v7 = vmul.f32 %v1452_v42, %v317_v40  ;;  %vm324_vm10 = vweird.f32 %v1452_v42 }
 0x225   :  { %vm325_vm12 = vmor %vm323_vm11, %vm324_vm10 }
 0x226   :  { %v320_v46 = vsub.f32 1.0, %v319_v7 }
 0x228   :  { %v321_v50 = vmul.f32 %v1452_v42, %v320_v46  ;;  %505 = vrot.lane.b32.xlu2 %v1856_v45, %s1521_s28  ;;  %v1890_v46 = vpop.permute.xlu1 %396 }
 0x229   :  { %v399_v47 = vsel %vm66_vm0, %v1697_v43, %v1890_v46 }
 0x22a   :  { %v322_v52 = vadd.f32 %v1452_v42, %v321_v50 }
 0x22c   :  { %v326_v57 = vsel %vm325_vm12, %v1452_v42, %v322_v52 }
 0x22d   :  { %v331_v60 = vsel %vm328_vm13, %v330_v53, %v326_v57  ;;  %v1898_v57 = vadd.f32 %v1699_v44, %v1688_v38 }
 0x22e   :  { %v358_v61 = vmul.f32 %v357_v58, %v331_v60 }
 0x230   :  { %596 = vrot.lane.b32.xlu2 %v1724_v55, %s1522_s2  ;;  %v359_v21 = vadd.f32 %v358_v61, %v312_v19 }
 0x238   :  { %688 = vrot.lane.b32.xlu2 %v1752_v0, %s1522_s2 }
 0x240   :  { %780 = vrot.lane.b32.xlu2 %v1761_v2, %s1522_s2 }
 0x248   :  { %872 = vrot.lane.b32.xlu2 %v1771_v4, %s1522_s2 }
 0x26a   :  { %v335_v3 = vpop.permute.xlu2 %334 }
 0x26b   :  { %v337_v11 = vadd.f32 %v335_v3, %v308_v1 }
 0x26d   :  { %v1393_v13 = vmul.f32 -1.442695, %v337_v11 }
 0x26f   :  { %1453 = vpow2.f32 %v1393_v13 }
 0x275   :  { %v1454_v56 = vpop.eup %1453 }
 0x276   :  { %v341_v15 = vadd.f32 1.0, %v1454_v56 }
 0x278   :  { %1455 = vrcp.f32 %v341_v15  ;;  %v353_v24 = vand.u32 2147483648, %v341_v15  ;;  %v351_v30 = vand.u32 2147483647, %v341_v15  ;;  %vm347_vm15 = vweird.f32 %v341_v15 }
 0x279   :  { %1457 = vtanh.f32 %v359_v21  ;;  %v406_v21 = vpop.permute.xlu0 %405 }
 0x27a   :  { %v354_v33 = vor.u32 1.1754944e-38, %v353_v24  ;;  %vm352_vm2 = vcmp.eq.f32.partialorder %v351_v30, 8.507059e+37 }
 0x27e   :  { %v1456_v18 = vpop.eup %1455 }
 0x27f   :  { %v343_v20 = vmul.f32 %v1456_v18, %v341_v15  ;;  %vm348_vm14 = vweird.f32 %v1456_v18  ;;  %v1458_v40 = vpop.eup %1457 }
 0x280   :  { %vm349_vm1 = vmor %vm347_vm15, %vm348_vm14 }
 0x281   :  { %v344_v22 = vsub.f32 1.0, %v343_v20  ;;  %v402_v20 = vpop.permute.xlu2 %401 }
 0x283   :  { %v345_v26 = vmul.f32 %v1456_v18, %v344_v22  ;;  %v408_v22 = vsel %vm66_vm0, %v402_v20, %v406_v21 }
 0x285   :  { %v346_v31 = vadd.f32 %v1456_v18, %v345_v26 }
 0x287   :  { %v350_v34 = vsel %vm349_vm1, %v1456_v18, %v346_v31 }
 0x288   :  { %v355_v36 = vsel %vm352_vm2, %v354_v33, %v350_v34 }
 0x289   :  { %v361_v37 = vsub.f32 1.0, %v355_v36  ;;  %v363_v14 = vmul.f32 %v355_v36, %v1830_v23  ;;  %v1906_v34 = vpop.permute.xlu2 %409 }
 0x28b   :  { %v362_v41 = vmul.f32 %v1458_v40, %v361_v37  ;;  %v412_v37 = vsel %vm66_vm0, %v1906_v34, %v1798_v12 }
 0x28d   :  { %v1876_v42 = vadd.f32 %v363_v14, %v362_v41 }
 0x28f   :  { %v365_v7 = vpack.c.bf16 %v1876_v42, %v1876_v42 }
 0x291   :  { %1394 = vmatmul.msk.bf16.vlgmr.msra.gmra.mxu2 %vm162_vm9, %v365_v7  ;;  %1395 = vmatmul.msk.bf16.vlgmr.msrb.gmra.mxu3 %vm162_vm9, %v365_v7 }
 0x292   :  { %665 = vmatpush.bf16.msra.mxu2 %v1639_v27  ;;  %678 = vmatpush.bf16.msrb.mxu3 %v1709_v48 }
 0x296   :  { %666 = vmatpush.bf16.msra.mxu2 %v1645_v29  ;;  %679 = vmatpush.bf16.msrb.mxu3 %v1721_v54 }
 0x29a   :  { %667 = vmatpush.bf16.msra.mxu2 %v1657_v32  ;;  %680 = vmatpush.bf16.msrb.mxu3 %v1739_v59 }
 0x29e   :  { %668 = vmatpush.bf16.msra.mxu2 %v1668_v35  ;;  %681 = vmatpush.bf16.msrb.mxu3 %v1749_v63 }
 0x314   :  { %v378_v50 = vpop.f32.mrf.mxu2  ;;  %v391_v51 = vpop.f32.mrf.mxu3 }
 0x315   :  { %v413_v52 = vadd.f32 %v399_v47, %v378_v50  ;;  %434 = vrot.lane.b32.xlu1 %v378_v50, %s1520_s20  ;;  %v457_v15 = vadd.f32 %v1821_v28, %v391_v51 }
 0x317   :  { %v1396_v53 = vmul.f32 -1.442695, %v413_v52 }
 0x319   :  { %1459 = vpow2.f32 %v1396_v53 }
 0x31c   :  { %v380_v58 = vpop.f32.mrf.mxu2  ;;  %v393_v60 = vpop.f32.mrf.mxu3 }
 0x31d   :  { %501 = vrot.lane.b32.xlu1 %v1898_v57, %s1522_s2 }
 0x31f   :  { %v1460_v61 = vpop.eup %1459 }
 0x320   :  { %v417_v10 = vadd.f32 1.0, %v1460_v61 }
 0x322   :  { %1461 = vrcp.f32 %v417_v10  ;;  %v429_v3 = vand.u32 2147483648, %v417_v10  ;;  %v427_v13 = vand.u32 2147483647, %v417_v10  ;;  %vm423_vm4 = vweird.f32 %v417_v10 }
 0x324   :  { %v430_v44 = vor.u32 1.1754944e-38, %v429_v3  ;;  %vm428_vm6 = vcmp.eq.f32.partialorder %v427_v13, 8.507059e+37 }
 0x325   :  { %509 = vrot.lane.b32.xlu1 %v1898_v57, %s1520_s20 }
 0x328   :  { %v1462_v43 = vpop.eup %1461 }
 0x329   :  { %v419_v62 = vmul.f32 %v1462_v43, %v417_v10  ;;  %vm424_vm3 = vweird.f32 %v1462_v43 }
 0x32a   :  { %vm425_vm5 = vmor %vm423_vm4, %vm424_vm3 }
 0x32b   :  { %v420_v1 = vsub.f32 1.0, %v419_v62 }
 0x32d   :  { %v421_v11 = vmul.f32 %v1462_v43, %v420_v1  ;;  %v1926_v1 = vpop.permute.xlu0 %496 }
 0x32f   :  { %v422_v38 = vadd.f32 %v1462_v43, %v421_v11 }
 0x331   :  { %v426_v56 = vsel %vm425_vm5, %v1462_v43, %v422_v38 }
 0x332   :  { %v431_v18 = vsel %vm428_vm6, %v430_v44, %v426_v56 }
 0x333   :  { %v458_v19 = vmul.f32 %v457_v15, %v431_v18 }
 0x335   :  { %v459_v41 = vadd.f32 %v458_v19, %v412_v37 }
 0x387   :  { %v435_v24 = vpop.permute.xlu1 %434 }
 0x388   :  { %v437_v26 = vadd.f32 %v435_v24, %v408_v22 }
 0x38a   :  { %v1397_v30 = vmul.f32 -1.442695, %v437_v26 }
 0x38c   :  { %1463 = vpow2.f32 %v1397_v30  ;;  %v506_v30 = vpop.permute.xlu2 %505 }
 0x38f   :  { %v502_v26 = vpop.permute.xlu1 %501 }
 0x392   :  { %v1464_v31 = vpop.eup %1463 }
 0x393   :  { %v441_v33 = vadd.f32 1.0, %v1464_v31  ;;  %v508_v31 = vsel %vm66_vm0, %v502_v26, %v506_v30 }
 0x395   :  { %1465 = vrcp.f32 %v441_v33  ;;  %v453_v7 = vand.u32 2147483648, %v441_v33  ;;  %v451_v50 = vand.u32 2147483647, %v441_v33  ;;  %vm447_vm8 = vweird.f32 %v441_v33 }
 0x396   :  { %1467 = vtanh.f32 %v459_v41 }
 0x397   :  { %v454_v52 = vor.u32 1.1754944e-38, %v453_v7  ;;  %vm452_vm11 = vcmp.eq.f32.partialorder %v451_v50, 8.507059e+37 }
 0x39b   :  { %v1466_v36 = vpop.eup %1465 }
 0x39c   :  { %v443_v40 = vmul.f32 %v1466_v36, %v441_v33  ;;  %vm448_vm7 = vweird.f32 %v1466_v36  ;;  %v1468_v61 = vpop.eup %1467 }
 0x39d   :  { %vm449_vm10 = vmor %vm447_vm8, %vm448_vm7 }
 0x39e   :  { %v444_v14 = vsub.f32 1.0, %v443_v40 }
 0x3a0   :  { %v445_v47 = vmul.f32 %v1466_v36, %v444_v14  ;;  %v510_v14 = vpop.permute.xlu1 %509 }
 0x3a2   :  { %v446_v51 = vadd.f32 %v1466_v36, %v445_v47 }
 0x3a4   :  { %v450_v53 = vsel %vm449_vm10, %v1466_v36, %v446_v51 }
 0x3a5   :  { %v455_v58 = vsel %vm452_vm11, %v454_v52, %v450_v53 }
 0x3a6   :  { %v461_v60 = vsub.f32 1.0, %v455_v58  ;;  %v463_v12 = vmul.f32 %v455_v58, %v1876_v42 }
 0x3a8   :  { %v462_v10 = vmul.f32 %v1468_v61, %v461_v60 }
 0x3aa   :  { %v1912_v43 = vadd.f32 %v463_v12, %v462_v10 }
 0x3ac   :  { %v465_v62 = vpack.c.bf16 %v1912_v43, %v1912_v43 }
 0x3ae   :  { %1398 = vmatmul.msk.bf16.vlgmr.msrb.gmra.mxu2 %vm162_vm9, %v465_v62  ;;  %1399 = vmatmul.msk.bf16.vlgmr.msra.gmra.mxu3 %vm162_vm9, %v465_v62 }
 0x3af   :  { %849 = vmatpush.bf16.msrb.mxu2 %v1639_v27  ;;  %862 = vmatpush.bf16.msra.mxu3 %v1709_v48  ;;  %v499_v27 = vsel %vm66_vm0, %v1898_v57, %v1926_v1  ;;  %v1940_v57 = vadd.f32 %v1789_v8, %v1711_v49 }
 0x3b3   :  { %850 = vmatpush.bf16.msrb.mxu2 %v1645_v29  ;;  %863 = vmatpush.bf16.msra.mxu3 %v1721_v54 }
 0x3b7   :  { %851 = vmatpush.bf16.msrb.mxu2 %v1657_v32  ;;  %864 = vmatpush.bf16.msra.mxu3 %v1739_v59  ;;  %v1934_v32 = vadd.f32 %v1793_v9, %v1711_v49  ;;  %v1946_v9 = vadd.f32 %v1782_v6, %v1711_v49  ;;  %v1953_v6 = vadd.f32 %v1776_v5, %v1711_v49 }
 0x3b8   :  { %v512_v49 = vsel %vm66_vm0, %v510_v14, %v1856_v45 }
 0x3bb   :  { %852 = vmatpush.bf16.msrb.mxu2 %v1668_v35  ;;  %865 = vmatpush.bf16.msra.mxu3 %v1749_v63 }
 0x431   :  { %v478_v3 = vpop.f32.mrf.mxu2  ;;  %v491_v48 = vpop.f32.mrf.mxu3 }
 0x432   :  { %v513_v11 = vadd.f32 %v499_v27, %v478_v3  ;;  %534 = vrot.lane.b32.xlu0 %v478_v3, %s1520_s20  ;;  %v557_v21 = vadd.f32 %v1821_v28, %v491_v48 }
 0x434   :  { %v1400_v29 = vmul.f32 -1.442695, %v513_v11  ;;  %v595_v11 = vsel %vm66_vm0, %v1724_v55, %v510_v14 }
 0x436   :  { %1469 = vpow2.f32 %v1400_v29 }
 0x439   :  { %v480_v35 = vpop.f32.mrf.mxu2  ;;  %v493_v54 = vpop.f32.mrf.mxu3 }
 0x43a   :  { %600 = vrot.lane.b32.xlu0 %v1934_v32, %s1521_s28 }
 0x43c   :  { %v1470_v59 = vpop.eup %1469 }
 0x43d   :  { %v517_v63 = vadd.f32 1.0, %v1470_v59 }
 0x43f   :  { %1471 = vrcp.f32 %v517_v63  ;;  %v529_v56 = vand.u32 2147483648, %v517_v63  ;;  %v527_v18 = vand.u32 2147483647, %v517_v63  ;;  %vm523_vm13 = vweird.f32 %v517_v63 }
 0x441   :  { %v530_v8 = vor.u32 1.1754944e-38, %v529_v56  ;;  %vm528_vm15 = vcmp.eq.f32.partialorder %v527_v18, 8.507059e+37 }
 0x442   :  { %692 = vrot.lane.b32.xlu0 %v1940_v57, %s1521_s28 }
 0x445   :  { %v1472_v13 = vpop.eup %1471 }
 0x446   :  { %v519_v38 = vmul.f32 %v1472_v13, %v517_v63  ;;  %vm524_vm12 = vweird.f32 %v1472_v13 }
 0x447   :  { %vm525_vm14 = vmor %vm523_vm13, %vm524_vm12 }
 0x448   :  { %v520_v44 = vsub.f32 1.0, %v519_v38 }
 0x44a   :  { %v521_v15 = vmul.f32 %v1472_v13, %v520_v44  ;;  %784 = vrot.lane.b32.xlu0 %v1946_v9, %s1521_s28 }
 0x44c   :  { %v522_v19 = vadd.f32 %v1472_v13, %v521_v15 }
 0x44e   :  { %v526_v20 = vsel %vm525_vm14, %v1472_v13, %v522_v19 }
 0x44f   :  { %v531_v22 = vsel %vm528_vm15, %v530_v8, %v526_v20 }
 0x450   :  { %v558_v24 = vmul.f32 %v557_v21, %v531_v22 }
 0x452   :  { %876 = vrot.lane.b32.xlu0 %v1953_v6, %s1521_s28  ;;  %v559_v47 = vadd.f32 %v558_v24, %v512_v49 }
 0x4a4   :  { %v535_v33 = vpop.permute.xlu0 %534 }
 0x4a5   :  { %v537_v36 = vadd.f32 %v535_v33, %v508_v31  ;;  %v597_v33 = vpop.permute.xlu2 %596 }
 0x4a7   :  { %v1401_v37 = vmul.f32 -1.442695, %v537_v36 }
 0x4a9   :  { %1473 = vpow2.f32 %v1401_v37 }
 0x4ac   :  { %v601_v31 = vpop.permute.xlu0 %600 }
 0x4ad   :  { %v603_v36 = vsel %vm66_vm0, %v597_v33, %v601_v31 }
 0x4af   :  { %v1474_v40 = vpop.eup %1473 }
 0x4b0   :  { %v541_v41 = vadd.f32 1.0, %v1474_v40 }
 0x4b2   :  { %1475 = vrcp.f32 %v541_v41  ;;  %v553_v51 = vand.u32 2147483648, %v541_v41  ;;  %v551_v53 = vand.u32 2147483647, %v541_v41  ;;  %vm547_vm2 = vweird.f32 %v541_v41 }
 0x4b3   :  { %1477 = vtanh.f32 %v559_v47 }
 0x4b4   :  { %v554_v60 = vor.u32 1.1754944e-38, %v553_v51  ;;  %vm552_vm4 = vcmp.eq.f32.partialorder %v551_v53, 8.507059e+37 }
 0x4b8   :  { %v1476_v7 = vpop.eup %1475 }
 0x4b9   :  { %v543_v5 = vmul.f32 %v1476_v7, %v541_v41  ;;  %vm548_vm1 = vweird.f32 %v1476_v7  ;;  %v1478_v62 = vpop.eup %1477 }
 0x4ba   :  { %vm549_vm3 = vmor %vm547_vm2, %vm548_vm1 }
 0x4bb   :  { %v544_v50 = vsub.f32 1.0, %v543_v5  ;;  %v604_v5 = vsel %vm66_vm0, %v1926_v1, %v1934_v32 }
 0x4bd   :  { %v545_v52 = vmul.f32 %v1476_v7, %v544_v50 }
 0x4bf   :  { %v546_v58 = vadd.f32 %v1476_v7, %v545_v52 }
 0x4c1   :  { %v550_v61 = vsel %vm549_vm3, %v1476_v7, %v546_v58 }
 0x4c2   :  { %v555_v10 = vsel %vm552_vm4, %v554_v60, %v550_v61 }
 0x4c3   :  { %v561_v12 = vsub.f32 1.0, %v555_v10  ;;  %v563_v45 = vmul.f32 %v555_v10, %v1912_v43 }
 0x4c5   :  { %v562_v27 = vmul.f32 %v1478_v62, %v561_v12 }
 0x4c7   :  { %v1961_v3 = vadd.f32 %v563_v45, %v562_v27 }
 0x4c9   :  { %v565_v48 = vpack.c.bf16 %v1961_v3, %v1961_v3 }
 0x4cb   :  { %1402 = vmatmul.msk.bf16.vlgmr.msrb.gmra.mxu0 %vm162_vm9, %v565_v48  ;;  %1403 = vmatmul.msk.bf16.vlgmr.msrb.gmra.mxu1 %vm162_vm9, %v565_v48 }
 0x548   :  { %v578_v29 = vpop.f32.mrf.mxu0  ;;  %v591_v35 = vpop.f32.mrf.mxu1 }
 0x549   :  { %v605_v54 = vadd.f32 %v595_v11, %v578_v29  ;;  %626 = vrot.lane.b32.xlu1 %v578_v29, %s1520_s20  ;;  %v649_v24 = vadd.f32 %v1821_v28, %v591_v35  ;;  %v687_v11 = vsel %vm66_vm0, %v1752_v0, %v1906_v34 }
 0x54b   :  { %v1404_v59 = vmul.f32 -1.442695, %v605_v54 }
 0x54d   :  { %1479 = vpow2.f32 %v1404_v59 }
 0x550   :  { %v580_v63 = vpop.f32.mrf.mxu0  ;;  %v593_v13 = vpop.f32.mrf.mxu1 }
 0x553   :  { %v1480_v38 = vpop.eup %1479 }
 0x554   :  { %v609_v44 = vadd.f32 1.0, %v1480_v38 }
 0x556   :  { %1481 = vrcp.f32 %v609_v44  ;;  %v621_v19 = vand.u32 2147483648, %v609_v44  ;;  %v619_v20 = vand.u32 2147483647, %v609_v44  ;;  %vm615_vm6 = vweird.f32 %v609_v44 }
 0x558   :  { %v622_v21 = vor.u32 1.1754944e-38, %v621_v19  ;;  %vm620_vm8 = vcmp.eq.f32.partialorder %v619_v20, 8.507059e+37 }
 0x55c   :  { %v1482_v56 = vpop.eup %1481 }
 0x55d   :  { %v611_v15 = vmul.f32 %v1482_v56, %v609_v44  ;;  %vm616_vm5 = vweird.f32 %v1482_v56 }
 0x55e   :  { %vm617_vm7 = vmor %vm615_vm6, %vm616_vm5 }
 0x55f   :  { %v612_v18 = vsub.f32 1.0, %v611_v15 }
 0x561   :  { %v613_v8 = vmul.f32 %v1482_v56, %v612_v18 }
 0x563   :  { %v614_v55 = vadd.f32 %v1482_v56, %v613_v8 }
 0x565   :  { %v618_v22 = vsel %vm617_vm7, %v1482_v56, %v614_v55 }
 0x566   :  { %v623_v26 = vsel %vm620_vm8, %v622_v21, %v618_v22 }
 0x567   :  { %v650_v30 = vmul.f32 %v649_v24, %v623_v26  ;;  %v693_v26 = vpop.permute.xlu0 %692 }
 0x569   :  { %v651_v50 = vadd.f32 %v650_v30, %v604_v5  ;;  %v689_v30 = vpop.permute.xlu2 %688 }
 0x56a   :  { %v695_v31 = vsel %vm66_vm0, %v689_v30, %v693_v26 }
 0x5bb   :  { %v627_v37 = vpop.permute.xlu1 %626 }
 0x5bc   :  { %v629_v40 = vadd.f32 %v627_v37, %v603_v36 }
 0x5be   :  { %v1405_v41 = vmul.f32 -1.442695, %v629_v40 }
 0x5c0   :  { %1483 = vpow2.f32 %v1405_v41 }
 0x5c6   :  { %v1484_v14 = vpop.eup %1483 }
 0x5c7   :  { %v633_v7 = vadd.f32 1.0, %v1484_v14 }
 0x5c9   :  { %1485 = vrcp.f32 %v633_v7  ;;  %v645_v52 = vand.u32 2147483648, %v633_v7  ;;  %v643_v58 = vand.u32 2147483647, %v633_v7  ;;  %vm639_vm11 = vweird.f32 %v633_v7 }
 0x5ca   :  { %1487 = vtanh.f32 %v651_v50 }
 0x5cb   :  { %v646_v61 = vor.u32 1.1754944e-38, %v645_v52  ;;  %vm644_vm13 = vcmp.eq.f32.partialorder %v643_v58, 8.507059e+37 }
 0x5cf   :  { %v1486_v49 = vpop.eup %1485 }
 0x5d0   :  { %v635_v47 = vmul.f32 %v1486_v49, %v633_v7  ;;  %vm640_vm10 = vweird.f32 %v1486_v49  ;;  %v1488_v27 = vpop.eup %1487  ;;  %v696_v7 = vsel %vm66_vm0, %v1890_v46, %v1940_v57 }
 0x5d1   :  { %vm641_vm12 = vmor %vm639_vm11, %vm640_vm10 }
 0x5d2   :  { %v636_v51 = vsub.f32 1.0, %v635_v47 }
 0x5d4   :  { %v637_v53 = vmul.f32 %v1486_v49, %v636_v51 }
 0x5d6   :  { %v638_v60 = vadd.f32 %v1486_v49, %v637_v53 }
 0x5d8   :  { %v642_v10 = vsel %vm641_vm12, %v1486_v49, %v638_v60 }
 0x5d9   :  { %v647_v12 = vsel %vm644_vm13, %v646_v61, %v642_v10 }
 0x5da   :  { %v653_v62 = vsub.f32 1.0, %v647_v12  ;;  %v655_v1 = vmul.f32 %v647_v12, %v1961_v3 }
 0x5dc   :  { %v654_v45 = vmul.f32 %v1488_v27, %v653_v62 }
 0x5de   :  { %v1976_v32 = vadd.f32 %v655_v1, %v654_v45  ;;  %v779_v45 = vsel %vm66_vm0, %v1761_v2, %v1870_v16 }
 0x5e0   :  { %v657_v48 = vpack.c.bf16 %v1976_v32, %v1976_v32 }
 0x5e2   :  { %1406 = vmatmul.msk.bf16.vlgmr.msra.gmra.mxu2 %vm162_vm9, %v657_v48  ;;  %1407 = vmatmul.msk.bf16.vlgmr.msrb.gmra.mxu3 %vm162_vm9, %v657_v48 }
 0x665   :  { %v670_v29 = vpop.f32.mrf.mxu2  ;;  %v683_v35 = vpop.f32.mrf.mxu3 }
 0x666   :  { %v697_v54 = vadd.f32 %v687_v11, %v670_v29  ;;  %718 = vrot.lane.b32.xlu1 %v670_v29, %s1520_s20  ;;  %v741_v21 = vadd.f32 %v1821_v28, %v683_v35 }
 0x668   :  { %v1408_v59 = vmul.f32 -1.442695, %v697_v54 }
 0x66a   :  { %1489 = vpow2.f32 %v1408_v59 }
 0x66d   :  { %v672_v63 = vpop.f32.mrf.mxu2  ;;  %v685_v13 = vpop.f32.mrf.mxu3 }
 0x670   :  { %v1490_v38 = vpop.eup %1489 }
 0x671   :  { %v701_v44 = vadd.f32 1.0, %v1490_v38 }
 0x673   :  { %1491 = vrcp.f32 %v701_v44  ;;  %v713_v19 = vand.u32 2147483648, %v701_v44  ;;  %v711_v20 = vand.u32 2147483647, %v701_v44  ;;  %vm707_vm15 = vweird.f32 %v701_v44 }
 0x675   :  { %v714_v34 = vor.u32 1.1754944e-38, %v713_v19  ;;  %vm712_vm2 = vcmp.eq.f32.partialorder %v711_v20, 8.507059e+37 }
 0x679   :  { %v1492_v56 = vpop.eup %1491 }
 0x67a   :  { %v703_v15 = vmul.f32 %v1492_v56, %v701_v44  ;;  %vm708_vm14 = vweird.f32 %v1492_v56 }
 0x67b   :  { %vm709_vm1 = vmor %vm707_vm15, %vm708_vm14 }
 0x67c   :  { %v704_v18 = vsub.f32 1.0, %v703_v15 }
 0x67e   :  { %v705_v8 = vmul.f32 %v1492_v56, %v704_v18 }
 0x680   :  { %v706_v0 = vadd.f32 %v1492_v56, %v705_v8 }
 0x682   :  { %v710_v55 = vsel %vm709_vm1, %v1492_v56, %v706_v0 }
 0x683   :  { %v715_v22 = vsel %vm712_vm2, %v714_v34, %v710_v55  ;;  %v785_v34 = vpop.permute.xlu0 %784  ;;  %v781_v55 = vpop.permute.xlu2 %780 }
 0x684   :  { %v742_v24 = vmul.f32 %v741_v21, %v715_v22  ;;  %v787_v21 = vsel %vm66_vm0, %v781_v55, %v785_v34 }
 0x686   :  { %v743_v5 = vadd.f32 %v742_v24, %v696_v7 }
 0x68b   :  { %v873_v34 = vpop.permute.xlu2 %872 }
 0x6d8   :  { %v719_v33 = vpop.permute.xlu1 %718 }
 0x6d9   :  { %v721_v36 = vadd.f32 %v719_v33, %v695_v31 }
 0x6db   :  { %v1409_v37 = vmul.f32 -1.442695, %v721_v36  ;;  %v788_v36 = vsel %vm66_vm0, %v1844_v25, %v1946_v9 }
 0x6dd   :  { %1493 = vpow2.f32 %v1409_v37 }
 0x6e3   :  { %v1494_v40 = vpop.eup %1493 }
 0x6e4   :  { %v725_v41 = vadd.f32 1.0, %v1494_v40 }
 0x6e6   :  { %1495 = vrcp.f32 %v725_v41  ;;  %v737_v50 = vand.u32 2147483648, %v725_v41  ;;  %v735_v52 = vand.u32 2147483647, %v725_v41  ;;  %vm731_vm4 = vweird.f32 %v725_v41 }
 0x6e7   :  { %1497 = vtanh.f32 %v743_v5 }
 0x6e8   :  { %v738_v58 = vor.u32 1.1754944e-38, %v737_v50  ;;  %vm736_vm6 = vcmp.eq.f32.partialorder %v735_v52, 8.507059e+37 }
 0x6ec   :  { %v1496_v14 = vpop.eup %1495 }
 0x6ed   :  { %v727_v49 = vmul.f32 %v1496_v14, %v725_v41  ;;  %vm732_vm3 = vweird.f32 %v1496_v14  ;;  %v1498_v12 = vpop.eup %1497 }
 0x6ee   :  { %vm733_vm5 = vmor %vm731_vm4, %vm732_vm3 }
 0x6ef   :  { %v728_v47 = vsub.f32 1.0, %v727_v49 }
 0x6f1   :  { %v729_v51 = vmul.f32 %v1496_v14, %v728_v47 }
 0x6f3   :  { %v730_v53 = vadd.f32 %v1496_v14, %v729_v51 }
 0x6f5   :  { %v734_v60 = vsel %vm733_vm5, %v1496_v14, %v730_v53 }
 0x6f6   :  { %v739_v61 = vsel %vm736_vm6, %v738_v58, %v734_v60 }
 0x6f7   :  { %v745_v10 = vsub.f32 1.0, %v739_v61  ;;  %v747_v46 = vmul.f32 %v739_v61, %v1976_v32  ;;  %v871_v61 = vsel %vm66_vm0, %v1771_v4, %v1824_v39 }
 0x6f9   :  { %v746_v62 = vmul.f32 %v1498_v12, %v745_v10 }
 0x6fb   :  { %v1992_v57 = vadd.f32 %v747_v46, %v746_v62 }
 0x6fd   :  { %v749_v27 = vpack.c.bf16 %v1992_v57, %v1992_v57 }
 0x6ff   :  { %1410 = vmatmul.msk.bf16.vlgmr.msra.gmra.mxu0 %vm162_vm9, %v749_v27  ;;  %1411 = vmatmul.msk.bf16.vlgmr.msra.gmra.mxu1 %vm162_vm9, %v749_v27 }
 0x77c   :  { %v762_v1 = vpop.f32.mrf.mxu0  ;;  %v775_v48 = vpop.f32.mrf.mxu1 }
 0x77d   :  { %v789_v11 = vadd.f32 %v779_v45, %v762_v1  ;;  %810 = vrot.lane.b32.xlu1 %v762_v1, %s1520_s20  ;;  %v833_v8 = vadd.f32 %v1821_v28, %v775_v48 }
 0x77f   :  { %v1412_v29 = vmul.f32 -1.442695, %v789_v11 }
 0x781   :  { %1499 = vpow2.f32 %v1412_v29 }
 0x784   :  { %v764_v35 = vpop.f32.mrf.mxu0  ;;  %v777_v54 = vpop.f32.mrf.mxu1 }
 0x787   :  { %v1500_v59 = vpop.eup %1499 }
 0x788   :  { %v793_v63 = vadd.f32 1.0, %v1500_v59 }
 0x78a   :  { %1501 = vrcp.f32 %v793_v63  ;;  %v805_v56 = vand.u32 2147483648, %v793_v63  ;;  %v803_v18 = vand.u32 2147483647, %v793_v63  ;;  %vm799_vm8 = vweird.f32 %v793_v63 }
 0x78c   :  { %v806_v16 = vor.u32 1.1754944e-38, %v805_v56  ;;  %vm804_vm11 = vcmp.eq.f32.partialorder %v803_v18, 8.507059e+37 }
 0x790   :  { %v1502_v13 = vpop.eup %1501 }
 0x791   :  { %v795_v38 = vmul.f32 %v1502_v13, %v793_v63  ;;  %vm800_vm7 = vweird.f32 %v1502_v13 }
 0x792   :  { %vm801_vm10 = vmor %vm799_vm8, %vm800_vm7 }
 0x793   :  { %v796_v44 = vsub.f32 1.0, %v795_v38 }
 0x795   :  { %v797_v15 = vmul.f32 %v1502_v13, %v796_v44 }
 0x797   :  { %v798_v2 = vadd.f32 %v1502_v13, %v797_v15  ;;  %v880_v15 = vsel %vm66_vm0, %v1813_v17, %v1953_v6  ;;  %v877_v6 = vpop.permute.xlu0 %876 }
 0x799   :  { %v802_v19 = vsel %vm801_vm10, %v1502_v13, %v798_v2  ;;  %v947_v2 = vld [vmem:[%s2355_s5 + $0x30] sm:$0xff]  ;;  %vm1359_vm10 = vcmask 64512  }
 0x79a   :  { %v807_v20 = vsel %vm804_vm11, %v806_v16, %v802_v19  ;;  %v948_v16 = vld [vmem:[%s2355_s5 + $0x38] sm:$0xff] }
 0x79b   :  { %v834_v0 = vmul.f32 %v833_v8, %v807_v20  ;;  %v956_v19 = vpack.c.bf16 %v948_v16, %v947_v2  ;;  %v946_v8 = vld [vmem:[%s2355_s5 + $0x28] sm:$0xff]  ;;  %v943_v20 = vld [vmem:[%s2355_s5 + $0x10] sm:$0xff] }
 0x79d   :  { %v835_v40 = vadd.f32 %v834_v0, %v788_v36  ;;  %977 = vmatpush.bf16.msrb.mxu0 %v956_v19  ;;  %v944_v0 = vld [vmem:[%s2355_s5 + $0x18] sm:$0xff] }
 0x79e   :  { %v954_v55 = vpack.c.bf16 %v944_v0, %v943_v20 }
 0x7ef   :  { %v811_v22 = vpop.permute.xlu1 %810 }
 0x7f0   :  { %v813_v24 = vadd.f32 %v811_v22, %v787_v21  ;;  %v941_v21 = vld [vmem:[%s2355_s5] sm:$0xff]  ;;  %v942_v22 = vld [vmem:[%s2355_s5 + $0x8] sm:$0xff] }
 0x7f2   :  { %v1413_v26 = vmul.f32 -1.442695, %v813_v24  ;;  %v879_v24 = vsel %vm66_vm0, %v873_v34, %v877_v6 }
 0x7f4   :  { %1503 = vpow2.f32 %v1413_v26 }
 0x7fa   :  { %v1504_v30 = vpop.eup %1503 }
 0x7fb   :  { %v817_v31 = vadd.f32 1.0, %v1504_v30 }
 0x7fd   :  { %1505 = vrcp.f32 %v817_v31  ;;  %v829_v14 = vand.u32 2147483648, %v817_v31  ;;  %v827_v49 = vand.u32 2147483647, %v817_v31  ;;  %vm823_vm13 = vweird.f32 %v817_v31 }
 0x7fe   :  { %1507 = vtanh.f32 %v835_v40 }
 0x7ff   :  { %v830_v47 = vor.u32 1.1754944e-38, %v829_v14  ;;  %vm828_vm15 = vcmp.eq.f32.partialorder %v827_v49, 8.507059e+37 }
 0x803   :  { %v1506_v33 = vpop.eup %1505 }
 0x804   :  { %v819_v37 = vmul.f32 %v1506_v33, %v817_v31  ;;  %vm824_vm12 = vweird.f32 %v1506_v33  ;;  %v1508_v53 = vpop.eup %1507  ;;  %v953_v31 = vpack.c.bf16 %v942_v22, %v941_v21 }
 0x805   :  { %vm825_vm14 = vmor %vm823_vm13, %vm824_vm12 }
 0x806   :  { %v820_v41 = vsub.f32 1.0, %v819_v37 }
 0x808   :  { %v821_v7 = vmul.f32 %v1506_v33, %v820_v41 }
 0x80a   :  { %v822_v5 = vadd.f32 %v1506_v33, %v821_v7 }
 0x80c   :  { %v826_v50 = vsel %vm825_vm14, %v1506_v33, %v822_v5 }
 0x80d   :  { %v831_v51 = vsel %vm828_vm15, %v830_v47, %v826_v50 }
 0x80e   :  { %v837_v52 = vsub.f32 1.0, %v831_v51  ;;  %v839_v25 = vmul.f32 %v831_v51, %v1992_v57 }
 0x810   :  { %v838_v58 = vmul.f32 %v1508_v53, %v837_v52 }
 0x812   :  { %v2008_v9 = vadd.f32 %v839_v25, %v838_v58 }
 0x814   :  { %v841_v60 = vpack.c.bf16 %v2008_v9, %v2008_v9 }
 0x816   :  { %1414 = vmatmul.msk.bf16.vlgmr.msrb.gmra.mxu2 %vm162_vm9, %v841_v60  ;;  %1415 = vmatmul.msk.bf16.vlgmr.msra.gmra.mxu3 %vm162_vm9, %v841_v60 }
 0x899   :  { %v854_v10 = vpop.f32.mrf.mxu2  ;;  %v867_v12 = vpop.f32.mrf.mxu3 }
 0x89a   :  { %v881_v62 = vadd.f32 %v871_v61, %v854_v10  ;;  %902 = vrot.lane.b32.xlu1 %v854_v10, %s1520_s20  ;;  %v925_v38 = vadd.f32 %v1821_v28, %v867_v12  ;;  %v945_v28 = vld [vmem:[%s2355_s5 + $0x20] sm:$0xff]  ;;  %v934_v12 = vsel %vm66_vm0, %v1876_v42, %v2008_v9 }
 0x89b   :  { %v955_v17 = vpack.c.bf16 %v946_v8, %v945_v28 }
 0x89c   :  { %v1416_v46 = vmul.f32 -1.442695, %v881_v62 }
 0x89d   :  { %978 = vmatpush.bf16.msrb.mxu0 %v955_v17 }
 0x89e   :  { %1509 = vpow2.f32 %v1416_v46  ;;  %v935_v46 = vsel %vm66_vm0, %v1912_v43, %v1992_v57 }
 0x8a1   :  { %v856_v27 = vpop.f32.mrf.mxu2  ;;  %v869_v45 = vpop.f32.mrf.mxu3  ;;  %979 = vmatpush.bf16.msrb.mxu0 %v954_v55 }
 0x8a2   :  { %v936_v27 = vsel %vm66_vm0, %v1961_v3, %v1976_v32 }
 0x8a3   :  { %v950_v45 = vpack.c.bf16 %v936_v27, %v935_v46  ;;  %v1025_v46 = vld [vmem:[%s2356_s7 + $0x78] sm:$0xff] }
 0x8a4   :  { %v1510_v1 = vpop.eup %1509 }
 0x8a5   :  { %v885_v48 = vadd.f32 1.0, %v1510_v1  ;;  %980 = vmatpush.bf16.msrb.mxu0 %v953_v31  ;;  %v938_v1 = vsel %vm66_vm0, %v1992_v57, %v1912_v43  ;;  %v1011_v31 = vld [vmem:[%s2356_s7 + $0x8] sm:$0xff] }
 0x8a7   :  { %1511 = vrcp.f32 %v885_v48  ;;  %v897_v54 = vand.u32 2147483648, %v885_v48  ;;  %v895_v63 = vand.u32 2147483647, %v885_v48  ;;  %vm891_vm2 = vweird.f32 %v885_v48 }
 0x8a9   :  { %v898_v39 = vor.u32 1.1754944e-38, %v897_v54  ;;  %vm896_vm4 = vcmp.eq.f32.partialorder %v895_v63, 8.507059e+37 }
 0x8ad   :  { %v1512_v11 = vpop.eup %1511 }
 0x8ae   :  { %v887_v29 = vmul.f32 %v1512_v11, %v885_v48  ;;  %vm892_vm1 = vweird.f32 %v1512_v11  ;;  %v937_v48 = vsel %vm66_vm0, %v1976_v32, %v1961_v3  ;;  %v1437_v32 = vld [vmem:[%s2354_s6] ss:$0 sm:$0xff] }
 0x8af   :  { %vm893_vm3 = vmor %vm891_vm2, %vm892_vm1 }
 0x8b0   :  { %v888_v35 = vsub.f32 1.0, %v887_v29 }
 0x8b2   :  { %v889_v59 = vmul.f32 %v1512_v11, %v888_v35  ;;  %v939_v35 = vsel %vm66_vm0, %v2008_v9, %v1876_v42 }
 0x8b4   :  { %v890_v4 = vadd.f32 %v1512_v11, %v889_v59 }
 0x8b6   :  { %v894_v13 = vsel %vm893_vm3, %v1512_v11, %v890_v4  ;;  %v951_v11 = vpack.c.bf16 %v938_v1, %v937_v48 }
 0x8b7   :  { %v899_v44 = vsel %vm896_vm4, %v898_v39, %v894_v13 }
 0x8b8   :  { %v926_v56 = vmul.f32 %v925_v38, %v899_v44 }
 0x8ba   :  { %v927_v18 = vadd.f32 %v926_v56, %v880_v15 }
 0x90c   :  { %v903_v26 = vpop.permute.xlu1 %902 }
 0x90d   :  { %v905_v30 = vadd.f32 %v903_v26, %v879_v24 }
 0x90f   :  { %v1417_v33 = vmul.f32 -1.442695, %v905_v30  ;;  %v1010_v30 = vld [vmem:[%s2356_s7] sm:$0xff] }
 0x911   :  { %1513 = vpow2.f32 %v1417_v33 }
 0x917   :  { %v1514_v36 = vpop.eup %1513 }
 0x918   :  { %v909_v37 = vadd.f32 1.0, %v1514_v36  ;;  %v2107_v36 = vpack.c.bf16 %v1011_v31, %v1010_v30 }
 0x91a   :  { %1515 = vrcp.f32 %v909_v37  ;;  %v921_v7 = vand.u32 2147483648, %v909_v37  ;;  %v919_v5 = vand.u32 2147483647, %v909_v37  ;;  %vm915_vm6 = vweird.f32 %v909_v37 }
 0x91b   :  { %1517 = vtanh.f32 %v927_v18 }
 0x91c   :  { %v922_v50 = vor.u32 1.1754944e-38, %v921_v7  ;;  %vm920_vm8 = vcmp.eq.f32.partialorder %v919_v5, 8.507059e+37  ;;  %v1015_v7 = vld [vmem:[%s2356_s7 + $0x28] sm:$0xff]  ;;  %v1016_v5 = vld [vmem:[%s2356_s7 + $0x30] sm:$0xff] }
 0x920   :  { %v1516_v40 = vpop.eup %1515 }
 0x921   :  { %v911_v41 = vmul.f32 %v1516_v40, %v909_v37  ;;  %vm916_vm5 = vweird.f32 %v1516_v40  ;;  %v1518_v58 = vpop.eup %1517  ;;  %v1012_v37 = vld [vmem:[%s2356_s7 + $0x10] sm:$0xff] }
 0x922   :  { %vm917_vm7 = vmor %vm915_vm6, %vm916_vm5 }
 0x923   :  { %v912_v14 = vsub.f32 1.0, %v911_v41 }
 0x925   :  { %v913_v49 = vmul.f32 %v1516_v40, %v912_v14  ;;  %v1014_v14 = vld [vmem:[%s2356_s7 + $0x20] sm:$0xff] }
 0x927   :  { %v914_v47 = vadd.f32 %v1516_v40, %v913_v49  ;;  %v2125_v49 = vpack.c.bf16 %v1015_v7, %v1014_v14 }
 0x929   :  { %v918_v51 = vsel %vm917_vm7, %v1516_v40, %v914_v47  ;;  %v1013_v40 = vld [vmem:[%s2356_s7 + $0x18] sm:$0xff] }
 0x92a   :  { %v923_v52 = vsel %vm920_vm8, %v922_v50, %v918_v51  ;;  %v2116_v41 = vpack.c.bf16 %v1013_v40, %v1012_v37  ;;  %v1017_v47 = vld [vmem:[%s2356_s7 + $0x38] sm:$0xff]  ;;  %v1018_v51 = vld [vmem:[%s2356_s7 + $0x40] sm:$0xff] }
 0x92b   :  { %v929_v53 = vsub.f32 1.0, %v923_v52  ;;  %v931_v60 = vmul.f32 %v923_v52, %v2008_v9  ;;  %v2134_v50 = vpack.c.bf16 %v1017_v47, %v1016_v5  ;;  %v1019_v52 = vld [vmem:[%s2356_s7 + $0x48] sm:$0xff] }
 0x92d   :  { %v930_v25 = vmul.f32 %v1518_v58, %v929_v53  ;;  %v2143_v53 = vpack.c.bf16 %v1019_v52, %v1018_v51  ;;  %v1020_v58 = vld [vmem:[%s2356_s7 + $0x50] sm:$0xff] }
 0x92f   :  { %v932_v61 = vadd.f32 %v931_v60, %v930_v25  ;;  %v1021_v25 = vld [vmem:[%s2356_s7 + $0x58] sm:$0xff] }
 0x930   :  { %v2152_v60 = vpack.c.bf16 %v1021_v25, %v1020_v58 }
 0x931   :  { %v933_v10 = vsel %vm66_vm0, %v1830_v23, %v932_v61  ;;  %v940_v29 = vsel %vm66_vm0, %v932_v61, %v1830_v23  ;;  %v1022_v61 = vld [vmem:[%s2356_s7 + $0x60] sm:$0xff] }
 0x932   :  { %v949_v62 = vpack.c.bf16 %v934_v12, %v933_v10  ;;  %v952_v54 = vpack.c.bf16 %v940_v29, %v939_v35  ;;  %v1023_v10 = vld [vmem:[%s2356_s7 + $0x68] sm:$0xff] }
 0x933   :  { %v2161_v12 = vpack.c.bf16 %v1023_v10, %v1022_v61 }
 0x934   :  { %1418 = vmatmul.msk.bf16.vlgmr.msrb.gmra.mxu0 %vm162_vm9, %v949_v62  ;;  %v1024_v62 = vld [vmem:[%s2356_s7 + $0x70] sm:$0xff] }
 0x935   :  { %v2170_v27 = vpack.c.bf16 %v1025_v46, %v1024_v62 }
 0x944   :  { %1419 = vmatmul.msk.bf16.gmra.mxu0 %vm162_vm9, %v950_v45 }
 0x954   :  { %1420 = vmatmul.msk.bf16.gmra.mxu0 %vm162_vm9, %v951_v11 }
 0x964   :  { %1421 = vmatmul.msk.bf16.gmra.mxu0 %vm162_vm9, %v952_v54 }
 0x9b1   :  { %v982_v59 = vpop.f32.mrf.mxu0 }
 0x9b2   :  { %v983_v55 = vadd.f32 %v1437_v32, %v982_v59 }
 0x9b4   :  { %v1002_v24 = vmax.f32 %v983_v55, 0.0 }
 0x9b6   :  { %v1042_v33 = vpack.c.bf16 %v1002_v24, %v1002_v24  ;;  %v2173_v11 = vmul.f32 0.05, %v1002_v24 }
 0x9b9   :  { %v984_v63 = vpop.f32.mrf.mxu0 }
 0x9ba   :  { %v985_v20 = vadd.f32 %v1437_v32, %v984_v63 }
 0x9bc   :  { %v1003_v21 = vmax.f32 %v985_v20, 0.0 }
 0x9be   :  { %v1043_v26 = vpack.c.bf16 %v1003_v21, %v1003_v21 }
 0x9c1   :  { %v987_v43 = vpop.f32.mrf.mxu0 }
 0x9c2   :  { %v988_v8 = vadd.f32 %v1437_v32, %v987_v43 }
 0x9c4   :  { %v2095_v0 = vmax.f32 %v988_v8, 0.0 }
 0x9c6   :  { %v1044_v22 = vpack.c.bf16 %v2095_v0, %v2095_v0 }
 0x9c9   :  { %v989_v57 = vpop.f32.mrf.mxu0 }
 0x9ca   :  { %v990_v16 = vadd.f32 %v1437_v32, %v989_v57 }
 0x9cc   :  { %v2091_v17 = vmax.f32 %v990_v16, 0.0 }
 0x9ce   :  { %v1045_v34 = vpack.c.bf16 %v2091_v17, %v2091_v17 }
 0x9d1   :  { %v992_v4 = vpop.f32.mrf.mxu0 }
 0x9d2   :  { %v993_v15 = vadd.f32 %v1437_v32, %v992_v4  ;;  %v2183_v4 = vmul.f32 0.05, %v1003_v21 }
 0x9d4   :  { %v2087_v19 = vmax.f32 %v993_v15, 0.0 }
 0x9d6   :  { %v1046_v6 = vpack.c.bf16 %v2087_v19, %v2087_v19 }
 0x9d9   :  { %v994_v39 = vpop.f32.mrf.mxu0 }
 0x9da   :  { %v995_v42 = vadd.f32 %v1437_v32, %v994_v39 }
 0x9dc   :  { %v2083_v18 = vmax.f32 %v995_v42, 0.0 }
 0x9de   :  { %v1047_v28 = vpack.c.bf16 %v2083_v18, %v2083_v18  ;;  %v2207_v46 = vmul.f32 0.05, %v2083_v18 }
 0x9e1   :  { %v997_v3 = vpop.f32.mrf.mxu0 }
 0x9e2   :  { %v998_v23 = vadd.f32 %v1437_v32, %v997_v3 }
 0x9e4   :  { %v2079_v9 = vmax.f32 %v998_v23, 0.0 }
 0x9e6   :  { %v1048_v2 = vpack.c.bf16 %v2079_v9, %v2079_v9  ;;  %v2201_v51 = vmul.f32 0.05, %v2079_v9 }
 0x9e9   :  { %v999_v13 = vpop.f32.mrf.mxu0 }
 0x9ea   :  { %v1000_v38 = vadd.f32 %v1437_v32, %v999_v13 }
 0x9ec   :  { %v2077_v44 = vmax.f32 %v1000_v38, 0.0 }
 0x9ee   :  { %v1049_v56 = vpack.c.bf16 %v2077_v44, %v2077_v44  ;;  %v2198_v5 = vmul.f32 0.05, %v2077_v44 }
 0x9f0   :  { %1050 = vmatpush.bf16.msrb.mxu1 %v1049_v56  ;;  %v2188_v56 = vmul.f32 0.05, %v2095_v0 }
 0x9f4   :  { %1051 = vmatpush.bf16.msrb.mxu1 %v1048_v2 }
 0x9f8   :  { %1052 = vmatpush.bf16.msrb.mxu1 %v1047_v28 }
 0x9fc   :  { %1053 = vmatpush.bf16.msrb.mxu1 %v1046_v6 }
 0xa00   :  { %1054 = vmatpush.bf16.msrb.mxu1 %v1045_v34  ;;  %v2193_v34 = vmul.f32 0.05, %v2091_v17 }
 0xa04   :  { %1055 = vmatpush.bf16.msrb.mxu1 %v1044_v22 }
 0xa08   :  { %1056 = vmatpush.bf16.msrb.mxu1 %v1043_v26 }
 0xa0c   :  { %1057 = vmatpush.bf16.msrb.mxu1 %v1042_v33 }
 0xa0f   :  { %1058 = vmatmul.bf16.vlgmr.msrb.gmra.mxu1 %v2107_v36 }
 0xa1f   :  { %1063 = vmatmul.bf16.gmra.mxu1 %v2116_v41 }
 0xa2f   :  { %1068 = vmatmul.bf16.gmra.mxu1 %v2125_v49 }
 0xa3f   :  { %1073 = vmatmul.bf16.gmra.mxu1 %v2134_v50 }
 0xa4f   :  { %1078 = vmatmul.bf16.gmra.mxu1 %v2143_v53 }
 0xa5f   :  { %1083 = vmatmul.bf16.gmra.mxu1 %v2152_v60 }
 0xa6f   :  { %1088 = vmatmul.bf16.gmra.mxu1 %v2161_v12 }
 0xa7f   :  { %1093 = vmatmul.bf16.gmra.mxu1 %v2170_v27 }
 0xa8c   :  { %v1059_v45 = vpop.f32.mrf.mxu1 }
 0xa8d   :  { %v1099_v1 = vmul.f32 0.95, %v1059_v45 }
 0xa8f   :  { %v2176_v35 = vadd.f32 %v1099_v1, %v2173_v11 }
 0xa94   :  { %v1061_v48 = vpop.f32.mrf.mxu1 }
 0xa95   :  { %v1100_v29 = vmul.f32 0.95, %v1061_v48 }
 0xa97   :  { %v2179_v54 = vadd.f32 %v1100_v29, %v2173_v11  ;;  %v2212_v29 = vmul.f32 0.05, %v2087_v19  ;;  %v1222_v19 = vld [vmem:[%s2357_s8 + $0x10] sm:$0xff] }
 0xa99   :  { %v1131_v59 = vpack.c.bf16 %v2179_v54, %v2176_v35  ;;  %v1223_v35 = vld [vmem:[%s2357_s8 + $0x18] sm:$0xff] }
 0xa9a   :  { %v1233_v54 = vpack.c.bf16 %v1223_v35, %v1222_v19  ;;  %v2267_v19 = vld [vmem:[%s2358_s9] ss:$0 sm:$0xff] }
 0xa9c   :  { %v1064_v63 = vpop.f32.mrf.mxu1  ;;  %1268 = vmatpush.bf16.msrb.mxu3 %v1233_v54 }
 0xa9d   :  { %v1101_v43 = vmul.f32 0.95, %v1064_v63 }
 0xa9f   :  { %v1117_v3 = vadd.f32 %v1101_v43, %v2183_v4 }
 0xaa4   :  { %v1066_v57 = vpop.f32.mrf.mxu1 }
 0xaa5   :  { %v1102_v39 = vmul.f32 0.95, %v1066_v57 }
 0xaa7   :  { %v1118_v32 = vadd.f32 %v1102_v39, %v2183_v4 }
 0xaa9   :  { %v1132_v13 = vpack.c.bf16 %v1118_v32, %v1117_v3 }
 0xaac   :  { %v1069_v23 = vpop.f32.mrf.mxu1 }
 0xaad   :  { %v1103_v38 = vmul.f32 0.95, %v1069_v23 }
 0xaaf   :  { %v1119_v2 = vadd.f32 %v1103_v38, %v2188_v56 }
 0xab4   :  { %v1071_v42 = vpop.f32.mrf.mxu1 }
 0xab5   :  { %v1104_v15 = vmul.f32 0.95, %v1071_v42 }
 0xab7   :  { %v1120_v16 = vadd.f32 %v1104_v15, %v2188_v56 }
 0xab9   :  { %v1133_v28 = vpack.c.bf16 %v1120_v16, %v1119_v2 }
 0xabc   :  { %v1074_v8 = vpop.f32.mrf.mxu1 }
 0xabd   :  { %v1105_v6 = vmul.f32 0.95, %v1074_v8 }
 0xabf   :  { %v1121_v21 = vadd.f32 %v1105_v6, %v2193_v34 }
 0xac4   :  { %v1076_v20 = vpop.f32.mrf.mxu1 }
 0xac5   :  { %v1106_v55 = vmul.f32 0.95, %v1076_v20 }
 0xac7   :  { %v1122_v22 = vadd.f32 %v1106_v55, %v2193_v34 }
 0xac9   :  { %v1134_v24 = vpack.c.bf16 %v1122_v22, %v1121_v21 }
 0xacc   :  { %v1079_v0 = vpop.f32.mrf.mxu1 }
 0xacd   :  { %v1107_v63 = vmul.f32 0.95, %v1079_v0 }
 0xacf   :  { %v1123_v18 = vadd.f32 %v1107_v63, %v2212_v29 }
 0xad4   :  { %v1081_v26 = vpop.f32.mrf.mxu1 }
 0xad5   :  { %v1108_v1 = vmul.f32 0.95, %v1081_v26 }
 0xad7   :  { %v1124_v57 = vadd.f32 %v1108_v1, %v2212_v29 }
 0xad9   :  { %v1135_v3 = vpack.c.bf16 %v1124_v57, %v1123_v18 }
 0xadc   :  { %v1084_v30 = vpop.f32.mrf.mxu1 }
 0xadd   :  { %v1109_v45 = vmul.f32 0.95, %v1084_v30 }
 0xadf   :  { %v1125_v43 = vadd.f32 %v1109_v45, %v2207_v46 }
 0xae4   :  { %v1086_v31 = vpop.f32.mrf.mxu1 }
 0xae5   :  { %v1110_v61 = vmul.f32 0.95, %v1086_v31 }
 0xae7   :  { %v1126_v9 = vadd.f32 %v1110_v61, %v2207_v46 }
 0xae9   :  { %v1136_v39 = vpack.c.bf16 %v1126_v9, %v1125_v43 }
 0xaec   :  { %v1089_v33 = vpop.f32.mrf.mxu1 }
 0xaed   :  { %v1111_v52 = vmul.f32 0.95, %v1089_v33 }
 0xaef   :  { %v1127_v44 = vadd.f32 %v1111_v52, %v2201_v51 }
 0xaf4   :  { %v1091_v37 = vpop.f32.mrf.mxu1 }
 0xaf5   :  { %v1112_v17 = vmul.f32 0.95, %v1091_v37 }
 0xaf7   :  { %v1128_v10 = vadd.f32 %v1112_v17, %v2201_v51 }
 0xaf9   :  { %v1137_v48 = vpack.c.bf16 %v1128_v10, %v1127_v44 }
 0xafc   :  { %v1094_v40 = vpop.f32.mrf.mxu1 }
 0xafd   :  { %v1113_v14 = vmul.f32 0.95, %v1094_v40 }
 0xaff   :  { %v1129_v58 = vadd.f32 %v1113_v14, %v2198_v5 }
 0xb04   :  { %v1096_v7 = vpop.f32.mrf.mxu1 }
 0xb05   :  { %v1114_v47 = vmul.f32 0.95, %v1096_v7 }
 0xb07   :  { %v1130_v25 = vadd.f32 %v1114_v47, %v2198_v5 }
 0xb09   :  { %v1138_v62 = vpack.c.bf16 %v1130_v25, %v1129_v58 }
 0xb0b   :  { %1139 = vmatpush.bf16.msra.mxu2 %v1138_v62 }
 0xb0f   :  { %1140 = vmatpush.bf16.msra.mxu2 %v1137_v48 }
 0xb13   :  { %1141 = vmatpush.bf16.msra.mxu2 %v1136_v39 }
 0xb17   :  { %1142 = vmatpush.bf16.msra.mxu2 %v1135_v3 }
 0xb1b   :  { %1143 = vmatpush.bf16.msra.mxu2 %v1134_v24 }
 0xb1f   :  { %1144 = vmatpush.bf16.msra.mxu2 %v1133_v28 }
 0xb23   :  { %1145 = vmatpush.bf16.msra.mxu2 %v1132_v13 }
 0xb27   :  { %1146 = vmatpush.bf16.msra.mxu2 %v1131_v59 }
 0xb2a   :  { %1147 = vmatmul.bf16.vlgmr.msra.gmra.mxu2 %v2107_v36  ;;  %v1220_v36 = vld [vmem:[%s2357_s8] sm:$0xff] }
 0xb3a   :  { %1152 = vmatmul.bf16.gmra.mxu2 %v2116_v41  ;;  %v1221_v41 = vld [vmem:[%s2357_s8 + $0x8] sm:$0xff] }
 0xb4a   :  { %1157 = vmatmul.bf16.gmra.mxu2 %v2125_v49  ;;  %v1232_v49 = vpack.c.bf16 %v1221_v41, %v1220_v36 }
 0xb4c   :  { %1269 = vmatpush.bf16.msrb.mxu3 %v1232_v49 }
 0xb5a   :  { %1162 = vmatmul.bf16.gmra.mxu2 %v2134_v50 }
 0xb6a   :  { %1167 = vmatmul.bf16.gmra.mxu2 %v2143_v53 }
 0xb7a   :  { %1172 = vmatmul.bf16.gmra.mxu2 %v2152_v60 }
 0xb8a   :  { %1177 = vmatmul.bf16.gmra.mxu2 %v2161_v12 }
 0xb9a   :  { %1182 = vmatmul.bf16.gmra.mxu2 %v2170_v27 }
 0xbad   :  { %v1148_v50 = vpop.f32.mrf.mxu2 }
 0xbae   :  { %v1188_v53 = vmul.f32 0.95, %v1148_v50 }
 0xbb0   :  { %v1204_v32 = vadd.f32 %v1188_v53, %v2173_v11 }
 0xbb5   :  { %v1150_v60 = vpop.f32.mrf.mxu2 }
 0xbb6   :  { %v1189_v59 = vmul.f32 0.95, %v1150_v60 }
 0xbb8   :  { %v1205_v12 = vadd.f32 %v1189_v59, %v2173_v11 }
 0xbba   :  { %v1224_v13 = vpack.c.bf16 %v1205_v12, %v1204_v32 }
 0xbbc   :  { %1422 = vmatmul.msk.bf16.vlgmr.msrb.gmra.mxu3 %vm66_vm0, %v1224_v13 }
 0xbbd   :  { %v1153_v23 = vpop.f32.mrf.mxu2 }
 0xbbe   :  { %v1190_v38 = vmul.f32 0.95, %v1153_v23 }
 0xbc0   :  { %v1206_v2 = vadd.f32 %v1190_v38, %v2183_v4 }
 0xbc5   :  { %v1155_v42 = vpop.f32.mrf.mxu2 }
 0xbc6   :  { %v1191_v15 = vmul.f32 0.95, %v1155_v42 }
 0xbc8   :  { %v1207_v16 = vadd.f32 %v1191_v15, %v2183_v4 }
 0xbca   :  { %v1225_v27 = vpack.c.bf16 %v1207_v16, %v1206_v2 }
 0xbcc   :  { %1423 = vmatmul.msk.bf16.gmra.mxu3 %vm66_vm0, %v1225_v27 }
 0xbcd   :  { %v1158_v28 = vpop.f32.mrf.mxu2 }
 0xbce   :  { %v1192_v8 = vmul.f32 0.95, %v1158_v28 }
 0xbd0   :  { %v1208_v11 = vadd.f32 %v1192_v8, %v2188_v56 }
 0xbd5   :  { %v1160_v6 = vpop.f32.mrf.mxu2 }
 0xbd6   :  { %v1193_v20 = vmul.f32 0.95, %v1160_v6 }
 0xbd8   :  { %v1209_v55 = vadd.f32 %v1193_v20, %v2188_v56 }
 0xbda   :  { %v1226_v21 = vpack.c.bf16 %v1209_v55, %v1208_v11 }
 0xbdc   :  { %1424 = vmatmul.msk.bf16.gmra.mxu3 %vm66_vm0, %v1226_v21 }
 0xbdd   :  { %v1163_v22 = vpop.f32.mrf.mxu2 }
 0xbde   :  { %v1194_v24 = vmul.f32 0.95, %v1163_v22 }
 0xbe0   :  { %v1210_v4 = vadd.f32 %v1194_v24, %v2193_v34 }
 0xbe5   :  { %v1165_v0 = vpop.f32.mrf.mxu2 }
 0xbe6   :  { %v1195_v26 = vmul.f32 0.95, %v1165_v0 }
 0xbe8   :  { %v1211_v30 = vadd.f32 %v1195_v26, %v2193_v34 }
 0xbea   :  { %v1227_v31 = vpack.c.bf16 %v1211_v30, %v1210_v4 }
 0xbec   :  { %1425 = vmatmul.msk.bf16.gmra.mxu3 %vm66_vm0, %v1227_v31 }
 0xbed   :  { %v1168_v33 = vpop.f32.mrf.mxu2 }
 0xbee   :  { %v1196_v37 = vmul.f32 0.95, %v1168_v33 }
 0xbf0   :  { %v1212_v56 = vadd.f32 %v1196_v37, %v2212_v29 }
 0xbf5   :  { %v1170_v40 = vpop.f32.mrf.mxu2 }
 0xbf6   :  { %v1197_v14 = vmul.f32 0.95, %v1170_v40 }
 0xbf8   :  { %v1213_v7 = vadd.f32 %v1197_v14, %v2212_v29 }
 0xbfa   :  { %v1228_v17 = vpack.c.bf16 %v1213_v7, %v1212_v56 }
 0xbfc   :  { %1426 = vmatmul.msk.bf16.gmra.mxu3 %vm66_vm0, %v1228_v17 }
 0xbfd   :  { %v1173_v47 = vpop.f32.mrf.mxu2 }
 0xbfe   :  { %v1198_v52 = vmul.f32 0.95, %v1173_v47 }
 0xc00   :  { %v1214_v34 = vadd.f32 %v1198_v52, %v2207_v46 }
 0xc05   :  { %v1175_v58 = vpop.f32.mrf.mxu2 }
 0xc06   :  { %v1199_v25 = vmul.f32 0.95, %v1175_v58 }
 0xc08   :  { %v1215_v61 = vadd.f32 %v1199_v25, %v2207_v46 }
 0xc0a   :  { %v1229_v10 = vpack.c.bf16 %v1215_v61, %v1214_v34 }
 0xc0c   :  { %1427 = vmatmul.msk.bf16.gmra.mxu3 %vm66_vm0, %v1229_v10 }
 0xc0d   :  { %v1178_v62 = vpop.f32.mrf.mxu2 }
 0xc0e   :  { %v1200_v45 = vmul.f32 0.95, %v1178_v62 }
 0xc10   :  { %v1216_v9 = vadd.f32 %v1200_v45, %v2201_v51 }
 0xc15   :  { %v1180_v44 = vpop.f32.mrf.mxu2 }
 0xc16   :  { %v1201_v1 = vmul.f32 0.95, %v1180_v44 }
 0xc18   :  { %v1217_v48 = vadd.f32 %v1201_v1, %v2201_v51 }
 0xc1a   :  { %v1230_v29 = vpack.c.bf16 %v1217_v48, %v1216_v9 }
 0xc1c   :  { %1428 = vmatmul.msk.bf16.gmra.mxu3 %vm66_vm0, %v1230_v29 }
 0xc1d   :  { %v1183_v63 = vpop.f32.mrf.mxu2 }
 0xc1e   :  { %v1202_v43 = vmul.f32 0.95, %v1183_v63 }
 0xc20   :  { %v1218_v46 = vadd.f32 %v1202_v43, %v2198_v5 }
 0xc25   :  { %v1185_v57 = vpop.f32.mrf.mxu2 }
 0xc26   :  { %v1203_v39 = vmul.f32 0.95, %v1185_v57 }
 0xc28   :  { %v1219_v18 = vadd.f32 %v1203_v39, %v2198_v5 }
 0xc2a   :  { %v1231_v3 = vpack.c.bf16 %v1219_v18, %v1218_v46 }
 0xc2c   :  { %1429 = vmatmul.msk.bf16.gmra.mxu3 %vm66_vm0, %v1231_v3 }
 0xc3f   :  { %v1271_v51 = vpop.f32.mrf.mxu3 }
 0xc40   :  { %v1272_v35 = vadd.f32 %v2267_v19, %v1271_v51 }
 0xc42   :  { %vm1311_vm9 = vcmp.gt.f32.partialorder %v1272_v35, 0.0  ;;  %v1327_v54 = vmul.f32 0.01, %v1272_v35 }
 0xc44   :  { %v1343_v36 = vsel %vm1311_vm9, %v1272_v35, %v1327_v54 }
 0xc45   :  { %1360 = vst.msk [vmem:[%s2359_s10] sm:$0xff] %vm1359_vm10, %v1343_v36 }
 0xc47   :  { %v1273_v5 = vpop.f32.mrf.mxu3 }
 0xc48   :  { %v1274_v41 = vadd.f32 %v2267_v19, %v1273_v5 }
 0xc4a   :  { %vm1312_vm0 = vcmp.gt.f32.partialorder %v1274_v41, 0.0  ;;  %v1328_v49 = vmul.f32 0.01, %v1274_v41 }
 0xc4c   :  { %v1344_v50 = vsel %vm1312_vm0, %v1274_v41, %v1328_v49 }
 0xc4d   :  { %1361 = vst.msk [vmem:[%s2359_s10 + $0x8] sm:$0xff] %vm1359_vm10, %v1344_v50 }
 0xc4f   :  { %v1276_v53 = vpop.f32.mrf.mxu3 }
 0xc50   :  { %v1277_v60 = vadd.f32 %v2267_v19, %v1276_v53 }
 0xc52   :  { %vm1313_vm11 = vcmp.gt.f32.partialorder %v1277_v60, 0.0  ;;  %v1329_v59 = vmul.f32 0.01, %v1277_v60 }
 0xc54   :  { %v1345_v32 = vsel %vm1313_vm11, %v1277_v60, %v1329_v59 }
 0xc55   :  { %1362 = vst.msk [vmem:[%s2359_s10 + $0x10] sm:$0xff] %vm1359_vm10, %v1345_v32 }
 0xc57   :  { %v1278_v12 = vpop.f32.mrf.mxu3 }
 0xc58   :  { %v1279_v13 = vadd.f32 %v2267_v19, %v1278_v12 }
 0xc5a   :  { %vm1314_vm12 = vcmp.gt.f32.partialorder %v1279_v13, 0.0  ;;  %v1330_v23 = vmul.f32 0.01, %v1279_v13 }
 0xc5c   :  { %v1346_v38 = vsel %vm1314_vm12, %v1279_v13, %v1330_v23 }
 0xc5d   :  { %1363 = vst.msk [vmem:[%s2359_s10 + $0x18] sm:$0xff] %vm1359_vm10, %v1346_v38 }
 0xc5f   :  { %v1281_v42 = vpop.f32.mrf.mxu3 }
 0xc60   :  { %v1282_v15 = vadd.f32 %v2267_v19, %v1281_v42 }
 0xc62   :  { %vm1315_vm13 = vcmp.gt.f32.partialorder %v1282_v15, 0.0  ;;  %v1331_v2 = vmul.f32 0.01, %v1282_v15 }
 0xc64   :  { %v1347_v16 = vsel %vm1315_vm13, %v1282_v15, %v1331_v2 }
 0xc65   :  { %1364 = vst.msk [vmem:[%s2359_s10 + $0x20] sm:$0xff] %vm1359_vm10, %v1347_v16 }
 0xc67   :  { %v1283_v27 = vpop.f32.mrf.mxu3 }
 0xc68   :  { %v1284_v28 = vadd.f32 %v2267_v19, %v1283_v27 }
 0xc6a   :  { %vm1316_vm14 = vcmp.gt.f32.partialorder %v1284_v28, 0.0  ;;  %v1332_v8 = vmul.f32 0.01, %v1284_v28 }
 0xc6c   :  { %v1348_v6 = vsel %vm1316_vm14, %v1284_v28, %v1332_v8 }
 0xc6d   :  { %1365 = vst.msk [vmem:[%s2359_s10 + $0x28] sm:$0xff] %vm1359_vm10, %v1348_v6 }
 0xc6f   :  { %v1286_v20 = vpop.f32.mrf.mxu3 }
 0xc70   :  { %v1287_v11 = vadd.f32 %v2267_v19, %v1286_v20 }
 0xc72   :  { %vm1317_vm15 = vcmp.gt.f32.partialorder %v1287_v11, 0.0  ;;  %v1333_v55 = vmul.f32 0.01, %v1287_v11 }
 0xc74   :  { %v1349_v21 = vsel %vm1317_vm15, %v1287_v11, %v1333_v55 }
 0xc75   :  { %1366 = vst.msk [vmem:[%s2359_s10 + $0x30] sm:$0xff] %vm1359_vm10, %v1349_v21 }
 0xc77   :  { %v1288_v22 = vpop.f32.mrf.mxu3 }
 0xc78   :  { %v1289_v24 = vadd.f32 %v2267_v19, %v1288_v22 }
 0xc7a   :  { %vm1318_vm1 = vcmp.gt.f32.partialorder %v1289_v24, 0.0  ;;  %v1334_v0 = vmul.f32 0.01, %v1289_v24 }
 0xc7c   :  { %v1350_v26 = vsel %vm1318_vm1, %v1289_v24, %v1334_v0 }
 0xc7d   :  { %1367 = vst.msk [vmem:[%s2359_s10 + $0x38] sm:$0xff] %vm1359_vm10, %v1350_v26 }
 0xc7f   :  { %v1291_v4 = vpop.f32.mrf.mxu3 }
 0xc80   :  { %v1292_v30 = vadd.f32 %v2267_v19, %v1291_v4 }
 0xc82   :  { %vm1319_vm2 = vcmp.gt.f32.partialorder %v1292_v30, 0.0  ;;  %v1335_v31 = vmul.f32 0.01, %v1292_v30 }
 0xc84   :  { %v1351_v33 = vsel %vm1319_vm2, %v1292_v30, %v1335_v31 }
 0xc85   :  { %1368 = vst.msk [vmem:[%s2359_s10 + $0x40] sm:$0xff] %vm1359_vm10, %v1351_v33 }
 0xc87   :  { %v1293_v37 = vpop.f32.mrf.mxu3 }
 0xc88   :  { %v1294_v40 = vadd.f32 %v2267_v19, %v1293_v37 }
 0xc8a   :  { %vm1320_vm3 = vcmp.gt.f32.partialorder %v1294_v40, 0.0  ;;  %v1336_v14 = vmul.f32 0.01, %v1294_v40 }
 0xc8c   :  { %v1352_v56 = vsel %vm1320_vm3, %v1294_v40, %v1336_v14 }
 0xc8d   :  { %1369 = vst.msk [vmem:[%s2359_s10 + $0x48] sm:$0xff] %vm1359_vm10, %v1352_v56 }
 0xc8f   :  { %v1296_v7 = vpop.f32.mrf.mxu3 }
 0xc90   :  { %v1297_v17 = vadd.f32 %v2267_v19, %v1296_v7 }
 0xc92   :  { %vm1321_vm4 = vcmp.gt.f32.partialorder %v1297_v17, 0.0  ;;  %v1337_v47 = vmul.f32 0.01, %v1297_v17 }
 0xc94   :  { %v1353_v52 = vsel %vm1321_vm4, %v1297_v17, %v1337_v47 }
 0xc95   :  { %1370 = vst.msk [vmem:[%s2359_s10 + $0x50] sm:$0xff] %vm1359_vm10, %v1353_v52 }
 0xc97   :  { %v1298_v58 = vpop.f32.mrf.mxu3 }
 0xc98   :  { %v1299_v25 = vadd.f32 %v2267_v19, %v1298_v58 }
 0xc9a   :  { %vm1322_vm5 = vcmp.gt.f32.partialorder %v1299_v25, 0.0  ;;  %v1338_v34 = vmul.f32 0.01, %v1299_v25 }
 0xc9c   :  { %v1354_v61 = vsel %vm1322_vm5, %v1299_v25, %v1338_v34 }
 0xc9d   :  { %1371 = vst.msk [vmem:[%s2359_s10 + $0x58] sm:$0xff] %vm1359_vm10, %v1354_v61 }
 0xc9f   :  { %v1301_v10 = vpop.f32.mrf.mxu3 }
 0xca0   :  { %v1302_v62 = vadd.f32 %v2267_v19, %v1301_v10 }
 0xca2   :  { %vm1323_vm6 = vcmp.gt.f32.partialorder %v1302_v62, 0.0  ;;  %v1339_v45 = vmul.f32 0.01, %v1302_v62 }
 0xca4   :  { %v1355_v44 = vsel %vm1323_vm6, %v1302_v62, %v1339_v45 }
 0xca5   :  { %1372 = vst.msk [vmem:[%s2359_s10 + $0x60] sm:$0xff] %vm1359_vm10, %v1355_v44 }
 0xca7   :  { %v1303_v1 = vpop.f32.mrf.mxu3 }
 0xca8   :  { %v1304_v9 = vadd.f32 %v2267_v19, %v1303_v1 }
 0xcaa   :  { %vm1324_vm7 = vcmp.gt.f32.partialorder %v1304_v9, 0.0  ;;  %v1340_v48 = vmul.f32 0.01, %v1304_v9 }
 0xcac   :  { %v1356_v29 = vsel %vm1324_vm7, %v1304_v9, %v1340_v48 }
 0xcad   :  { %1373 = vst.msk [vmem:[%s2359_s10 + $0x68] sm:$0xff] %vm1359_vm10, %v1356_v29 }
 0xcaf   :  { %v1306_v63 = vpop.f32.mrf.mxu3 }
 0xcb0   :  { %v1307_v43 = vadd.f32 %v2267_v19, %v1306_v63 }
 0xcb2   :  { %vm1325_vm8 = vcmp.gt.f32.partialorder %v1307_v43, 0.0  ;;  %v1341_v57 = vmul.f32 0.01, %v1307_v43 }
 0xcb4   :  { %v1357_v39 = vsel %vm1325_vm8, %v1307_v43, %v1341_v57 }
 0xcb5   :  { %1374 = vst.msk [vmem:[%s2359_s10 + $0x70] sm:$0xff] %vm1359_vm10, %v1357_v39 }
 0xcb7   :  { %v1308_v46 = vpop.f32.mrf.mxu3 }
 0xcb8   :  { %v1309_v18 = vadd.f32 %v2267_v19, %v1308_v46 }
 0xcba   :  { %vm1326_vm9 = vcmp.gt.f32.partialorder %v1309_v18, 0.0  ;;  %v1342_v3 = vmul.f32 0.01, %v1309_v18 }
 0xcbc   :  { %v1358_v51 = vsel %vm1326_vm9, %v1309_v18, %v1342_v3 }
 0xcbd   :  { %1375 = vst.msk [vmem:[%s2359_s10 + $0x78] sm:$0xff] %vm1359_vm10, %v1358_v51 }

</bundles_post_ra>
